<compile_context>
chip_gen: v5e
topology: v5e:2x2
jax: 0.10.0
libtpu: 0.0.40
codegen_flags: <defaults>
</compile_context>

<pallas_src>
import functools

import jax
import jax.numpy as jnp
from jax.experimental import pallas as pl
from jax.experimental.pallas import tpu as pltpu


def _round_up(x, m):
    return (x + m - 1) // m * m


def _num_tensorcores():
    """Best-effort TensorCores-per-chip detection (v7x has 2, v5e/v6e have 1)."""
    try:
        kind = jax.devices()[0].device_kind.lower()
        if "v7" in kind:
            return 2
    except Exception:
        pass
    return 1


# ----------------------------------------------------------------------------
# Pallas kernels: tiled matmul + bias  (the wrapped torch_module's forward)
# ----------------------------------------------------------------------------
def _linear_kernel_f32(x_ref, w_ref, b_ref, o_ref):
    # f32 output: accumulate directly into the K-resident output block.
    # x_ref : [tm, tk] f32 or bf16 ; w_ref : [tk, tn] bf16 ; b_ref : [1, tn] f32
    k = pl.program_id(2)

    @pl.when(k == 0)
    def _init():
        # Bias doubles as the accumulator init -> no finalize pass needed.
        o_ref[...] = jnp.broadcast_to(b_ref[...], o_ref.shape)

    o_ref[...] += jnp.dot(
        x_ref[...].astype(jnp.bfloat16), w_ref[...],
        preferred_element_type=jnp.float32,
    )


def _linear_kernel_scratch(x_ref, w_ref, b_ref, o_ref, acc_ref):
    # Narrow output dtypes (e.g. bf16): keep an f32 VMEM accumulator and cast
    # only once per output tile.
    k = pl.program_id(2)

    @pl.when(k == 0)
    def _init():
        acc_ref[...] = jnp.broadcast_to(b_ref[...], acc_ref.shape)

    acc_ref[...] += jnp.dot(
        x_ref[...].astype(jnp.bfloat16), w_ref[...],
        preferred_element_type=jnp.float32,
    )

    @pl.when(k == pl.num_programs(2) - 1)
    def _finalize():
        o_ref[...] = acc_ref[...].astype(o_ref.dtype)


@functools.partial(
    jax.jit, static_argnames=("d_out", "tm", "tn", "tk", "num_cores"))
def pallas_linear(x, wt_padded, bias_padded, *, d_out,
                  tm=None, tn=1024, tk=1024, num_cores=1):
    """y = x @ wt + bias.

    wt_padded  : [Kp, Np] bf16, already transposed + padded to (tk, tn) multiples.
    bias_padded: [1,  Np] f32, already padded.
    """
    B, D_in = x.shape
    Kp, Np = wt_padded.shape
    assert Kp % tk == 0 and Np % tn == 0
    assert D_in <= Kp and d_out <= Np
    assert bias_padded.shape == (1, Np)

    grid_n = Np // tn
    grid_k = Kp // tk

    # --- M tile: as big as the batch allows (sublane-aligned).  On dual-TC
    # chips (v7x) shrink it (but not below 128) until the parallel grid axes
    # expose at least `num_cores` blocks.
    if tm is None:
        tm = min(1024, _round_up(B, 8))
        while num_cores > 1 and pl.cdiv(B, tm) * grid_n < num_cores and tm > 128:
            tm = max(128, _round_up(tm // 2, 8))
    Bp = _round_up(B, tm)
    grid_m = Bp // tm

    # --- x: pre-cast to bf16 only when it is re-read across >=2 N tiles
    # (halves repeated HBM reads); otherwise keep f32 and cast in-kernel to
    # avoid an extra full HBM pass over x.
    x_in = x.astype(jnp.bfloat16) if grid_n >= 2 else x
    if (Bp, Kp) != (B, D_in):
        x_in = jnp.pad(x_in, ((0, Bp - B), (0, Kp - D_in)))

    out_dtype = x.dtype
    out_itemsize = jnp.dtype(out_dtype).itemsize

    if out_dtype == jnp.float32:
        kernel = _linear_kernel_f32
        scratch_shapes = []
        acc_bytes = 0
    else:
        kernel = _linear_kernel_scratch
        scratch_shapes = [pltpu.VMEM((tm, tn), jnp.float32)]
        acc_bytes = tm * tn * 4

    # VMEM budget: double-buffered in/out tiles + accumulator; cap at 48 MiB
    # (safe on v7x's 64 MiB physical VMEM, generous on v5e/v6e).
    vmem_need = 2 * (tm * tk * x_in.dtype.itemsize
                     + tk * tn * wt_padded.dtype.itemsize
                     + tn * 4
                     + tm * tn * out_itemsize) + acc_bytes
    vmem_limit = int(min(max(vmem_need + (8 << 20), 32 << 20), 48 << 20))

    cost = pl.CostEstimate(
        flops=2 * Bp * Np * Kp,
        transcendentals=0,
        bytes_accessed=(Bp * Kp * x_in.dtype.itemsize
                        + Kp * Np * wt_padded.dtype.itemsize
                        + Bp * Np * out_itemsize),
    )

    out = pl.pallas_call(
        kernel,
        out_shape=jax.ShapeDtypeStruct((Bp, Np), out_dtype),
        grid_spec=pltpu.PrefetchScalarGridSpec(
            num_scalar_prefetch=0,
            grid=(grid_m, grid_n, grid_k),
            in_specs=[
                pl.BlockSpec((tm, tk), lambda i, j, k: (i, k)),
                pl.BlockSpec((tk, tn), lambda i, j, k: (k, j)),
                pl.BlockSpec((1, tn), lambda i, j, k: (0, j)),
            ],
            out_specs=pl.BlockSpec((tm, tn), lambda i, j, k: (i, j)),
            scratch_shapes=scratch_shapes,
        ),
        compiler_params=pltpu.CompilerParams(
            dimension_semantics=("parallel", "parallel", "arbitrary"),
            vmem_limit_bytes=vmem_limit,
        ),
        cost_estimate=cost,
    )(x_in, wt_padded, bias_padded)

    if (Bp, Np) != (B, d_out):
        out = out[:B, :d_out]
    return out


# ----------------------------------------------------------------------------
# SLModel-equivalent wrapper (JAX side)
# ----------------------------------------------------------------------------
class LinearTorchModule:
    """Stand-in for the wrapped `torch_module` (an nn.Linear)."""

    DEFAULT_TM = 1024
    DEFAULT_TN = 1024
    DEFAULT_TK = 1024

    def __init__(self, in_features, out_features, key):
        k_w, k_b = jax.random.split(key)
        bound = 1.0 / (in_features ** 0.5)
        # Deterministic init mimicking nn.Linear's uniform(-1/sqrt(fan_in), ...)
        self.weight = jax.random.uniform(
            k_w, (out_features, in_features), jnp.float32, -bound, bound)
        self.bias = jax.random.uniform(
            k_b, (out_features,), jnp.float32, -bound, bound)
        self.in_features = in_features
        self.out_features = out_features

        # Tile plan for the N / K axes (M tile is picked per call from batch).
        self.tn = min(self.DEFAULT_TN, _round_up(out_features, 128))
        self.tk = min(self.DEFAULT_TK, _round_up(in_features, 128))
        self.num_cores = _num_tensorcores()

        # MXU-ready operands, prepared ONCE: transpose + bf16 cast + pad to
        # tile multiples.  The forward path never re-transposes / re-pads.
        Kp = _round_up(in_features, self.tk)
        Np = _round_up(out_features, self.tn)
        wt = jnp.asarray(self.weight.T, dtype=jnp.bfloat16)
        if (Kp, Np) != (in_features, out_features):
            wt = jnp.pad(wt, ((0, Kp - in_features), (0, Np - out_features)))
        self.weight_t_bf16 = wt
        b2 = self.bias.astype(jnp.float32).reshape(1, out_features)
        if Np != out_features:
            b2 = jnp.pad(b2, ((0, 0), (0, Np - out_features)))
        self.bias_padded = b2

    def forward(self, x):
        return pallas_linear(
            x, self.weight_t_bf16, self.bias_padded,
            d_out=self.out_features, tn=self.tn, tk=self.tk,
            num_cores=self.num_cores)


class SLModel:
    """JAX/Pallas port of PyJet's SLModel forward-pass semantics."""

    def __init__(self, torch_module=None):
        self.loss_in = []
        self.torch_module = torch_module

    def forward(self, *inputs, **kwargs):
        if self.torch_module is not None:
            self.loss_in = self.torch_module.forward(*inputs, **kwargs)
            return self.loss_in
        raise NotImplementedError()

    __call__ = forward

    # TODO(synk): training/optimizer/loss-manager/callback machinery
    # (train_on_batch, fit_generator, etc.) is host-side orchestration with no
    # Pallas equivalent.


# ----------------------------------------------------------------------------
if __name__ == "__main__":
    key = jax.random.PRNGKey(0)
    k_in, k_mod = jax.random.split(key)

    # Small shapes; default 1024-class tiles clamp to (tm<=256, tn=512, tk=512).
    B, D_IN, D_OUT = 256, 512, 512
    x = jax.random.normal(k_in, (B, D_IN), jnp.float32)

    model = SLModel(torch_module=LinearTorchModule(D_IN, D_OUT, k_mod))
    out = model(x)
    out = jax.block_until_ready(out)

    tmod = model.torch_module
    wt_bf16 = jnp.asarray(tmod.weight.T, dtype=jnp.bfloat16)
    # Reference with the same bf16-input / fp32-accumulate numerics.
    ref = jnp.dot(x.astype(jnp.bfloat16), wt_bf16,
                  preferred_element_type=jnp.float32) + tmod.bias
    ref_fp32 = x @ tmod.weight.T + tmod.bias

    assert out.shape == (B, D_OUT)
    assert jnp.allclose(out, ref, atol=1e-3, rtol=1e-3)
    assert jnp.allclose(out, ref_fp32, atol=5e-2, rtol=5e-2)

    # Extra validation: force small tiles so the (M, N, K) multi-block grid
    # and the K-resident accumulation path are exercised (grid = (4, 4, 4)).
    out_small = pallas_linear(
        x, tmod.weight_t_bf16, tmod.bias_padded, d_out=D_OUT,
        tm=64, tn=128, tk=128, num_cores=1)
    out_small = jax.block_until_ready(out_small)
    assert jnp.allclose(out_small, ref, atol=1e-3, rtol=1e-3)

    # Extra validation: bf16 input/output exercises the scratch-accumulator path.
    out_bf16 = jax.block_until_ready(model(x.astype(jnp.bfloat16)))
    assert out_bf16.dtype == jnp.bfloat16
    assert jnp.allclose(out_bf16.astype(jnp.float32), ref, atol=2e-2, rtol=2e-2)

    print("KERNEL_OK")
</pallas_src>

<mosaic_0001>
module attributes {stable_mosaic.version = 11 : i64} {
  func.func @_linear_kernel_f32(%arg0: i32, %arg1: i32, %arg2: i32, %arg3: memref<256x512xf32, #tpu.memory_space<vmem>>, %arg4: memref<512x512xbf16, #tpu.memory_space<vmem>>, %arg5: memref<1x512xf32, #tpu.memory_space<vmem>>, %arg6: memref<256x512xf32, #tpu.memory_space<vmem>>) attributes {dimension_semantics = [#tpu.dimension_semantics<parallel>, #tpu.dimension_semantics<parallel>, #tpu.dimension_semantics<arbitrary>], iteration_bounds = array<i64: 1, 1, 1>, scalar_prefetch = 0 : i64, scratch_operands = 0 : i64, tpu.core_type = #tpu.core_type<tc>, window_params = [{transform_indices = @transform_0, window_bounds = array<i64: 256, 512>}, {transform_indices = @transform_1, window_bounds = array<i64: 512, 512>}, {transform_indices = @transform_2, window_bounds = array<i64: 1, 512>}, {transform_indices = @transform_3, window_bounds = array<i64: 256, 512>}]} {
    %c0_i32 = arith.constant 0 : i32
    %0 = arith.cmpi eq, %arg2, %c0_i32 : i32
    %1 = arith.extui %0 : i1 to i32
    %c0_i32_0 = arith.constant 0 : i32
    %2 = arith.cmpi ne, %1, %c0_i32_0 : i32
    scf.if %2 {
      %c0_8 = arith.constant 0 : index
      %c0_9 = arith.constant 0 : index
      %10 = vector.load %arg5[%c0_8, %c0_9] : memref<1x512xf32, #tpu.memory_space<vmem>>, vector<1x512xf32>
      %11 = vector.shape_cast %10 : vector<1x512xf32> to vector<1x512xf32>
      %12 = vector.broadcast %11 : vector<1x512xf32> to vector<256x512xf32>
      %c0_10 = arith.constant 0 : index
      %c0_11 = arith.constant 0 : index
      %13 = vector.load %arg6[%c0_10, %c0_11] : memref<256x512xf32, #tpu.memory_space<vmem>>, vector<256x512xf32>
      tpu.vector_store %arg6[%c0_10, %c0_11], %12 {strides = array<i32>} : memref<256x512xf32, #tpu.memory_space<vmem>>, vector<256x512xf32>,
    } else {
    }
    %c0 = arith.constant 0 : index
    %c0_1 = arith.constant 0 : index
    %3 = vector.load %arg6[%c0, %c0_1] : memref<256x512xf32, #tpu.memory_space<vmem>>, vector<256x512xf32>
    %c0_2 = arith.constant 0 : index
    %c0_3 = arith.constant 0 : index
    %4 = vector.load %arg3[%c0_2, %c0_3] : memref<256x512xf32, #tpu.memory_space<vmem>>, vector<256x512xf32>
    %5 = arith.truncf %4 : vector<256x512xf32> to vector<256x512xbf16>
    %c0_4 = arith.constant 0 : index
    %c0_5 = arith.constant 0 : index
    %6 = vector.load %arg4[%c0_4, %c0_5] : memref<512x512xbf16, #tpu.memory_space<vmem>>, vector<512x512xbf16>
    %cst = arith.constant dense<0.000000e+00> : vector<256x512xf32>
    %7 = tpu.matmul %5, %6, %cst {dimension_numbers = #tpu.dot_dimension_numbers<[1], [0], [0], [1], [0, 0, 1, 1], [], []>} : vector<256x512xbf16>, vector<512x512xbf16>, vector<256x512xf32> -> vector<256x512xf32>
    %8 = arith.addf %3, %7 : vector<256x512xf32>
    %c0_6 = arith.constant 0 : index
    %c0_7 = arith.constant 0 : index
    %9 = vector.load %arg6[%c0_6, %c0_7] : memref<256x512xf32, #tpu.memory_space<vmem>>, vector<256x512xf32>
    tpu.vector_store %arg6[%c0_6, %c0_7], %8 {strides = array<i32>} : memref<256x512xf32, #tpu.memory_space<vmem>>, vector<256x512xf32>,
    return
  }
  func.func @transform_0(%arg0: i32, %arg1: i32, %arg2: i32) -> (i32, i32) {
    %c0_i32 = arith.constant 0 : i32
    return %arg0, %arg2 : i32, i32
  }
  func.func @transform_1(%arg0: i32, %arg1: i32, %arg2: i32) -> (i32, i32) {
    %c0_i32 = arith.constant 0 : i32
    return %arg2, %arg1 : i32, i32
  }
  func.func @transform_2(%arg0: i32, %arg1: i32, %arg2: i32) -> (i32, i32) {
    %c0_i32 = arith.constant 0 : i32
    %c0_i32_0 = arith.constant 0 : i32
    return %c0_i32, %arg1 : i32, i32
  }
  func.func @transform_3(%arg0: i32, %arg1: i32, %arg2: i32) -> (i32, i32) {
    %c0_i32 = arith.constant 0 : i32
    return %arg0, %arg1 : i32, i32
  }
}

</mosaic_0001>

<bundles_post_ra>
// kernel: pallas_linear.1
= control target key start
LH: loop header
LB: loop body
LE: loop exit
PB: predicated region body
PF: predicated region fallthrough
CT: control target
= control target key end

     0   :  { %8 = vsyncpa [#allocation3], 0  ;;  %s4310_s0 = inlined_call_operand.hbm [shape: f32[256,512], index: 0, kind: input, shape index: {}]   ;;  %s4311_s1 = inlined_call_operand.hbm [shape: bf16[512,512], index: 1, kind: input, shape index: {}]   ;;  %s4312_s2 = inlined_call_operand.hbm [shape: f32[1,512], index: 2, kind: input, shape index: {}]   ;;  %s4313_s3 = inlined_call_operand.hbm [shape: f32[256,512], index: 3, kind: output, shape index: {}]  }
   0x1   :  { %9 = vsyncpa [#allocation6], 0  ;;  %s28_s14 = sshll.u32 %s4311_s1, 4  ;;  %s29_s14 = int_to_ptr.hbm [resolvable:$true] %s28_s14 }
   0x2   :  { %10 = vsyncpa [#allocation4], 0  ;;  %s3743_s15 = smov [#allocation5]   ;;  %s15_s19 = sshll.u32 %s4310_s0, 4  ;;  %s16_s19 = int_to_ptr.hbm [resolvable:$true] %s15_s19 }
   0x3   :  { %s30_s16 = sshll.u32 %s3743_s15, 4  ;;  %s3744_s20 = smov 256   ;;  %s31_s16 = int_to_ptr.vmem [resolvable:$true] %s30_s16 }
   0x4   :  { %s3745_s21 = smov 16   ;;  %s3746_s22 = smov [#allocation2]  }
   0x5   :  { %36 = dma.hbm_to_vmem [thread:$0]  %s29_s14, 16384, %s31_s16, [#allocation6], %s3744_s20, %s3744_s20, %s3745_s21  }
   0x6   :  { %s17_s23 = sshll.u32 %s3746_s22, 4  ;;  %s3747_s24 = smov 512   ;;  %s18_s23 = int_to_ptr.vmem [resolvable:$true] %s17_s23 }
   0x7   :  { %s3748_s25 = smov 32   ;;  %s42_s27 = sshll.u32 %s4312_s2, 4  ;;  %s43_s27 = int_to_ptr.hbm [resolvable:$true] %s42_s27 }
   0x8   :  { %23 = dma.hbm_to_vmem [thread:$0]  %s16_s19, 16384, %s18_s23, [#allocation3], %s3747_s24, %s3747_s24, %s3748_s25  }
   0x9   :  { %s3749_s28 = smov [#allocation7]  }
   0xa   :  { %s44_s0 = sshll.u32 %s3749_s28, 4  ;;  %s45_s0 = int_to_ptr.vmem [resolvable:$true] %s44_s0 }
   0xb   :  { %47 = dma.hbm_to_vmem [thread:$0]  %s43_s27, 64, %s45_s0, [#allocation6]  }
   0xc   :  { %3737 = dma.done.wait [#allocation3], 16384  }
   0xd   :  { %3738 = vsyncadd [#allocation3], 4294950912 }
   0xe   :  { %3739 = dma.done.wait [#allocation6], 16448  }
   0xf   :  { %3740 = vsyncadd [#allocation6], 4294950848  ;;  %v3104_v0 = vld [vmem:[#allocation5 + $0xe0] sm:$0xf]  ;;  %v3532_v1 = vld [vmem:[#allocation5 + $0xec] sm:$0xf0] }
  0x10   :  { %v3232_v2 = vld [vmem:[#allocation5 + $0x1e0] sm:$0xf]  ;;  %v3105_v3 = vor.u32 %v3532_v1, %v3104_v0  ;;  %v3564_v4 = vld [vmem:[#allocation5 + $0x1ec] sm:$0xf0]  ;;  %s3750_s2 = smov [#allocation8]   ;;  %s2976_s5 = sshll.u32 %s4313_s3, 4  ;;  %s2977_s5 = int_to_ptr.hbm [resolvable:$true] %s2976_s5 }
  0x11   :  { %v3360_v5 = vld [vmem:[#allocation5 + $0x2e0] sm:$0xf]  ;;  %v3596_v6 = vld [vmem:[#allocation5 + $0x2ec] sm:$0xf0]  ;;  %v3233_v7 = vor.u32 %v3564_v4, %v3232_v2  ;;  %s2974_s29 = sshll.u32 %s3750_s2, 4  ;;  %s2975_s29 = int_to_ptr.vmem [resolvable:$true] %s2974_s29 }
  0x12   :  { %v3361_v8 = vor.u32 %v3596_v6, %v3360_v5  ;;  %v3488_v9 = vld [vmem:[#allocation5 + $0x3e0] sm:$0xf]  ;;  %v3628_v10 = vld [vmem:[#allocation5 + $0x3ec] sm:$0xf0]  ;;  %1290 = vmatpush.bf16.msra.mxu0 %v3105_v3 }
  0x13   :  { %v3088_v11 = vld [vmem:[#allocation5 + $0xc0] sm:$0xf]  ;;  %v3489_v12 = vor.u32 %v3628_v10, %v3488_v9  ;;  %v3528_v13 = vld [vmem:[#allocation5 + $0xcc] sm:$0xf0]  ;;  %1379 = vmatpush.bf16.msra.mxu1 %v3233_v7 }
  0x14   :  { %v3216_v14 = vld [vmem:[#allocation5 + $0x1c0] sm:$0xf]  ;;  %v3560_v15 = vld [vmem:[#allocation5 + $0x1cc] sm:$0xf0]  ;;  %1468 = vmatpush.bf16.msra.mxu2 %v3361_v8  ;;  %v3089_v16 = vor.u32 %v3528_v13, %v3088_v11 }
  0x15   :  { %v3217_v17 = vor.u32 %v3560_v15, %v3216_v14  ;;  %v3344_v18 = vld [vmem:[#allocation5 + $0x2c0] sm:$0xf]  ;;  %v3592_v19 = vld [vmem:[#allocation5 + $0x2cc] sm:$0xf0]  ;;  %1557 = vmatpush.bf16.msra.mxu3 %v3489_v12 }
  0x16   :  { %v3472_v20 = vld [vmem:[#allocation5 + $0x3c0] sm:$0xf]  ;;  %v3345_v21 = vor.u32 %v3592_v19, %v3344_v18  ;;  %v3624_v22 = vld [vmem:[#allocation5 + $0x3cc] sm:$0xf0]  ;;  %1291 = vmatpush.bf16.msra.mxu0 %v3089_v16 }
  0x17   :  { %v3072_v23 = vld [vmem:[#allocation5 + $0xa0] sm:$0xf]  ;;  %v3524_v24 = vld [vmem:[#allocation5 + $0xac] sm:$0xf0]  ;;  %v3473_v25 = vor.u32 %v3624_v22, %v3472_v20  ;;  %1380 = vmatpush.bf16.msra.mxu1 %v3217_v17 }
  0x18   :  { %v3200_v26 = vld [vmem:[#allocation5 + $0x1a0] sm:$0xf]  ;;  %v3556_v27 = vld [vmem:[#allocation5 + $0x1ac] sm:$0xf0]  ;;  %v3073_v29 = vor.u32 %v3524_v24, %v3072_v23  ;;  %1469 = vmatpush.bf16.msra.mxu2 %v3345_v21 }
  0x19   :  { %v3328_v28 = vld [vmem:[#allocation5 + $0x2a0] sm:$0xf]  ;;  %v3588_v30 = vld [vmem:[#allocation5 + $0x2ac] sm:$0xf0]  ;;  %v3201_v33 = vor.u32 %v3556_v27, %v3200_v26  ;;  %1558 = vmatpush.bf16.msra.mxu3 %v3473_v25 }
  0x1a   :  { %v3456_v31 = vld [vmem:[#allocation5 + $0x3a0] sm:$0xf]  ;;  %v3620_v32 = vld [vmem:[#allocation5 + $0x3ac] sm:$0xf0]  ;;  %v3329_v34 = vor.u32 %v3588_v30, %v3328_v28  ;;  %1292 = vmatpush.bf16.msra.mxu0 %v3073_v29  ;;  %v331_v30 = vld [vmem:[#allocation2 + $0x8] sm:$0xff] }
  0x1b   :  { %v3056_v35 = vld [vmem:[#allocation5 + $0x80] sm:$0xf]  ;;  %v3520_v36 = vld [vmem:[#allocation5 + $0x8c] sm:$0xf0]  ;;  %v3457_v38 = vor.u32 %v3620_v32, %v3456_v31  ;;  %1381 = vmatpush.bf16.msra.mxu1 %v3201_v33  ;;  %v3594_v31 = vld [vmem:[#allocation5 + $0x2e4] sm:$0xf] }
  0x1c   :  { %v3184_v37 = vld [vmem:[#allocation5 + $0x180] sm:$0xf]  ;;  %v3552_v39 = vld [vmem:[#allocation5 + $0x18c] sm:$0xf0]  ;;  %v3057_v44 = vor.u32 %v3520_v36, %v3056_v35  ;;  %1470 = vmatpush.bf16.msra.mxu2 %v3329_v34  ;;  %v3362_v32 = vld [vmem:[#allocation5 + $0x2f0] sm:$0xf0] }
  0x1d   :  { %v3312_v40 = vld [vmem:[#allocation5 + $0x280] sm:$0xf]  ;;  %v3584_v41 = vld [vmem:[#allocation5 + $0x28c] sm:$0xf0]  ;;  %v3185_v45 = vor.u32 %v3552_v39, %v3184_v37  ;;  %1559 = vmatpush.bf16.msra.mxu3 %v3457_v38  ;;  %v335_v34 = vld [vmem:[#allocation2 + $0x28] sm:$0xff] }
  0x1e   :  { %v3440_v42 = vld [vmem:[#allocation5 + $0x380] sm:$0xf]  ;;  %v3616_v43 = vld [vmem:[#allocation5 + $0x38c] sm:$0xf0]  ;;  %v3313_v46 = vor.u32 %v3584_v41, %v3312_v40  ;;  %1293 = vmatpush.bf16.msra.mxu0 %v3057_v44  ;;  %v3626_v35 = vld [vmem:[#allocation5 + $0x3e4] sm:$0xf]  ;;  %v3365_v44 = vor.u32 %v3594_v31, %v3362_v32 }
  0x1f   :  { %v3040_v47 = vld [vmem:[#allocation5 + $0x60] sm:$0xf]  ;;  %v3516_v48 = vld [vmem:[#allocation5 + $0x6c] sm:$0xf0]  ;;  %v3441_v50 = vor.u32 %v3616_v43, %v3440_v42  ;;  %1382 = vmatpush.bf16.msra.mxu1 %v3185_v45  ;;  %v3490_v36 = vld [vmem:[#allocation5 + $0x3f0] sm:$0xf0] }
  0x20   :  { %v3168_v49 = vld [vmem:[#allocation5 + $0x160] sm:$0xf]  ;;  %v3548_v51 = vld [vmem:[#allocation5 + $0x16c] sm:$0xf0]  ;;  %v3041_v56 = vor.u32 %v3516_v48, %v3040_v47  ;;  %1471 = vmatpush.bf16.msra.mxu2 %v3313_v46  ;;  %v333_v41 = vld [vmem:[#allocation2 + $0x18] sm:$0xff]  ;;  %v3493_v48 = vor.u32 %v3626_v35, %v3490_v36 }
  0x21   :  { %v3296_v52 = vld [vmem:[#allocation5 + $0x260] sm:$0xf]  ;;  %v3580_v53 = vld [vmem:[#allocation5 + $0x26c] sm:$0xf0]  ;;  %v3169_v57 = vor.u32 %v3548_v51, %v3168_v49  ;;  %1560 = vmatpush.bf16.msra.mxu3 %v3441_v50  ;;  %v337_v43 = vld [vmem:[#allocation2 + $0x38] sm:$0xff]  ;;  %v3785_v51 = vpack.c.bf16 %v335_v34, %v331_v30 }
  0x22   :  { %v3424_v54 = vld [vmem:[#allocation5 + $0x360] sm:$0xf]  ;;  %v3612_v55 = vld [vmem:[#allocation5 + $0x36c] sm:$0xf0]  ;;  %v3297_v58 = vor.u32 %v3580_v53, %v3296_v52  ;;  %1294 = vmatpush.bf16.msra.mxu0 %v3041_v56  ;;  %v3530_v45 = vld [vmem:[#allocation5 + $0xe4] sm:$0xf]  ;;  %v3789_v53 = vpack.c.bf16 %v337_v43, %v333_v41 }
  0x23   :  { %v3024_v59 = vld [vmem:[#allocation5 + $0x40] sm:$0xf]  ;;  %v3512_v60 = vld [vmem:[#allocation5 + $0x4c] sm:$0xf0]  ;;  %v3425_v62 = vor.u32 %v3612_v55, %v3424_v54  ;;  %1383 = vmatpush.bf16.msra.mxu1 %v3169_v57  ;;  %v3106_v46 = vld [vmem:[#allocation5 + $0xf0] sm:$0xf0] }
  0x24   :  { %v3152_v61 = vld [vmem:[#allocation5 + $0x140] sm:$0xf]  ;;  %v3544_v63 = vld [vmem:[#allocation5 + $0x14c] sm:$0xf0]  ;;  %v3025_v4 = vor.u32 %v3512_v60, %v3024_v59  ;;  %1472 = vmatpush.bf16.msra.mxu2 %v3297_v58  ;;  %v3562_v49 = vld [vmem:[#allocation5 + $0x1e4] sm:$0xf]  ;;  %v3109_v54 = vor.u32 %v3530_v45, %v3106_v46 }
  0x25   :  { %v3280_v0 = vld [vmem:[#allocation5 + $0x240] sm:$0xf]  ;;  %v3576_v1 = vld [vmem:[#allocation5 + $0x24c] sm:$0xf0]  ;;  %v3153_v5 = vor.u32 %v3544_v63, %v3152_v61  ;;  %1561 = vmatpush.bf16.msra.mxu3 %v3425_v62  ;;  %v3234_v50 = vld [vmem:[#allocation5 + $0x1f0] sm:$0xf0] }
  0x26   :  { %v3408_v2 = vld [vmem:[#allocation5 + $0x340] sm:$0xf]  ;;  %v3608_v3 = vld [vmem:[#allocation5 + $0x34c] sm:$0xf0]  ;;  %v3281_v6 = vor.u32 %v3576_v1, %v3280_v0  ;;  %1295 = vmatpush.bf16.msra.mxu0 %v3025_v4  ;;  %v3237_v55 = vor.u32 %v3562_v49, %v3234_v50  ;;  %v3590_v56 = vld [vmem:[#allocation5 + $0x2c4] sm:$0xf] }
  0x27   :  { %v3008_v7 = vld [vmem:[#allocation5 + $0x20] sm:$0xf]  ;;  %v3508_v8 = vld [vmem:[#allocation5 + $0x2c] sm:$0xf0]  ;;  %v3409_v10 = vor.u32 %v3608_v3, %v3408_v2  ;;  %1384 = vmatpush.bf16.msra.mxu1 %v3153_v5  ;;  %v3346_v57 = vld [vmem:[#allocation5 + $0x2d0] sm:$0xf0] }
  0x28   :  { %v3136_v9 = vld [vmem:[#allocation5 + $0x120] sm:$0xf]  ;;  %v3540_v11 = vld [vmem:[#allocation5 + $0x12c] sm:$0xf0]  ;;  %v3009_v17 = vor.u32 %v3508_v8, %v3008_v7  ;;  %1473 = vmatpush.bf16.msra.mxu2 %v3281_v6  ;;  %v3622_v58 = vld [vmem:[#allocation5 + $0x3c4] sm:$0xf]  ;;  %v3349_v59 = vor.u32 %v3590_v56, %v3346_v57 }
  0x29   :  { %v3264_v12 = vld [vmem:[#allocation5 + $0x220] sm:$0xf]  ;;  %v3572_v13 = vld [vmem:[#allocation5 + $0x22c] sm:$0xf0]  ;;  %v3137_v21 = vor.u32 %v3540_v11, %v3136_v9  ;;  %1562 = vmatpush.bf16.msra.mxu3 %v3409_v10  ;;  %v3474_v60 = vld [vmem:[#allocation5 + $0x3d0] sm:$0xf0] }
  0x2a   :  { %v3392_v14 = vld [vmem:[#allocation5 + $0x320] sm:$0xf]  ;;  %v3604_v15 = vld [vmem:[#allocation5 + $0x32c] sm:$0xf0]  ;;  %v3265_v22 = vor.u32 %v3572_v13, %v3264_v12  ;;  %1296 = vmatpush.bf16.msra.mxu0 %v3009_v17  ;;  %v3526_v61 = vld [vmem:[#allocation5 + $0xc4] sm:$0xf]  ;;  %v3477_v63 = vor.u32 %v3622_v58, %v3474_v60 }
  0x2b   :  { %v2992_v16 = vld [vmem:[#allocation5] sm:$0xf]  ;;  %v3504_v18 = vld [vmem:[#allocation5 + $0xc] sm:$0xf0]  ;;  %v3393_v26 = vor.u32 %v3604_v15, %v3392_v14  ;;  %1385 = vmatpush.bf16.msra.mxu1 %v3137_v21  ;;  %v3090_v62 = vld [vmem:[#allocation5 + $0xd0] sm:$0xf0] }
  0x2c   :  { %v3120_v19 = vld [vmem:[#allocation5 + $0x100] sm:$0xf]  ;;  %v3536_v20 = vld [vmem:[#allocation5 + $0x10c] sm:$0xf0]  ;;  %v2993_v33 = vor.u32 %v3504_v18, %v2992_v16  ;;  %1474 = vmatpush.bf16.msra.mxu2 %v3265_v22  ;;  %v3093_v0 = vor.u32 %v3526_v61, %v3090_v62  ;;  %v3558_v1 = vld [vmem:[#allocation5 + $0x1c4] sm:$0xf] }
  0x2d   :  { %v3248_v23 = vld [vmem:[#allocation5 + $0x200] sm:$0xf]  ;;  %v3568_v24 = vld [vmem:[#allocation5 + $0x20c] sm:$0xf0]  ;;  %v3121_v37 = vor.u32 %v3536_v20, %v3120_v19  ;;  %1563 = vmatpush.bf16.msra.mxu3 %v3393_v26  ;;  %v3218_v2 = vld [vmem:[#allocation5 + $0x1d0] sm:$0xf0] }
  0x2e   :  { %v3376_v25 = vld [vmem:[#allocation5 + $0x300] sm:$0xf]  ;;  %v3600_v27 = vld [vmem:[#allocation5 + $0x30c] sm:$0xf0]  ;;  %v3249_v38 = vor.u32 %v3568_v24, %v3248_v23  ;;  %1297 = vmatpush.bf16.msra.mxu0 %v2993_v33  ;;  %v3221_v3 = vor.u32 %v3558_v1, %v3218_v2  ;;  %v339_v6 = vld [vmem:[#allocation2 + $0x48] sm:$0xff] }
  0x2f   :  { %v330_v28 = vld [vmem:[#allocation2] sm:$0xff]  ;;  %v332_v39 = vld [vmem:[#allocation2 + $0x10] sm:$0xff]  ;;  %v3377_v42 = vor.u32 %v3600_v27, %v3376_v25  ;;  %1386 = vmatpush.bf16.msra.mxu1 %v3121_v37  ;;  %v343_v7 = vld [vmem:[#allocation2 + $0x68] sm:$0xff] }
  0x30   :  { %v334_v29 = vld [vmem:[#allocation2 + $0x20] sm:$0xff]  ;;  %v336_v40 = vld [vmem:[#allocation2 + $0x30] sm:$0xff]  ;;  %1475 = vmatpush.bf16.msra.mxu2 %v3249_v38  ;;  %v341_v10 = vld [vmem:[#allocation2 + $0x58] sm:$0xff]  ;;  %v3797_v13 = vpack.c.bf16 %v343_v7, %v339_v6 }
  0x31   :  { %v3783_v47 = vpack.c.bf16 %v334_v29, %v330_v28  ;;  %v3787_v52 = vpack.c.bf16 %v336_v40, %v332_v39  ;;  %1564 = vmatpush.bf16.msra.mxu3 %v3377_v42  ;;  %v338_v4 = vld [vmem:[#allocation2 + $0x40] sm:$0xff]  ;;  %v340_v8 = vld [vmem:[#allocation2 + $0x50] sm:$0xff]  ;;  %v345_v11 = vld [vmem:[#allocation2 + $0x78] sm:$0xff] }
  0x32   :  { %1387 = vmatmul.bf16.vlgmr.msra.gmra.mxu1 %v3785_v51  ;;  %1646 = vmatpush.bf16.msrb.mxu0 %v3109_v54  ;;  %v342_v5 = vld [vmem:[#allocation2 + $0x60] sm:$0xff]  ;;  %v344_v9 = vld [vmem:[#allocation2 + $0x70] sm:$0xff]  ;;  %v3801_v15 = vpack.c.bf16 %v345_v11, %v341_v10  ;;  %v347_v18 = vld [vmem:[#allocation2 + $0x88] sm:$0xff] }
  0x33   :  { %1298 = vmatmul.bf16.vlgmr.msra.gmra.mxu0 %v3783_v47  ;;  %1476 = vmatmul.bf16.vlgmr.msra.gmra.mxu2 %v3787_v52  ;;  %v3795_v12 = vpack.c.bf16 %v342_v5, %v338_v4  ;;  %v3799_v14 = vpack.c.bf16 %v344_v9, %v340_v8  ;;  %v346_v16 = vld [vmem:[#allocation2 + $0x80] sm:$0xff]  ;;  %v351_v19 = vld [vmem:[#allocation2 + $0xa8] sm:$0xff]  ;;  %v348_v20 = vld [vmem:[#allocation2 + $0x90] sm:$0xff] }
  0x34   :  { %1824 = vmatpush.bf16.msrb.mxu2 %v3365_v44  ;;  %1565 = vmatmul.bf16.vlgmr.msra.gmra.mxu3 %v3789_v53  ;;  %v350_v17 = vld [vmem:[#allocation2 + $0xa0] sm:$0xff]  ;;  %v352_v21 = vld [vmem:[#allocation2 + $0xb0] sm:$0xff]  ;;  %v349_v22 = vld [vmem:[#allocation2 + $0x98] sm:$0xff]  ;;  %v3809_v25 = vpack.c.bf16 %v351_v19, %v347_v18 }
  0x35   :  { %1913 = vmatpush.bf16.msrb.mxu3 %v3493_v48  ;;  %1735 = vmatpush.bf16.msrb.mxu1 %v3237_v55  ;;  %v353_v23 = vld [vmem:[#allocation2 + $0xb8] sm:$0xff]  ;;  %v3807_v24 = vpack.c.bf16 %v350_v17, %v346_v16  ;;  %v3811_v26 = vpack.c.bf16 %v352_v21, %v348_v20  ;;  %v3586_v28 = vld [vmem:[#allocation5 + $0x2a4] sm:$0xf]  ;;  %v3330_v29 = vld [vmem:[#allocation5 + $0x2b0] sm:$0xf0] }
  0x36   :  { %1647 = vmatpush.bf16.msrb.mxu0 %v3093_v0  ;;  %v3813_v27 = vpack.c.bf16 %v353_v23, %v349_v22  ;;  %v3618_v30 = vld [vmem:[#allocation5 + $0x3a4] sm:$0xf]  ;;  %v3333_v31 = vor.u32 %v3586_v28, %v3330_v29  ;;  %v3458_v32 = vld [vmem:[#allocation5 + $0x3b0] sm:$0xf0]  ;;  %v355_v42 = vld [vmem:[#allocation2 + $0xc8] sm:$0xff] }
  0x37   :  { %v3522_v33 = vld [vmem:[#allocation5 + $0xa4] sm:$0xf]  ;;  %v3074_v34 = vld [vmem:[#allocation5 + $0xb0] sm:$0xf0]  ;;  %v3461_v35 = vor.u32 %v3618_v30, %v3458_v32  ;;  %v359_v43 = vld [vmem:[#allocation2 + $0xe8] sm:$0xff] }
  0x38   :  { %1825 = vmatpush.bf16.msrb.mxu2 %v3349_v59  ;;  %v3077_v36 = vor.u32 %v3522_v33, %v3074_v34  ;;  %v3554_v37 = vld [vmem:[#allocation5 + $0x1a4] sm:$0xf]  ;;  %v3202_v38 = vld [vmem:[#allocation5 + $0x1b0] sm:$0xf0]  ;;  %v357_v46 = vld [vmem:[#allocation2 + $0xd8] sm:$0xff]  ;;  %v3821_v50 = vpack.c.bf16 %v359_v43, %v355_v42 }
  0x39   :  { %1914 = vmatpush.bf16.msrb.mxu3 %v3477_v63  ;;  %1736 = vmatpush.bf16.msrb.mxu1 %v3221_v3  ;;  %v3205_v39 = vor.u32 %v3554_v37, %v3202_v38  ;;  %v354_v40 = vld [vmem:[#allocation2 + $0xc0] sm:$0xff]  ;;  %v356_v44 = vld [vmem:[#allocation2 + $0xd0] sm:$0xff]  ;;  %v361_v48 = vld [vmem:[#allocation2 + $0xf8] sm:$0xff] }
  0x3a   :  { %1648 = vmatpush.bf16.msrb.mxu0 %v3077_v36  ;;  %v358_v41 = vld [vmem:[#allocation2 + $0xe0] sm:$0xff]  ;;  %v360_v45 = vld [vmem:[#allocation2 + $0xf0] sm:$0xff]  ;;  %v3825_v55 = vpack.c.bf16 %v361_v48, %v357_v46  ;;  %v363_v58 = vld [vmem:[#allocation2 + $0x108] sm:$0xff] }
  0x3b   :  { %v3819_v49 = vpack.c.bf16 %v358_v41, %v354_v40  ;;  %v3823_v54 = vpack.c.bf16 %v360_v45, %v356_v44  ;;  %v362_v56 = vld [vmem:[#allocation2 + $0x100] sm:$0xff]  ;;  %v367_v59 = vld [vmem:[#allocation2 + $0x128] sm:$0xff]  ;;  %v364_v60 = vld [vmem:[#allocation2 + $0x110] sm:$0xff] }
  0x3c   :  { %1826 = vmatpush.bf16.msrb.mxu2 %v3333_v31  ;;  %v366_v57 = vld [vmem:[#allocation2 + $0x120] sm:$0xff]  ;;  %v368_v61 = vld [vmem:[#allocation2 + $0x130] sm:$0xff]  ;;  %v365_v62 = vld [vmem:[#allocation2 + $0x118] sm:$0xff]  ;;  %v3833_v1 = vpack.c.bf16 %v367_v59, %v363_v58 }
  0x3d   :  { %1915 = vmatpush.bf16.msrb.mxu3 %v3461_v35  ;;  %1737 = vmatpush.bf16.msrb.mxu1 %v3205_v39  ;;  %v369_v63 = vld [vmem:[#allocation2 + $0x138] sm:$0xff]  ;;  %v3831_v0 = vpack.c.bf16 %v366_v57, %v362_v56  ;;  %v3835_v2 = vpack.c.bf16 %v368_v61, %v364_v60  ;;  %v3582_v4 = vld [vmem:[#allocation5 + $0x284] sm:$0xf]  ;;  %v3314_v5 = vld [vmem:[#allocation5 + $0x290] sm:$0xf0] }
  0x3e   :  { %v3837_v3 = vpack.c.bf16 %v369_v63, %v365_v62  ;;  %v3614_v6 = vld [vmem:[#allocation5 + $0x384] sm:$0xf]  ;;  %v3317_v7 = vor.u32 %v3582_v4, %v3314_v5  ;;  %v3442_v8 = vld [vmem:[#allocation5 + $0x390] sm:$0xf0]  ;;  %v371_v22 = vld [vmem:[#allocation2 + $0x148] sm:$0xff] }
  0x3f   :  { %v3518_v9 = vld [vmem:[#allocation5 + $0x84] sm:$0xf]  ;;  %v3058_v10 = vld [vmem:[#allocation5 + $0x90] sm:$0xf0]  ;;  %v3445_v11 = vor.u32 %v3614_v6, %v3442_v8  ;;  %v375_v23 = vld [vmem:[#allocation2 + $0x168] sm:$0xff] }
  0x40   :  { %v3061_v16 = vor.u32 %v3518_v9, %v3058_v10  ;;  %v3550_v17 = vld [vmem:[#allocation5 + $0x184] sm:$0xf]  ;;  %v3186_v18 = vld [vmem:[#allocation5 + $0x190] sm:$0xf0]  ;;  %1827 = vmatpush.bf16.msrb.mxu2 %v3317_v7  ;;  %v373_v30 = vld [vmem:[#allocation2 + $0x158] sm:$0xff]  ;;  %v3845_v33 = vpack.c.bf16 %v375_v23, %v371_v22 }
  0x41   :  { %v3189_v19 = vor.u32 %v3550_v17, %v3186_v18  ;;  %1916 = vmatpush.bf16.msrb.mxu3 %v3445_v11  ;;  %v370_v20 = vld [vmem:[#allocation2 + $0x140] sm:$0xff]  ;;  %v372_v28 = vld [vmem:[#allocation2 + $0x150] sm:$0xff]  ;;  %v377_v31 = vld [vmem:[#allocation2 + $0x178] sm:$0xff] }
  0x42   :  { %1392 = vmatmul.bf16.gmra.mxu1 %v3797_v13  ;;  %1649 = vmatpush.bf16.msrb.mxu0 %v3061_v16  ;;  %v374_v21 = vld [vmem:[#allocation2 + $0x160] sm:$0xff]  ;;  %v376_v29 = vld [vmem:[#allocation2 + $0x170] sm:$0xff]  ;;  %v3849_v35 = vpack.c.bf16 %v377_v31, %v373_v30  ;;  %v379_v38 = vld [vmem:[#allocation2 + $0x188] sm:$0xff] }
  0x43   :  { %1303 = vmatmul.bf16.gmra.mxu0 %v3795_v12  ;;  %1481 = vmatmul.bf16.gmra.mxu2 %v3799_v14  ;;  %v3843_v32 = vpack.c.bf16 %v374_v21, %v370_v20  ;;  %v3847_v34 = vpack.c.bf16 %v376_v29, %v372_v28  ;;  %v378_v36 = vld [vmem:[#allocation2 + $0x180] sm:$0xff]  ;;  %v383_v39 = vld [vmem:[#allocation2 + $0x1a8] sm:$0xff]  ;;  %v380_v40 = vld [vmem:[#allocation2 + $0x190] sm:$0xff] }
  0x44   :  { %1570 = vmatmul.bf16.gmra.mxu3 %v3801_v15  ;;  %1738 = vmatpush.bf16.msrb.mxu1 %v3189_v19  ;;  %v382_v37 = vld [vmem:[#allocation2 + $0x1a0] sm:$0xff]  ;;  %v384_v41 = vld [vmem:[#allocation2 + $0x1b0] sm:$0xff]  ;;  %v381_v42 = vld [vmem:[#allocation2 + $0x198] sm:$0xff]  ;;  %v3857_v45 = vpack.c.bf16 %v383_v39, %v379_v38 }
  0x45   :  { %v385_v43 = vld [vmem:[#allocation2 + $0x1b8] sm:$0xff]  ;;  %v3855_v44 = vpack.c.bf16 %v382_v37, %v378_v36  ;;  %v3859_v46 = vpack.c.bf16 %v384_v41, %v380_v40  ;;  %v3578_v56 = vld [vmem:[#allocation5 + $0x264] sm:$0xf]  ;;  %v3298_v57 = vld [vmem:[#allocation5 + $0x270] sm:$0xf0] }
  0x46   :  { %v3861_v48 = vpack.c.bf16 %v385_v43, %v381_v42  ;;  %v3610_v58 = vld [vmem:[#allocation5 + $0x364] sm:$0xf]  ;;  %v3301_v59 = vor.u32 %v3578_v56, %v3298_v57  ;;  %v3426_v60 = vld [vmem:[#allocation5 + $0x370] sm:$0xf0]  ;;  %v64_v62 = vld [vmem:[#allocation7] sm:$0xf] }
  0x47   :  { %v3429_v61 = vor.u32 %v3610_v58, %v3426_v60  ;;  %v3867_v63 = vperm.slane %v64_v62, 0  ;;  %v386_v4 = vld [vmem:[#allocation2 + $0x1c0] sm:$0xff]  ;;  %v387_v6 = vld [vmem:[#allocation2 + $0x1c8] sm:$0xff]  ;;  %v388_v8 = vld [vmem:[#allocation2 + $0x1d0] sm:$0xff] }
  0x48   :  { %1828 = vmatpush.bf16.msrb.mxu2 %v3301_v59  ;;  %v390_v5 = vld [vmem:[#allocation2 + $0x1e0] sm:$0xff]  ;;  %v391_v7 = vld [vmem:[#allocation2 + $0x1e8] sm:$0xff]  ;;  %v392_v9 = vld [vmem:[#allocation2 + $0x1f0] sm:$0xff] }
  0x49   :  { %1917 = vmatpush.bf16.msrb.mxu3 %v3429_v61  ;;  %186 = vst [vmem:[#allocation8 + $0x380] sm:$0xff] %v3867_v63  ;;  %v389_v10 = vld [vmem:[#allocation2 + $0x1d8] sm:$0xff]  ;;  %v3514_v16 = vld [vmem:[#allocation5 + $0x64] sm:$0xf]  ;;  %v3042_v17 = vld [vmem:[#allocation5 + $0x70] sm:$0xf0]  ;;  %v3873_v18 = vpack.c.bf16 %v390_v5, %v386_v4  ;;  %v3875_v22 = vpack.c.bf16 %v391_v7, %v387_v6  ;;  %v3877_v23 = vpack.c.bf16 %v392_v9, %v388_v8 }
  0x4a   :  { %190 = vst [vmem:[#allocation8 + $0x3a0] sm:$0xff] %v3867_v63  ;;  %v393_v11 = vld [vmem:[#allocation2 + $0x1f8] sm:$0xff]  ;;  %v3045_v19 = vor.u32 %v3514_v16, %v3042_v17  ;;  %v3546_v20 = vld [vmem:[#allocation5 + $0x164] sm:$0xf]  ;;  %v3170_v21 = vld [vmem:[#allocation5 + $0x170] sm:$0xf0] }
  0x4b   :  { %194 = vst [vmem:[#allocation8 + $0x3c0] sm:$0xff] %v3867_v63  ;;  %v3173_v28 = vor.u32 %v3546_v20, %v3170_v21  ;;  %v3879_v29 = vpack.c.bf16 %v393_v11, %v389_v10  ;;  %v394_v30 = vld [vmem:[#allocation2 + $0x200] sm:$0xff]  ;;  %v395_v36 = vld [vmem:[#allocation2 + $0x208] sm:$0xff]  ;;  %v396_v38 = vld [vmem:[#allocation2 + $0x210] sm:$0xff] }
  0x4c   :  { %198 = vst [vmem:[#allocation8 + $0x3e0] sm:$0xff] %v3867_v63  ;;  %1650 = vmatpush.bf16.msrb.mxu0 %v3045_v19  ;;  %v398_v31 = vld [vmem:[#allocation2 + $0x220] sm:$0xff]  ;;  %v399_v37 = vld [vmem:[#allocation2 + $0x228] sm:$0xff]  ;;  %v400_v39 = vld [vmem:[#allocation2 + $0x230] sm:$0xff] }
  0x4d   :  { %1739 = vmatpush.bf16.msrb.mxu1 %v3173_v28  ;;  %v397_v40 = vld [vmem:[#allocation2 + $0x218] sm:$0xff]  ;;  %v3885_v42 = vpack.c.bf16 %v398_v31, %v394_v30  ;;  %v3887_v56 = vpack.c.bf16 %v399_v37, %v395_v36  ;;  %v3889_v57 = vpack.c.bf16 %v400_v39, %v396_v38  ;;  %v3574_v61 = vld [vmem:[#allocation5 + $0x244] sm:$0xf]  ;;  %v3282_v62 = vld [vmem:[#allocation5 + $0x250] sm:$0xf0] }
  0x4e   :  { %v401_v41 = vld [vmem:[#allocation2 + $0x238] sm:$0xff]  ;;  %v3606_v4 = vld [vmem:[#allocation5 + $0x344] sm:$0xf]  ;;  %v3285_v6 = vor.u32 %v3574_v61, %v3282_v62  ;;  %v3410_v7 = vld [vmem:[#allocation5 + $0x350] sm:$0xf0] }
  0x4f   :  { %v3891_v59 = vpack.c.bf16 %v401_v41, %v397_v40  ;;  %v3413_v11 = vor.u32 %v3606_v4, %v3410_v7  ;;  %v402_v19 = vld [vmem:[#allocation2 + $0x240] sm:$0xff]  ;;  %v403_v28 = vld [vmem:[#allocation2 + $0x248] sm:$0xff]  ;;  %v404_v31 = vld [vmem:[#allocation2 + $0x250] sm:$0xff] }
  0x50   :  { %1829 = vmatpush.bf16.msrb.mxu2 %v3285_v6  ;;  %v406_v21 = vld [vmem:[#allocation2 + $0x260] sm:$0xff]  ;;  %v407_v30 = vld [vmem:[#allocation2 + $0x268] sm:$0xff]  ;;  %v408_v36 = vld [vmem:[#allocation2 + $0x270] sm:$0xff] }
  0x51   :  { %1918 = vmatpush.bf16.msrb.mxu3 %v3413_v11  ;;  %v405_v37 = vld [vmem:[#allocation2 + $0x258] sm:$0xff]  ;;  %v3510_v40 = vld [vmem:[#allocation5 + $0x44] sm:$0xf]  ;;  %v3026_v41 = vld [vmem:[#allocation5 + $0x50] sm:$0xf0]  ;;  %v3900_v7 = vpack.c.bf16 %v407_v30, %v403_v28 }
  0x52   :  { %1397 = vmatmul.bf16.gmra.mxu1 %v3809_v25  ;;  %v409_v39 = vld [vmem:[#allocation2 + $0x278] sm:$0xff]  ;;  %v3542_v61 = vld [vmem:[#allocation5 + $0x144] sm:$0xf]  ;;  %v3154_v62 = vld [vmem:[#allocation5 + $0x150] sm:$0xf0] }
  0x53   :  { %1308 = vmatmul.bf16.gmra.mxu0 %v3807_v24  ;;  %1486 = vmatmul.bf16.gmra.mxu2 %v3811_v26  ;;  %4361 = vst [vmem:[#allocation12_spill] sm:$0xff] %v3900_v7 }
  0x54   :  { %1575 = vmatmul.bf16.gmra.mxu3 %v3813_v27 }
  0x62   :  { %1402 = vmatmul.bf16.gmra.mxu1 %v3821_v50 }
  0x63   :  { %1313 = vmatmul.bf16.gmra.mxu0 %v3819_v49  ;;  %1491 = vmatmul.bf16.gmra.mxu2 %v3823_v54 }
  0x64   :  { %1580 = vmatmul.bf16.gmra.mxu3 %v3825_v55 }
  0x72   :  { %1407 = vmatmul.bf16.gmra.mxu1 %v3833_v1 }
  0x73   :  { %1318 = vmatmul.bf16.gmra.mxu0 %v3831_v0  ;;  %1496 = vmatmul.bf16.gmra.mxu2 %v3835_v2 }
  0x74   :  { %1585 = vmatmul.bf16.gmra.mxu3 %v3837_v3 }
  0x82   :  { %1412 = vmatmul.bf16.gmra.mxu1 %v3845_v33 }
  0x83   :  { %1323 = vmatmul.bf16.gmra.mxu0 %v3843_v32  ;;  %1501 = vmatmul.bf16.gmra.mxu2 %v3847_v34 }
  0x84   :  { %1590 = vmatmul.bf16.gmra.mxu3 %v3849_v35 }
  0x92   :  { %1417 = vmatmul.bf16.gmra.mxu1 %v3857_v45 }
  0x93   :  { %1328 = vmatmul.bf16.gmra.mxu0 %v3855_v44  ;;  %1506 = vmatmul.bf16.gmra.mxu2 %v3859_v46 }
  0x94   :  { %1595 = vmatmul.bf16.gmra.mxu3 %v3861_v48 }
  0xa2   :  { %1422 = vmatmul.bf16.gmra.mxu1 %v3875_v22 }
  0xa3   :  { %1333 = vmatmul.bf16.gmra.mxu0 %v3873_v18  ;;  %1511 = vmatmul.bf16.gmra.mxu2 %v3877_v23 }
  0xa4   :  { %1600 = vmatmul.bf16.gmra.mxu3 %v3879_v29 }
  0xaf   :  { %v1388_v58 = vpop.f32.mrf.mxu1 }
  0xb0   :  { %v1299_v43 = vpop.f32.mrf.mxu0 }
  0xb1   :  { %v1389_v60 = vadd.f32 %v1388_v58, %v1299_v43  ;;  %v3898_v58 = vpack.c.bf16 %v406_v21, %v402_v19 }
  0xb2   :  { %1427 = vmatmul.bf16.gmra.mxu1 %v3887_v56 }
  0xb3   :  { %1338 = vmatmul.bf16.gmra.mxu0 %v3885_v42  ;;  %1516 = vmatmul.bf16.gmra.mxu2 %v3889_v57 }
  0xb4   :  { %1605 = vmatmul.bf16.gmra.mxu3 %v3891_v59 }
  0xb6   :  { %v1477_v5 = vpop.f32.mrf.mxu2 }
  0xb7   :  { %v1478_v8 = vadd.f32 %v1477_v5, %v1389_v60  ;;  %v1566_v9 = vpop.f32.mrf.mxu3  ;;  %v1390_v16 = vpop.f32.mrf.mxu1  ;;  %v3029_v60 = vor.u32 %v3510_v40, %v3026_v41  ;;  %v411_v40 = vld [vmem:[#allocation2 + $0x288] sm:$0xff] }
  0xb8   :  { %v1301_v10 = vpop.f32.mrf.mxu0  ;;  %v415_v41 = vld [vmem:[#allocation2 + $0x2a8] sm:$0xff] }
  0xb9   :  { %v1567_v17 = vadd.f32 %v1566_v9, %v1478_v8  ;;  %v1391_v38 = vadd.f32 %v1390_v16, %v1301_v10  ;;  %v3902_v8 = vpack.c.bf16 %v408_v36, %v404_v31  ;;  %v3157_v9 = vor.u32 %v3542_v61, %v3154_v62  ;;  %1651 = vmatpush.bf16.msrb.mxu0 %v3029_v60  ;;  %v416_v60 = vld [vmem:[#allocation2 + $0x2b0] sm:$0xff]  ;;  %v413_v62 = vld [vmem:[#allocation2 + $0x298] sm:$0xff] }
  0xbb   :  { %v2714_v20 = vadd.f32 %v1567_v17, %v3867_v63  ;;  %4362 = vst [vmem:[#allocation13_spill] sm:$0xff] %v3902_v8  ;;  %v3904_v17 = vpack.c.bf16 %v409_v39, %v405_v37  ;;  %1740 = vmatpush.bf16.msrb.mxu1 %v3157_v9  ;;  %v414_v39 = vld [vmem:[#allocation2 + $0x2a0] sm:$0xff] }
  0xbd   :  { %2842 = vst [vmem:[#allocation8] sm:$0xff] %v2714_v20 }
  0xbe   :  { %v1479_v43 = vpop.f32.mrf.mxu2  ;;  %4363 = vst [vmem:[#allocation14_spill] sm:$0xff] %v3904_v17 }
  0xbf   :  { %v1480_v4 = vadd.f32 %v1479_v43, %v1391_v38  ;;  %v1568_v5 = vpop.f32.mrf.mxu3  ;;  %v1393_v11 = vpop.f32.mrf.mxu1  ;;  %v410_v38 = vld [vmem:[#allocation2 + $0x280] sm:$0xff]  ;;  %v412_v43 = vld [vmem:[#allocation2 + $0x290] sm:$0xff] }
  0xc0   :  { %v1304_v6 = vpop.f32.mrf.mxu0 }
  0xc1   :  { %v1569_v10 = vadd.f32 %v1568_v5, %v1480_v4  ;;  %v1394_v19 = vadd.f32 %v1393_v11, %v1304_v6  ;;  %v417_v4 = vld [vmem:[#allocation2 + $0x2b8] sm:$0xff]  ;;  %v3912_v6 = vpack.c.bf16 %v414_v39, %v410_v38 }
  0xc2   :  { %1432 = vmatmul.bf16.gmra.mxu1 %v3900_v7 }
  0xc3   :  { %1343 = vmatmul.bf16.gmra.mxu0 %v3898_v58  ;;  %v2718_v16 = vadd.f32 %v1569_v10, %v3867_v63  ;;  %1521 = vmatmul.bf16.gmra.mxu2 %v3902_v8  ;;  %4364 = vst [vmem:[#allocation15_spill] sm:$0xff] %v3912_v6 }
  0xc4   :  { %1610 = vmatmul.bf16.gmra.mxu3 %v3904_v17 }
  0xc5   :  { %2846 = vst [vmem:[#allocation8 + $0x20] sm:$0xff] %v2718_v16  ;;  %v3914_v16 = vpack.c.bf16 %v415_v41, %v411_v40  ;;  %v3602_v40 = vld [vmem:[#allocation5 + $0x324] sm:$0xf]  ;;  %v3394_v41 = vld [vmem:[#allocation5 + $0x330] sm:$0xf0] }
  0xc6   :  { %v1482_v20 = vpop.f32.mrf.mxu2 }
  0xc7   :  { %v1483_v21 = vadd.f32 %v1482_v20, %v1394_v19  ;;  %v1571_v28 = vpop.f32.mrf.mxu3  ;;  %v1395_v31 = vpop.f32.mrf.mxu1  ;;  %4365 = vst [vmem:[#allocation16_spill] sm:$0xff] %v3914_v16  ;;  %v3916_v19 = vpack.c.bf16 %v416_v60, %v412_v43 }
  0xc8   :  { %v1306_v30 = vpop.f32.mrf.mxu0 }
  0xc9   :  { %v1572_v36 = vadd.f32 %v1571_v28, %v1483_v21  ;;  %v1396_v61 = vadd.f32 %v1395_v31, %v1306_v30  ;;  %4366 = vst [vmem:[#allocation17_spill] sm:$0xff] %v3916_v19  ;;  %v3918_v21 = vpack.c.bf16 %v417_v4, %v413_v62  ;;  %v3397_v62 = vor.u32 %v3602_v40, %v3394_v41  ;;  %v3538_v41 = vld [vmem:[#allocation5 + $0x124] sm:$0xf] }
  0xcb   :  { %v2722_v37 = vadd.f32 %v1572_v36, %v3867_v63  ;;  %4367 = vst [vmem:[#allocation18_spill] sm:$0xff] %v3918_v21  ;;  %v3570_v36 = vld [vmem:[#allocation5 + $0x224] sm:$0xf]  ;;  %1919 = vmatpush.bf16.msrb.mxu3 %v3397_v62 }
  0xcd   :  { %2850 = vst [vmem:[#allocation8 + $0x40] sm:$0xff] %v2722_v37  ;;  %v3266_v37 = vld [vmem:[#allocation5 + $0x230] sm:$0xf0] }
  0xce   :  { %v1484_v5 = vpop.f32.mrf.mxu2  ;;  %v3269_v39 = vor.u32 %v3570_v36, %v3266_v37  ;;  %v425_v37 = vld [vmem:[#allocation2 + $0x2f8] sm:$0xff] }
  0xcf   :  { %v1485_v9 = vadd.f32 %v1484_v5, %v1396_v61  ;;  %v1573_v11 = vpop.f32.mrf.mxu3  ;;  %v1398_v20 = vpop.f32.mrf.mxu1 }
  0xd0   :  { %v1309_v10 = vpop.f32.mrf.mxu0  ;;  %1830 = vmatpush.bf16.msrb.mxu2 %v3269_v39 }
  0xd1   :  { %v1574_v28 = vadd.f32 %v1573_v11, %v1485_v9  ;;  %v1399_v31 = vadd.f32 %v1398_v20, %v1309_v10  ;;  %v418_v9 = vld [vmem:[#allocation2 + $0x2c0] sm:$0xff]  ;;  %v419_v20 = vld [vmem:[#allocation2 + $0x2c8] sm:$0xff] }
  0xd2   :  { %1437 = vmatmul.bf16.gmra.mxu1 %v3914_v16  ;;  %v422_v10 = vld [vmem:[#allocation2 + $0x2e0] sm:$0xff] }
  0xd3   :  { %1348 = vmatmul.bf16.gmra.mxu0 %v3912_v6  ;;  %v2726_v30 = vadd.f32 %v1574_v28, %v3867_v63  ;;  %1526 = vmatmul.bf16.gmra.mxu2 %v3916_v19  ;;  %v423_v28 = vld [vmem:[#allocation2 + $0x2e8] sm:$0xff]  ;;  %v421_v19 = vld [vmem:[#allocation2 + $0x2d8] sm:$0xff]  ;;  %v3926_v40 = vpack.c.bf16 %v422_v10, %v418_v9 }
  0xd4   :  { %1615 = vmatmul.bf16.gmra.mxu3 %v3918_v21  ;;  %v424_v21 = vld [vmem:[#allocation2 + $0x2f0] sm:$0xff]  ;;  %v3928_v6 = vpack.c.bf16 %v423_v28, %v419_v20 }
  0xd5   :  { %2854 = vst [vmem:[#allocation8 + $0x60] sm:$0xff] %v2726_v30  ;;  %v420_v30 = vld [vmem:[#allocation2 + $0x2d0] sm:$0xff] }
  0xd6   :  { %v1487_v38 = vpop.f32.mrf.mxu2  ;;  %4368 = vst [vmem:[#allocation19_spill] sm:$0xff] %v3926_v40  ;;  %v3930_v17 = vpack.c.bf16 %v424_v21, %v420_v30  ;;  %v426_v30 = vld [vmem:[#allocation2 + $0x300] sm:$0xff] }
  0xd7   :  { %v1488_v43 = vadd.f32 %v1487_v38, %v1399_v31  ;;  %v1576_v60 = vpop.f32.mrf.mxu3  ;;  %v1400_v4 = vpop.f32.mrf.mxu1  ;;  %v3506_v31 = vld [vmem:[#allocation5 + $0x24] sm:$0xf]  ;;  %v3010_v38 = vld [vmem:[#allocation5 + $0x30] sm:$0xf0]  ;;  %4369 = vst [vmem:[#allocation20_spill] sm:$0xff] %v3928_v6 }
  0xd8   :  { %v1311_v61 = vpop.f32.mrf.mxu0  ;;  %v3013_v39 = vor.u32 %v3506_v31, %v3010_v38  ;;  %4370 = vst [vmem:[#allocation21_spill] sm:$0xff] %v3930_v17  ;;  %v431_v31 = vld [vmem:[#allocation2 + $0x328] sm:$0xff]  ;;  %v432_v38 = vld [vmem:[#allocation2 + $0x330] sm:$0xff] }
  0xd9   :  { %v1577_v5 = vadd.f32 %v1576_v60, %v1488_v43  ;;  %v1401_v36 = vadd.f32 %v1400_v4, %v1311_v61  ;;  %v3138_v43 = vld [vmem:[#allocation5 + $0x130] sm:$0xf0] }
  0xda   :  { %v3141_v8 = vor.u32 %v3538_v41, %v3138_v43  ;;  %1652 = vmatpush.bf16.msrb.mxu0 %v3013_v39  ;;  %v429_v41 = vld [vmem:[#allocation2 + $0x318] sm:$0xff] }
  0xdb   :  { %v2730_v11 = vadd.f32 %v1577_v5, %v3867_v63  ;;  %v433_v43 = vld [vmem:[#allocation2 + $0x338] sm:$0xff] }
  0xdc   :  { %1741 = vmatpush.bf16.msrb.mxu1 %v3141_v8 }
  0xdd   :  { %2858 = vst [vmem:[#allocation8 + $0x80] sm:$0xff] %v2730_v11  ;;  %v3932_v11 = vpack.c.bf16 %v425_v37, %v421_v19  ;;  %v427_v37 = vld [vmem:[#allocation2 + $0x308] sm:$0xff] }
  0xde   :  { %v1489_v16 = vpop.f32.mrf.mxu2 }
  0xdf   :  { %v1490_v60 = vadd.f32 %v1489_v16, %v1401_v36  ;;  %v1578_v62 = vpop.f32.mrf.mxu3  ;;  %v1403_v7 = vpop.f32.mrf.mxu1  ;;  %4371 = vst [vmem:[#allocation22_spill] sm:$0xff] %v3932_v11  ;;  %v430_v36 = vld [vmem:[#allocation2 + $0x320] sm:$0xff] }
  0xe0   :  { %v1314_v5 = vpop.f32.mrf.mxu0 }
  0xe1   :  { %v1579_v61 = vadd.f32 %v1578_v62, %v1490_v60  ;;  %v1404_v9 = vadd.f32 %v1403_v7, %v1314_v5  ;;  %v428_v7 = vld [vmem:[#allocation2 + $0x310] sm:$0xff]  ;;  %v3940_v62 = vpack.c.bf16 %v430_v36, %v426_v30 }
  0xe2   :  { %1442 = vmatmul.bf16.gmra.mxu1 %v3928_v6  ;;  %v3250_v30 = vld [vmem:[#allocation5 + $0x210] sm:$0xf0] }
  0xe3   :  { %1353 = vmatmul.bf16.gmra.mxu0 %v3926_v40  ;;  %v2734_v4 = vadd.f32 %v1579_v61, %v3867_v63  ;;  %1531 = vmatmul.bf16.gmra.mxu2 %v3930_v17  ;;  %4372 = vst [vmem:[#allocation23_spill] sm:$0xff] %v3940_v62 }
  0xe4   :  { %1620 = vmatmul.bf16.gmra.mxu3 %v3932_v11 }
  0xe5   :  { %2862 = vst [vmem:[#allocation8 + $0xa0] sm:$0xff] %v2734_v4 }
  0xe6   :  { %v1492_v16 = vpop.f32.mrf.mxu2 }
  0xe7   :  { %v1493_v21 = vadd.f32 %v1492_v16, %v1404_v9  ;;  %v1581_v10 = vpop.f32.mrf.mxu3  ;;  %v1405_v20 = vpop.f32.mrf.mxu1  ;;  %v3942_v9 = vpack.c.bf16 %v431_v31, %v427_v37  ;;  %v3944_v16 = vpack.c.bf16 %v432_v38, %v428_v7  ;;  %v3598_v31 = vld [vmem:[#allocation5 + $0x304] sm:$0xf]  ;;  %v3378_v7 = vld [vmem:[#allocation5 + $0x310] sm:$0xf0] }
  0xe8   :  { %v1316_v19 = vpop.f32.mrf.mxu0 }
  0xe9   :  { %v1582_v28 = vadd.f32 %v1581_v10, %v1493_v21  ;;  %v1406_v39 = vadd.f32 %v1405_v20, %v1316_v19  ;;  %4373 = vst [vmem:[#allocation24_spill] sm:$0xff] %v3942_v9  ;;  %v3946_v10 = vpack.c.bf16 %v433_v43, %v429_v41  ;;  %v3381_v43 = vor.u32 %v3598_v31, %v3378_v7  ;;  %v3534_v7 = vld [vmem:[#allocation5 + $0x104] sm:$0xf] }
  0xea   :  { %4374 = vst [vmem:[#allocation25_spill] sm:$0xff] %v3944_v16 }
  0xeb   :  { %v2738_v8 = vadd.f32 %v1582_v28, %v3867_v63  ;;  %4375 = vst [vmem:[#allocation26_spill] sm:$0xff] %v3946_v10  ;;  %1920 = vmatpush.bf16.msrb.mxu3 %v3381_v43 }
  0xed   :  { %2866 = vst [vmem:[#allocation8 + $0xc0] sm:$0xff] %v2738_v8  ;;  %v3566_v8 = vld [vmem:[#allocation5 + $0x204] sm:$0xf] }
  0xee   :  { %v1494_v60 = vpop.f32.mrf.mxu2  ;;  %v3253_v37 = vor.u32 %v3566_v8, %v3250_v30  ;;  %v441_v30 = vld [vmem:[#allocation2 + $0x378] sm:$0xff] }
  0xef   :  { %v1495_v5 = vadd.f32 %v1494_v60, %v1406_v39  ;;  %v1583_v61 = vpop.f32.mrf.mxu3  ;;  %v1408_v21 = vpop.f32.mrf.mxu1 }
  0xf0   :  { %v1319_v4 = vpop.f32.mrf.mxu0  ;;  %1831 = vmatpush.bf16.msrb.mxu2 %v3253_v37 }
  0xf1   :  { %v1584_v28 = vadd.f32 %v1583_v61, %v1495_v5  ;;  %v1409_v20 = vadd.f32 %v1408_v21, %v1319_v4  ;;  %v434_v61 = vld [vmem:[#allocation2 + $0x340] sm:$0xff] }
  0xf2   :  { %1447 = vmatmul.bf16.gmra.mxu1 %v3942_v9  ;;  %v438_v21 = vld [vmem:[#allocation2 + $0x360] sm:$0xff]  ;;  %v437_v9 = vld [vmem:[#allocation2 + $0x358] sm:$0xff] }
  0xf3   :  { %1358 = vmatmul.bf16.gmra.mxu0 %v3940_v62  ;;  %v2742_v19 = vadd.f32 %v1584_v28, %v3867_v63  ;;  %1536 = vmatmul.bf16.gmra.mxu2 %v3944_v16  ;;  %v435_v28 = vld [vmem:[#allocation2 + $0x348] sm:$0xff]  ;;  %v440_v16 = vld [vmem:[#allocation2 + $0x370] sm:$0xff]  ;;  %v3954_v31 = vpack.c.bf16 %v438_v21, %v434_v61 }
  0xf4   :  { %1625 = vmatmul.bf16.gmra.mxu3 %v3946_v10  ;;  %v436_v10 = vld [vmem:[#allocation2 + $0x350] sm:$0xff] }
  0xf5   :  { %2870 = vst [vmem:[#allocation8 + $0xe0] sm:$0xff] %v2742_v19  ;;  %v439_v19 = vld [vmem:[#allocation2 + $0x368] sm:$0xff]  ;;  %v3958_v17 = vpack.c.bf16 %v440_v16, %v436_v10 }
  0xf6   :  { %v1497_v36 = vpop.f32.mrf.mxu2  ;;  %4376 = vst [vmem:[#allocation27_spill] sm:$0xff] %v3954_v31  ;;  %v3956_v11 = vpack.c.bf16 %v439_v19, %v435_v28  ;;  %v442_v19 = vld [vmem:[#allocation2 + $0x380] sm:$0xff] }
  0xf7   :  { %v1498_v38 = vadd.f32 %v1497_v36, %v1409_v20  ;;  %v1586_v39 = vpop.f32.mrf.mxu3  ;;  %v1410_v60 = vpop.f32.mrf.mxu1  ;;  %v3502_v20 = vld [vmem:[#allocation5 + $0x4] sm:$0xf]  ;;  %v2994_v36 = vld [vmem:[#allocation5 + $0x10] sm:$0xf0]  ;;  %4378 = vst [vmem:[#allocation29_spill] sm:$0xff] %v3958_v17 }
  0xf8   :  { %v1321_v41 = vpop.f32.mrf.mxu0  ;;  %v2997_v37 = vor.u32 %v3502_v20, %v2994_v36  ;;  %4377 = vst [vmem:[#allocation28_spill] sm:$0xff] %v3956_v11  ;;  %v447_v20 = vld [vmem:[#allocation2 + $0x3a8] sm:$0xff]  ;;  %v448_v36 = vld [vmem:[#allocation2 + $0x3b0] sm:$0xff] }
  0xf9   :  { %v1587_v5 = vadd.f32 %v1586_v39, %v1498_v38  ;;  %v1411_v8 = vadd.f32 %v1410_v60, %v1321_v41  ;;  %v3122_v38 = vld [vmem:[#allocation5 + $0x110] sm:$0xf0] }
  0xfa   :  { %v3125_v6 = vor.u32 %v3534_v7, %v3122_v38  ;;  %1653 = vmatpush.bf16.msrb.mxu0 %v2997_v37  ;;  %v445_v7 = vld [vmem:[#allocation2 + $0x398] sm:$0xff] }
  0xfb   :  { %v2746_v4 = vadd.f32 %v1587_v5, %v3867_v63  ;;  %v449_v38 = vld [vmem:[#allocation2 + $0x3b8] sm:$0xff] }
  0xfc   :  { %1742 = vmatpush.bf16.msrb.mxu1 %v3125_v6 }
  0xfd   :  { %2874 = vst [vmem:[#allocation8 + $0x100] sm:$0xff] %v2746_v4  ;;  %v3960_v4 = vpack.c.bf16 %v441_v30, %v437_v9  ;;  %v443_v30 = vld [vmem:[#allocation2 + $0x388] sm:$0xff] }
  0xfe   :  { %v1499_v62 = vpop.f32.mrf.mxu2 }
  0xff   :  { %v1500_v39 = vadd.f32 %v1499_v62, %v1411_v8  ;;  %v1588_v43 = vpop.f32.mrf.mxu3  ;;  %v1413_v40 = vpop.f32.mrf.mxu1  ;;  %4379 = vst [vmem:[#allocation30_spill] sm:$0xff] %v3960_v4  ;;  %v446_v8 = vld [vmem:[#allocation2 + $0x3a0] sm:$0xff] }
 0x100   :  { %v1324_v5 = vpop.f32.mrf.mxu0 }
 0x101   :  { %v1589_v41 = vadd.f32 %v1588_v43, %v1500_v39  ;;  %v1414_v61 = vadd.f32 %v1413_v40, %v1324_v5  ;;  %v444_v40 = vld [vmem:[#allocation2 + $0x390] sm:$0xff]  ;;  %v3968_v43 = vpack.c.bf16 %v446_v8, %v442_v19  ;;  %v3597_v19 = vld [vmem:[#allocation5 + $0x2f4] sm:$0xf0] }
 0x102   :  { %1452 = vmatmul.bf16.gmra.mxu1 %v3956_v11 }
 0x103   :  { %1363 = vmatmul.bf16.gmra.mxu0 %v3954_v31  ;;  %v2750_v60 = vadd.f32 %v1589_v41, %v3867_v63  ;;  %1541 = vmatmul.bf16.gmra.mxu2 %v3958_v17  ;;  %4380 = vst [vmem:[#allocation31_spill] sm:$0xff] %v3968_v43 }
 0x104   :  { %1630 = vmatmul.bf16.gmra.mxu3 %v3960_v4 }
 0x105   :  { %2878 = vst [vmem:[#allocation8 + $0x120] sm:$0xff] %v2750_v60 }
 0x106   :  { %v1502_v62 = vpop.f32.mrf.mxu2 }
 0x107   :  { %v1503_v16 = vadd.f32 %v1502_v62, %v1414_v61  ;;  %v1591_v10 = vpop.f32.mrf.mxu3  ;;  %v1415_v21 = vpop.f32.mrf.mxu1  ;;  %v3970_v61 = vpack.c.bf16 %v447_v20, %v443_v30  ;;  %v3972_v62 = vpack.c.bf16 %v448_v36, %v444_v40  ;;  %v3496_v20 = vld [vmem:[#allocation5 + $0x3e8] sm:$0xf]  ;;  %v3629_v40 = vld [vmem:[#allocation5 + $0x3f4] sm:$0xf0] }
 0x108   :  { %v1326_v9 = vpop.f32.mrf.mxu0 }
 0x109   :  { %v1592_v28 = vadd.f32 %v1591_v10, %v1503_v16  ;;  %v1416_v37 = vadd.f32 %v1415_v21, %v1326_v9  ;;  %4381 = vst [vmem:[#allocation32_spill] sm:$0xff] %v3970_v61  ;;  %v3974_v10 = vpack.c.bf16 %v449_v38, %v445_v7  ;;  %v3497_v38 = vor.u32 %v3629_v40, %v3496_v20  ;;  %v3240_v40 = vld [vmem:[#allocation5 + $0x1e8] sm:$0xf] }
 0x10a   :  { %4382 = vst [vmem:[#allocation33_spill] sm:$0xff] %v3972_v62 }
 0x10b   :  { %v2754_v6 = vadd.f32 %v1592_v28, %v3867_v63  ;;  %4383 = vst [vmem:[#allocation34_spill] sm:$0xff] %v3974_v10  ;;  %2269 = vmatpush.bf16.msra.mxu3 %v3497_v38 }
 0x10d   :  { %2882 = vst [vmem:[#allocation8 + $0x140] sm:$0xff] %v2754_v6  ;;  %v3368_v6 = vld [vmem:[#allocation5 + $0x2e8] sm:$0xf] }
 0x10e   :  { %v1504_v39 = vpop.f32.mrf.mxu2  ;;  %v3369_v30 = vor.u32 %v3597_v19, %v3368_v6  ;;  %v457_v19 = vld [vmem:[#allocation2 + $0x3f8] sm:$0xff] }
 0x10f   :  { %v1505_v5 = vadd.f32 %v1504_v39, %v1416_v37  ;;  %v1593_v41 = vpop.f32.mrf.mxu3  ;;  %v1418_v16 = vpop.f32.mrf.mxu1 }
 0x110   :  { %v1329_v60 = vpop.f32.mrf.mxu0  ;;  %2180 = vmatpush.bf16.msra.mxu2 %v3369_v30 }
 0x111   :  { %v1594_v28 = vadd.f32 %v1593_v41, %v1505_v5  ;;  %v1419_v21 = vadd.f32 %v1418_v16, %v1329_v60  ;;  %v450_v41 = vld [vmem:[#allocation2 + $0x3c0] sm:$0xff] }
 0x112   :  { %1457 = vmatmul.bf16.gmra.mxu1 %v3970_v61  ;;  %v454_v16 = vld [vmem:[#allocation2 + $0x3e0] sm:$0xff]  ;;  %v453_v61 = vld [vmem:[#allocation2 + $0x3d8] sm:$0xff] }
 0x113   :  { %1368 = vmatmul.bf16.gmra.mxu0 %v3968_v43  ;;  %v2758_v9 = vadd.f32 %v1594_v28, %v3867_v63  ;;  %1546 = vmatmul.bf16.gmra.mxu2 %v3972_v62  ;;  %v451_v28 = vld [vmem:[#allocation2 + $0x3c8] sm:$0xff]  ;;  %v456_v62 = vld [vmem:[#allocation2 + $0x3f0] sm:$0xff]  ;;  %v3982_v20 = vpack.c.bf16 %v454_v16, %v450_v41 }
 0x114   :  { %1635 = vmatmul.bf16.gmra.mxu3 %v3974_v10  ;;  %v452_v10 = vld [vmem:[#allocation2 + $0x3d0] sm:$0xff] }
 0x115   :  { %2886 = vst [vmem:[#allocation8 + $0x160] sm:$0xff] %v2758_v9  ;;  %v455_v9 = vld [vmem:[#allocation2 + $0x3e8] sm:$0xff]  ;;  %v3986_v17 = vpack.c.bf16 %v456_v62, %v452_v10 }
 0x116   :  { %v1507_v8 = vpop.f32.mrf.mxu2  ;;  %v3984_v4 = vpack.c.bf16 %v455_v9, %v451_v28 }
 0x117   :  { %v1508_v36 = vadd.f32 %v1507_v8, %v1419_v21  ;;  %v1596_v37 = vpop.f32.mrf.mxu3  ;;  %v1420_v39 = vpop.f32.mrf.mxu1  ;;  %v3112_v21 = vld [vmem:[#allocation5 + $0xe8] sm:$0xf]  ;;  %v3533_v8 = vld [vmem:[#allocation5 + $0xf4] sm:$0xf0] }
 0x118   :  { %v1331_v7 = vpop.f32.mrf.mxu0  ;;  %v3113_v30 = vor.u32 %v3533_v8, %v3112_v21 }
 0x119   :  { %v1597_v5 = vadd.f32 %v1596_v37, %v1508_v36  ;;  %v1421_v6 = vadd.f32 %v1420_v39, %v1331_v7  ;;  %v3565_v36 = vld [vmem:[#allocation5 + $0x1f4] sm:$0xf0] }
 0x11a   :  { %v3241_v11 = vor.u32 %v3565_v36, %v3240_v40  ;;  %2002 = vmatpush.bf16.msra.mxu0 %v3113_v30 }
 0x11b   :  { %v2762_v60 = vadd.f32 %v1597_v5, %v3867_v63 }
 0x11c   :  { %2091 = vmatpush.bf16.msra.mxu1 %v3241_v11 }
 0x11d   :  { %2890 = vst [vmem:[#allocation8 + $0x180] sm:$0xff] %v2762_v60  ;;  %v3988_v60 = vpack.c.bf16 %v457_v19, %v453_v61 }
 0x11e   :  { %v1509_v43 = vpop.f32.mrf.mxu2 }
 0x11f   :  { %v1510_v37 = vadd.f32 %v1509_v43, %v1421_v6  ;;  %v1598_v38 = vpop.f32.mrf.mxu3  ;;  %v1423_v31 = vpop.f32.mrf.mxu1 }
 0x120   :  { %v1334_v5 = vpop.f32.mrf.mxu0 }
 0x121   :  { %v1599_v7 = vadd.f32 %v1598_v38, %v1510_v37  ;;  %v1424_v41 = vadd.f32 %v1423_v31, %v1334_v5  ;;  %v3352_v37 = vld [vmem:[#allocation5 + $0x2c8] sm:$0xf]  ;;  %v3593_v38 = vld [vmem:[#allocation5 + $0x2d4] sm:$0xf0] }
 0x122   :  { %1462 = vmatmul.bf16.gmra.mxu1 %v3984_v4 }
 0x123   :  { %1373 = vmatmul.bf16.gmra.mxu0 %v3982_v20  ;;  %v2766_v39 = vadd.f32 %v1599_v7, %v3867_v63  ;;  %1551 = vmatmul.bf16.gmra.mxu2 %v3986_v17  ;;  %v3353_v7 = vor.u32 %v3593_v38, %v3352_v37 }
 0x124   :  { %1640 = vmatmul.bf16.gmra.mxu3 %v3988_v60 }
 0x125   :  { %2894 = vst [vmem:[#allocation8 + $0x1a0] sm:$0xff] %v2766_v39  ;;  %v3480_v39 = vld [vmem:[#allocation5 + $0x3c8] sm:$0xf]  ;;  %2181 = vmatpush.bf16.msra.mxu2 %v3353_v7 }
 0x126   :  { %v1512_v43 = vpop.f32.mrf.mxu2 }
 0x127   :  { %v1513_v62 = vadd.f32 %v1512_v43, %v1424_v41  ;;  %v1601_v10 = vpop.f32.mrf.mxu3  ;;  %v1425_v16 = vpop.f32.mrf.mxu1  ;;  %v3625_v41 = vld [vmem:[#allocation5 + $0x3d4] sm:$0xf0] }
 0x128   :  { %v1336_v61 = vpop.f32.mrf.mxu0 }
 0x129   :  { %v1602_v28 = vadd.f32 %v1601_v10, %v1513_v62  ;;  %v1426_v9 = vadd.f32 %v1425_v16, %v1336_v61  ;;  %v3481_v61 = vor.u32 %v3625_v41, %v3480_v39 }
 0x12b   :  { %v2770_v11 = vadd.f32 %v1602_v28, %v3867_v63  ;;  %2270 = vmatpush.bf16.msra.mxu3 %v3481_v61 }
 0x12d   :  { %2898 = vst [vmem:[#allocation8 + $0x1c0] sm:$0xff] %v2770_v11 }
 0x12e   :  { %v1514_v6 = vpop.f32.mrf.mxu2 }
 0x12f   :  { %v1515_v19 = vadd.f32 %v1514_v6, %v1426_v9  ;;  %v1603_v31 = vpop.f32.mrf.mxu3  ;;  %v1428_v8 = vpop.f32.mrf.mxu1  ;;  %v3096_v6 = vld [vmem:[#allocation5 + $0xc8] sm:$0xf] }
 0x130   :  { %v1339_v21 = vpop.f32.mrf.mxu0 }
 0x131   :  { %v1604_v30 = vadd.f32 %v1603_v31, %v1515_v19  ;;  %v1429_v36 = vadd.f32 %v1428_v8, %v1339_v21  ;;  %v3529_v19 = vld [vmem:[#allocation5 + $0xd4] sm:$0xf0]  ;;  %v3224_v8 = vld [vmem:[#allocation5 + $0x1c8] sm:$0xf] }
 0x132   :  { %1743 = vmatmul.bf16.vlgmr.msrb.gmra.mxu1 %v3785_v51  ;;  %v3097_v21 = vor.u32 %v3529_v19, %v3096_v6 }
 0x133   :  { %1654 = vmatmul.bf16.vlgmr.msrb.gmra.mxu0 %v3783_v47  ;;  %v2774_v40 = vadd.f32 %v1604_v30, %v3867_v63  ;;  %1832 = vmatmul.bf16.vlgmr.msrb.gmra.mxu2 %v3787_v52  ;;  %v3561_v30 = vld [vmem:[#allocation5 + $0x1d4] sm:$0xf0] }
 0x134   :  { %1921 = vmatmul.bf16.vlgmr.msrb.gmra.mxu3 %v3789_v53  ;;  %v3225_v38 = vor.u32 %v3561_v30, %v3224_v8  ;;  %2003 = vmatpush.bf16.msra.mxu0 %v3097_v21 }
 0x135   :  { %2902 = vst [vmem:[#allocation8 + $0x1e0] sm:$0xff] %v2774_v40 }
 0x136   :  { %v1517_v5 = vpop.f32.mrf.mxu2  ;;  %2092 = vmatpush.bf16.msra.mxu1 %v3225_v38  ;;  %v3589_v38 = vld [vmem:[#allocation5 + $0x2b4] sm:$0xf0] }
 0x137   :  { %v1518_v43 = vadd.f32 %v1517_v5, %v1429_v36  ;;  %v1606_v62 = vpop.f32.mrf.mxu3  ;;  %v1430_v16 = vpop.f32.mrf.mxu1 }
 0x138   :  { %v1341_v10 = vpop.f32.mrf.mxu0 }
 0x139   :  { %v1607_v28 = vadd.f32 %v1606_v62, %v1518_v43  ;;  %v1431_v9 = vadd.f32 %v1430_v16, %v1341_v10 }
 0x13b   :  { %v2778_v11 = vadd.f32 %v1607_v28, %v3867_v63 }
 0x13d   :  { %2906 = vst [vmem:[#allocation8 + $0x200] sm:$0xff] %v2778_v11 }
 0x13e   :  { %v1519_v31 = vpop.f32.mrf.mxu2 }
 0x13f   :  { %v1520_v40 = vadd.f32 %v1519_v31, %v1431_v9  ;;  %v1608_v37 = vpop.f32.mrf.mxu3  ;;  %v1433_v5 = vpop.f32.mrf.mxu1 }
 0x140   :  { %v1344_v36 = vpop.f32.mrf.mxu0 }
 0x141   :  { %v1609_v39 = vadd.f32 %v1608_v37, %v1520_v40  ;;  %v1434_v41 = vadd.f32 %v1433_v5, %v1344_v36  ;;  %v3336_v36 = vld [vmem:[#allocation5 + $0x2a8] sm:$0xf] }
 0x142   :  { %1748 = vmatmul.bf16.gmra.mxu1 %v3797_v13 }
 0x143   :  { %1659 = vmatmul.bf16.gmra.mxu0 %v3795_v12  ;;  %v2782_v7 = vadd.f32 %v1609_v39, %v3867_v63  ;;  %1837 = vmatmul.bf16.gmra.mxu2 %v3799_v14  ;;  %v3337_v39 = vor.u32 %v3589_v38, %v3336_v36 }
 0x144   :  { %1926 = vmatmul.bf16.gmra.mxu3 %v3801_v15 }
 0x145   :  { %2910 = vst [vmem:[#allocation8 + $0x220] sm:$0xff] %v2782_v7  ;;  %v3464_v7 = vld [vmem:[#allocation5 + $0x3a8] sm:$0xf]  ;;  %2182 = vmatpush.bf16.msra.mxu2 %v3337_v39 }
 0x146   :  { %v1522_v43 = vpop.f32.mrf.mxu2 }
 0x147   :  { %v1523_v62 = vadd.f32 %v1522_v43, %v1434_v41  ;;  %v1611_v10 = vpop.f32.mrf.mxu3  ;;  %v1435_v16 = vpop.f32.mrf.mxu1  ;;  %v3621_v41 = vld [vmem:[#allocation5 + $0x3b4] sm:$0xf0] }
 0x148   :  { %v1346_v61 = vpop.f32.mrf.mxu0 }
 0x149   :  { %v1612_v28 = vadd.f32 %v1611_v10, %v1523_v62  ;;  %v1436_v9 = vadd.f32 %v1435_v16, %v1346_v61  ;;  %v3465_v61 = vor.u32 %v3621_v41, %v3464_v7 }
 0x14b   :  { %v2786_v11 = vadd.f32 %v1612_v28, %v3867_v63  ;;  %2271 = vmatpush.bf16.msra.mxu3 %v3465_v61 }
 0x14d   :  { %2914 = vst [vmem:[#allocation8 + $0x240] sm:$0xff] %v2786_v11 }
 0x14e   :  { %v1524_v6 = vpop.f32.mrf.mxu2 }
 0x14f   :  { %v1525_v19 = vadd.f32 %v1524_v6, %v1436_v9  ;;  %v1613_v31 = vpop.f32.mrf.mxu3  ;;  %v1438_v8 = vpop.f32.mrf.mxu1  ;;  %v3080_v6 = vld [vmem:[#allocation5 + $0xa8] sm:$0xf] }
 0x150   :  { %v1349_v21 = vpop.f32.mrf.mxu0 }
 0x151   :  { %v1614_v30 = vadd.f32 %v1613_v31, %v1525_v19  ;;  %v1439_v37 = vadd.f32 %v1438_v8, %v1349_v21  ;;  %v3525_v19 = vld [vmem:[#allocation5 + $0xb4] sm:$0xf0]  ;;  %v3208_v8 = vld [vmem:[#allocation5 + $0x1a8] sm:$0xf] }
 0x152   :  { %1753 = vmatmul.bf16.gmra.mxu1 %v3809_v25  ;;  %v3081_v21 = vor.u32 %v3525_v19, %v3080_v6 }
 0x153   :  { %1664 = vmatmul.bf16.gmra.mxu0 %v3807_v24  ;;  %v2790_v40 = vadd.f32 %v1614_v30, %v3867_v63  ;;  %1842 = vmatmul.bf16.gmra.mxu2 %v3811_v26  ;;  %v3557_v30 = vld [vmem:[#allocation5 + $0x1b4] sm:$0xf0] }
 0x154   :  { %1931 = vmatmul.bf16.gmra.mxu3 %v3813_v27  ;;  %v3209_v38 = vor.u32 %v3557_v30, %v3208_v8  ;;  %2004 = vmatpush.bf16.msra.mxu0 %v3081_v21 }
 0x155   :  { %2918 = vst [vmem:[#allocation8 + $0x260] sm:$0xff] %v2790_v40 }
 0x156   :  { %v1527_v5 = vpop.f32.mrf.mxu2  ;;  %2093 = vmatpush.bf16.msra.mxu1 %v3209_v38  ;;  %v3585_v38 = vld [vmem:[#allocation5 + $0x294] sm:$0xf0] }
 0x157   :  { %v1528_v43 = vadd.f32 %v1527_v5, %v1439_v37  ;;  %v1616_v62 = vpop.f32.mrf.mxu3  ;;  %v1440_v16 = vpop.f32.mrf.mxu1 }
 0x158   :  { %v1351_v10 = vpop.f32.mrf.mxu0 }
 0x159   :  { %v1617_v28 = vadd.f32 %v1616_v62, %v1528_v43  ;;  %v1441_v9 = vadd.f32 %v1440_v16, %v1351_v10 }
 0x15b   :  { %v2794_v11 = vadd.f32 %v1617_v28, %v3867_v63 }
 0x15d   :  { %2922 = vst [vmem:[#allocation8 + $0x280] sm:$0xff] %v2794_v11 }
 0x15e   :  { %v1529_v31 = vpop.f32.mrf.mxu2 }
 0x15f   :  { %v1530_v40 = vadd.f32 %v1529_v31, %v1441_v9  ;;  %v1618_v36 = vpop.f32.mrf.mxu3  ;;  %v1443_v5 = vpop.f32.mrf.mxu1 }
 0x160   :  { %v1354_v37 = vpop.f32.mrf.mxu0 }
 0x161   :  { %v1619_v7 = vadd.f32 %v1618_v36, %v1530_v40  ;;  %v1444_v41 = vadd.f32 %v1443_v5, %v1354_v37  ;;  %v3320_v37 = vld [vmem:[#allocation5 + $0x288] sm:$0xf] }
 0x162   :  { %1758 = vmatmul.bf16.gmra.mxu1 %v3821_v50 }
 0x163   :  { %1669 = vmatmul.bf16.gmra.mxu0 %v3819_v49  ;;  %v2798_v39 = vadd.f32 %v1619_v7, %v3867_v63  ;;  %1847 = vmatmul.bf16.gmra.mxu2 %v3823_v54  ;;  %v3321_v7 = vor.u32 %v3585_v38, %v3320_v37 }
 0x164   :  { %1936 = vmatmul.bf16.gmra.mxu3 %v3825_v55 }
 0x165   :  { %2926 = vst [vmem:[#allocation8 + $0x2a0] sm:$0xff] %v2798_v39  ;;  %v3448_v39 = vld [vmem:[#allocation5 + $0x388] sm:$0xf]  ;;  %2183 = vmatpush.bf16.msra.mxu2 %v3321_v7 }
 0x166   :  { %v1532_v43 = vpop.f32.mrf.mxu2  ;;  %v3638_v7 = vld [vmem:[#allocation8 + $0x380] sm:$0xff] }
 0x167   :  { %v1533_v62 = vadd.f32 %v1532_v43, %v1444_v41  ;;  %v1621_v10 = vpop.f32.mrf.mxu3  ;;  %v1445_v16 = vpop.f32.mrf.mxu1  ;;  %v3617_v41 = vld [vmem:[#allocation5 + $0x394] sm:$0xf0] }
 0x168   :  { %v1356_v61 = vpop.f32.mrf.mxu0 }
 0x169   :  { %v1622_v28 = vadd.f32 %v1621_v10, %v1533_v62  ;;  %v1446_v9 = vadd.f32 %v1445_v16, %v1356_v61  ;;  %v3449_v61 = vor.u32 %v3617_v41, %v3448_v39 }
 0x16b   :  { %v2802_v11 = vadd.f32 %v1622_v28, %v3867_v63  ;;  %2272 = vmatpush.bf16.msra.mxu3 %v3449_v61 }
 0x16d   :  { %2930 = vst [vmem:[#allocation8 + $0x2c0] sm:$0xff] %v2802_v11 }
 0x16e   :  { %v1534_v6 = vpop.f32.mrf.mxu2 }
 0x16f   :  { %v1535_v19 = vadd.f32 %v1534_v6, %v1446_v9  ;;  %v1623_v31 = vpop.f32.mrf.mxu3  ;;  %v1448_v8 = vpop.f32.mrf.mxu1  ;;  %v3064_v6 = vld [vmem:[#allocation5 + $0x88] sm:$0xf] }
 0x170   :  { %v1359_v21 = vpop.f32.mrf.mxu0 }
 0x171   :  { %v1624_v30 = vadd.f32 %v1623_v31, %v1535_v19  ;;  %v1449_v36 = vadd.f32 %v1448_v8, %v1359_v21  ;;  %v3521_v19 = vld [vmem:[#allocation5 + $0x94] sm:$0xf0]  ;;  %v3192_v8 = vld [vmem:[#allocation5 + $0x188] sm:$0xf] }
 0x172   :  { %1763 = vmatmul.bf16.gmra.mxu1 %v3833_v1  ;;  %v3065_v21 = vor.u32 %v3521_v19, %v3064_v6 }
 0x173   :  { %1674 = vmatmul.bf16.gmra.mxu0 %v3831_v0  ;;  %v2806_v40 = vadd.f32 %v1624_v30, %v3867_v63  ;;  %1852 = vmatmul.bf16.gmra.mxu2 %v3835_v2  ;;  %v3553_v30 = vld [vmem:[#allocation5 + $0x194] sm:$0xf0] }
 0x174   :  { %1941 = vmatmul.bf16.gmra.mxu3 %v3837_v3  ;;  %v3193_v38 = vor.u32 %v3553_v30, %v3192_v8  ;;  %2005 = vmatpush.bf16.msra.mxu0 %v3065_v21 }
 0x175   :  { %2934 = vst [vmem:[#allocation8 + $0x2e0] sm:$0xff] %v2806_v40 }
 0x176   :  { %v1537_v5 = vpop.f32.mrf.mxu2  ;;  %2094 = vmatpush.bf16.msra.mxu1 %v3193_v38  ;;  %v3581_v38 = vld [vmem:[#allocation5 + $0x274] sm:$0xf0] }
 0x177   :  { %v1538_v43 = vadd.f32 %v1537_v5, %v1449_v36  ;;  %v1626_v62 = vpop.f32.mrf.mxu3  ;;  %v1450_v16 = vpop.f32.mrf.mxu1 }
 0x178   :  { %v1361_v10 = vpop.f32.mrf.mxu0 }
 0x179   :  { %v1627_v28 = vadd.f32 %v1626_v62, %v1538_v43  ;;  %v1451_v9 = vadd.f32 %v1450_v16, %v1361_v10 }
 0x17b   :  { %v2810_v11 = vadd.f32 %v1627_v28, %v3867_v63 }
 0x17d   :  { %2938 = vst [vmem:[#allocation8 + $0x300] sm:$0xff] %v2810_v11 }
 0x17e   :  { %v1539_v31 = vpop.f32.mrf.mxu2 }
 0x17f   :  { %v1540_v40 = vadd.f32 %v1539_v31, %v1451_v9  ;;  %v1628_v37 = vpop.f32.mrf.mxu3  ;;  %v1453_v5 = vpop.f32.mrf.mxu1 }
 0x180   :  { %v1364_v36 = vpop.f32.mrf.mxu0 }
 0x181   :  { %v1629_v39 = vadd.f32 %v1628_v37, %v1540_v40  ;;  %v1454_v41 = vadd.f32 %v1453_v5, %v1364_v36  ;;  %v3304_v36 = vld [vmem:[#allocation5 + $0x268] sm:$0xf] }
 0x182   :  { %1768 = vmatmul.bf16.gmra.mxu1 %v3845_v33 }
 0x183   :  { %1679 = vmatmul.bf16.gmra.mxu0 %v3843_v32  ;;  %v2814_v63 = vadd.f32 %v3638_v7, %v1629_v39  ;;  %1857 = vmatmul.bf16.gmra.mxu2 %v3847_v34  ;;  %v3305_v39 = vor.u32 %v3581_v38, %v3304_v36 }
 0x184   :  { %1946 = vmatmul.bf16.gmra.mxu3 %v3849_v35 }
 0x185   :  { %2942 = vst [vmem:[#allocation8 + $0x320] sm:$0xff] %v2814_v63  ;;  %v3432_v63 = vld [vmem:[#allocation5 + $0x368] sm:$0xf]  ;;  %2184 = vmatpush.bf16.msra.mxu2 %v3305_v39 }
 0x186   :  { %v1542_v43 = vpop.f32.mrf.mxu2 }
 0x187   :  { %v1543_v62 = vadd.f32 %v1542_v43, %v1454_v41  ;;  %v1631_v10 = vpop.f32.mrf.mxu3  ;;  %v1455_v16 = vpop.f32.mrf.mxu1  ;;  %v3613_v41 = vld [vmem:[#allocation5 + $0x374] sm:$0xf0] }
 0x188   :  { %v1366_v61 = vpop.f32.mrf.mxu0 }
 0x189   :  { %v1632_v28 = vadd.f32 %v1631_v10, %v1543_v62  ;;  %v1456_v9 = vadd.f32 %v1455_v16, %v1366_v61  ;;  %v3433_v61 = vor.u32 %v3613_v41, %v3432_v63  ;;  %v314_v16 = vld [vmem:[#allocation8 + $0x380] sm:$0xff] }
 0x18b   :  { %v2818_v11 = vadd.f32 %v3638_v7, %v1632_v28  ;;  %2273 = vmatpush.bf16.msra.mxu3 %v3433_v61 }
 0x18d   :  { %2946 = vst [vmem:[#allocation8 + $0x340] sm:$0xff] %v2818_v11 }
 0x18e   :  { %v1544_v6 = vpop.f32.mrf.mxu2 }
 0x18f   :  { %v1545_v19 = vadd.f32 %v1544_v6, %v1456_v9  ;;  %v1633_v31 = vpop.f32.mrf.mxu3  ;;  %v1458_v8 = vpop.f32.mrf.mxu1  ;;  %v3048_v6 = vld [vmem:[#allocation5 + $0x68] sm:$0xf] }
 0x190   :  { %v1369_v21 = vpop.f32.mrf.mxu0 }
 0x191   :  { %v1634_v30 = vadd.f32 %v1633_v31, %v1545_v19  ;;  %v1459_v37 = vadd.f32 %v1458_v8, %v1369_v21  ;;  %v3517_v19 = vld [vmem:[#allocation5 + $0x74] sm:$0xf0]  ;;  %v3176_v8 = vld [vmem:[#allocation5 + $0x168] sm:$0xf] }
 0x192   :  { %1773 = vmatmul.bf16.gmra.mxu1 %v3857_v45  ;;  %v3049_v21 = vor.u32 %v3517_v19, %v3048_v6 }
 0x193   :  { %1684 = vmatmul.bf16.gmra.mxu0 %v3855_v44  ;;  %v2822_v40 = vadd.f32 %v3638_v7, %v1634_v30  ;;  %1862 = vmatmul.bf16.gmra.mxu2 %v3859_v46  ;;  %v3549_v30 = vld [vmem:[#allocation5 + $0x174] sm:$0xf0] }
 0x194   :  { %1951 = vmatmul.bf16.gmra.mxu3 %v3861_v48  ;;  %v3177_v38 = vor.u32 %v3549_v30, %v3176_v8  ;;  %2006 = vmatpush.bf16.msra.mxu0 %v3049_v21  ;;  %v326_v30 = vld [vmem:[#allocation8 + $0x3e0] sm:$0xff] }
 0x195   :  { %2950 = vst [vmem:[#allocation8 + $0x360] sm:$0xff] %v2822_v40 }
 0x196   :  { %v1547_v5 = vpop.f32.mrf.mxu2  ;;  %2095 = vmatpush.bf16.msra.mxu1 %v3177_v38 }
 0x197   :  { %v1548_v43 = vadd.f32 %v1547_v5, %v1459_v37  ;;  %v1636_v62 = vpop.f32.mrf.mxu3  ;;  %v1460_v7 = vpop.f32.mrf.mxu1  ;;  %v318_v5 = vld [vmem:[#allocation8 + $0x3a0] sm:$0xff] }
 0x198   :  { %v1371_v10 = vpop.f32.mrf.mxu0 }
 0x199   :  { %v1637_v28 = vadd.f32 %v1636_v62, %v1548_v43  ;;  %v1461_v9 = vadd.f32 %v1460_v7, %v1371_v10  ;;  %v322_v7 = vld [vmem:[#allocation8 + $0x3c0] sm:$0xff] }
 0x19b   :  { %v2826_v11 = vadd.f32 %v1637_v28, %v314_v16 }
 0x19d   :  { %2954 = vst [vmem:[#allocation8 + $0x380] sm:$0xff] %v2826_v11 }
 0x19e   :  { %v1549_v31 = vpop.f32.mrf.mxu2 }
 0x19f   :  { %v1550_v40 = vadd.f32 %v1549_v31, %v1461_v9  ;;  %v1638_v36 = vpop.f32.mrf.mxu3  ;;  %v1463_v63 = vpop.f32.mrf.mxu1 }
 0x1a0   :  { %v1374_v37 = vpop.f32.mrf.mxu0 }
 0x1a1   :  { %v1639_v41 = vadd.f32 %v1638_v36, %v1550_v40  ;;  %v1464_v43 = vadd.f32 %v1463_v63, %v1374_v37  ;;  %v3577_v63 = vld [vmem:[#allocation5 + $0x254] sm:$0xf0] }
 0x1a2   :  { %1778 = vmatmul.bf16.gmra.mxu1 %v3875_v22 }
 0x1a3   :  { %1689 = vmatmul.bf16.gmra.mxu0 %v3873_v18  ;;  %v2830_v39 = vadd.f32 %v1639_v41, %v318_v5  ;;  %1867 = vmatmul.bf16.gmra.mxu2 %v3877_v23  ;;  %v3288_v5 = vld [vmem:[#allocation5 + $0x248] sm:$0xf] }
 0x1a4   :  { %1956 = vmatmul.bf16.gmra.mxu3 %v3879_v29 }
 0x1a5   :  { %2958 = vst [vmem:[#allocation8 + $0x3a0] sm:$0xff] %v2830_v39  ;;  %v3289_v39 = vor.u32 %v3577_v63, %v3288_v5 }
 0x1a6   :  { %v1552_v62 = vpop.f32.mrf.mxu2 }
 0x1a7   :  { %v1553_v10 = vadd.f32 %v1552_v62, %v1464_v43  ;;  %v1641_v61 = vpop.f32.mrf.mxu3  ;;  %v1465_v28 = vpop.f32.mrf.mxu1  ;;  %v3416_v43 = vld [vmem:[#allocation5 + $0x348] sm:$0xf]  ;;  %v3609_v62 = vld [vmem:[#allocation5 + $0x354] sm:$0xf0]  ;;  %2185 = vmatpush.bf16.msra.mxu2 %v3289_v39 }
 0x1a8   :  { %v1376_v16 = vpop.f32.mrf.mxu0 }
 0x1a9   :  { %v1642_v11 = vadd.f32 %v1641_v61, %v1553_v10  ;;  %v1466_v6 = vadd.f32 %v1465_v28, %v1376_v16  ;;  %v4042_v61 = vld [vmem:[#allocation7] sm:$0xf] }
 0x1aa   :  { %4384 = vst [vmem:[#allocation35_spill] sm:$0xff] %v4042_v61  ;;  %v4045_v16 = vperm.slane %v4042_v61, 1 }
 0x1ab   :  { %v2834_v9 = vadd.f32 %v1642_v11, %v322_v7  ;;  %v3417_v11 = vor.u32 %v3609_v62, %v3416_v43 }
 0x1ad   :  { %2962 = vst [vmem:[#allocation8 + $0x3c0] sm:$0xff] %v2834_v9  ;;  %2274 = vmatpush.bf16.msra.mxu3 %v3417_v11 }
 0x1ae   :  { %v1554_v19 = vpop.f32.mrf.mxu2 }
 0x1af   :  { %v1555_v31 = vadd.f32 %v1554_v19, %v1466_v6  ;;  %v1643_v21 = vpop.f32.mrf.mxu3  ;;  %v1744_v40 = vpop.f32.mrf.mxu1 }
 0x1b0   :  { %v1655_v8 = vpop.f32.mrf.mxu0 }
 0x1b1   :  { %v1644_v36 = vadd.f32 %v1643_v21, %v1555_v31  ;;  %v1745_v38 = vadd.f32 %v1744_v40, %v1655_v8  ;;  %v3032_v21 = vld [vmem:[#allocation5 + $0x48] sm:$0xf]  ;;  %v3513_v8 = vld [vmem:[#allocation5 + $0x54] sm:$0xf0] }
 0x1b2   :  { %1783 = vmatmul.bf16.gmra.mxu1 %v3887_v56  ;;  %v3033_v40 = vor.u32 %v3513_v8, %v3032_v21 }
 0x1b3   :  { %1694 = vmatmul.bf16.gmra.mxu0 %v3885_v42  ;;  %v2838_v37 = vadd.f32 %v1644_v36, %v326_v30  ;;  %1872 = vmatmul.bf16.gmra.mxu2 %v3889_v57  ;;  %v3160_v36 = vld [vmem:[#allocation5 + $0x148] sm:$0xf] }
 0x1b4   :  { %1961 = vmatmul.bf16.gmra.mxu3 %v3891_v59  ;;  %2007 = vmatpush.bf16.msra.mxu0 %v3033_v40 }
 0x1b5   :  { %2966 = vst [vmem:[#allocation8 + $0x3e0] sm:$0xff] %v2838_v37  ;;  %v3545_v37 = vld [vmem:[#allocation5 + $0x154] sm:$0xf0] }
 0x1b6   :  { %v1833_v41 = vpop.f32.mrf.mxu2 }
 0x1b7   :  { %v1834_v10 = vadd.f32 %v1833_v41, %v1745_v38  ;;  %v1922_v7 = vpop.f32.mrf.mxu3  ;;  %v1746_v9 = vpop.f32.mrf.mxu1  ;;  %v3161_v41 = vor.u32 %v3545_v37, %v3160_v36 }
 0x1b8   :  { %v1657_v28 = vpop.f32.mrf.mxu0 }
 0x1b9   :  { %v1923_v6 = vadd.f32 %v1922_v7, %v1834_v10  ;;  %v1747_v31 = vadd.f32 %v1746_v9, %v1657_v28  ;;  %2096 = vmatpush.bf16.msra.mxu1 %v3161_v41  ;;  %v4385_v10 = vld [vmem:[#allocation12_spill] sm:$0xff]  ;;  %v4386_v7 = vld [vmem:[#allocation13_spill] sm:$0xff]  ;;  %v4387_v28 = vld [vmem:[#allocation14_spill] sm:$0xff] }
 0x1bb   :  { %v2715_v19 = vadd.f32 %v1923_v6, %v4045_v16 }
 0x1bd   :  { %2843 = vst [vmem:[#allocation8 + $0x8] sm:$0xff] %v2715_v19 }
 0x1be   :  { %v1835_v30 = vpop.f32.mrf.mxu2 }
 0x1bf   :  { %v1836_v38 = vadd.f32 %v1835_v30, %v1747_v31  ;;  %v1924_v5 = vpop.f32.mrf.mxu3  ;;  %v1749_v61 = vpop.f32.mrf.mxu1 }
 0x1c0   :  { %v1660_v63 = vpop.f32.mrf.mxu0 }
 0x1c1   :  { %v1925_v43 = vadd.f32 %v1924_v5, %v1836_v38  ;;  %v1750_v62 = vadd.f32 %v1749_v61, %v1660_v63  ;;  %v4388_v63 = vld [vmem:[#allocation15_spill] sm:$0xff] }
 0x1c2   :  { %1788 = vmatmul.bf16.gmra.mxu1 %v4385_v10 }
 0x1c3   :  { %1699 = vmatmul.bf16.gmra.mxu0 %v3898_v58  ;;  %v2719_v39 = vadd.f32 %v1925_v43, %v4045_v16  ;;  %1877 = vmatmul.bf16.gmra.mxu2 %v4386_v7 }
 0x1c4   :  { %1966 = vmatmul.bf16.gmra.mxu3 %v4387_v28  ;;  %v3144_v28 = vld [vmem:[#allocation5 + $0x128] sm:$0xf] }
 0x1c5   :  { %2847 = vst [vmem:[#allocation8 + $0x28] sm:$0xff] %v2719_v39  ;;  %v4389_v39 = vld [vmem:[#allocation16_spill] sm:$0xff] }
 0x1c6   :  { %v1838_v11 = vpop.f32.mrf.mxu2 }
 0x1c7   :  { %v1839_v9 = vadd.f32 %v1838_v11, %v1750_v62  ;;  %v1927_v6 = vpop.f32.mrf.mxu3  ;;  %v1751_v31 = vpop.f32.mrf.mxu1  ;;  %v4390_v62 = vld [vmem:[#allocation17_spill] sm:$0xff]  ;;  %v4391_v11 = vld [vmem:[#allocation18_spill] sm:$0xff] }
 0x1c8   :  { %v1662_v19 = vpop.f32.mrf.mxu0 }
 0x1c9   :  { %v1928_v21 = vadd.f32 %v1927_v6, %v1839_v9  ;;  %v1752_v30 = vadd.f32 %v1751_v31, %v1662_v19  ;;  %v3272_v9 = vld [vmem:[#allocation5 + $0x228] sm:$0xf]  ;;  %v3573_v6 = vld [vmem:[#allocation5 + $0x234] sm:$0xf0] }
 0x1ca   :  { %v3273_v31 = vor.u32 %v3573_v6, %v3272_v9  ;;  %v3541_v9 = vld [vmem:[#allocation5 + $0x134] sm:$0xf0] }
 0x1cb   :  { %v2723_v8 = vadd.f32 %v1928_v21, %v4045_v16  ;;  %v3400_v21 = vld [vmem:[#allocation5 + $0x328] sm:$0xf] }
 0x1cc   :  { %2186 = vmatpush.bf16.msra.mxu2 %v3273_v31  ;;  %v4392_v31 = vld [vmem:[#allocation19_spill] sm:$0xff] }
 0x1cd   :  { %2851 = vst [vmem:[#allocation8 + $0x48] sm:$0xff] %v2723_v8  ;;  %v3605_v8 = vld [vmem:[#allocation5 + $0x334] sm:$0xf0] }
 0x1ce   :  { %v1840_v40 = vpop.f32.mrf.mxu2 }
 0x1cf   :  { %v1841_v36 = vadd.f32 %v1840_v40, %v1752_v30  ;;  %v1929_v61 = vpop.f32.mrf.mxu3  ;;  %v1754_v38 = vpop.f32.mrf.mxu1 }
 0x1d0   :  { %v1665_v37 = vpop.f32.mrf.mxu0 }
 0x1d1   :  { %v1930_v5 = vadd.f32 %v1929_v61, %v1841_v36  ;;  %v1755_v43 = vadd.f32 %v1754_v38, %v1665_v37  ;;  %v3401_v61 = vor.u32 %v3605_v8, %v3400_v21 }
 0x1d2   :  { %1793 = vmatmul.bf16.gmra.mxu1 %v4389_v39 }
 0x1d3   :  { %1704 = vmatmul.bf16.gmra.mxu0 %v4388_v63  ;;  %v2727_v41 = vadd.f32 %v1930_v5, %v4045_v16  ;;  %1882 = vmatmul.bf16.gmra.mxu2 %v4390_v62 }
 0x1d4   :  { %1971 = vmatmul.bf16.gmra.mxu3 %v4391_v11  ;;  %v3016_v11 = vld [vmem:[#allocation5 + $0x28] sm:$0xf] }
 0x1d5   :  { %2855 = vst [vmem:[#allocation8 + $0x68] sm:$0xff] %v2727_v41  ;;  %2275 = vmatpush.bf16.msra.mxu3 %v3401_v61  ;;  %v3509_v41 = vld [vmem:[#allocation5 + $0x34] sm:$0xf0] }
 0x1d6   :  { %v1843_v19 = vpop.f32.mrf.mxu2  ;;  %v3017_v39 = vor.u32 %v3509_v41, %v3016_v11  ;;  %v4395_v11 = vld [vmem:[#allocation22_spill] sm:$0xff] }
 0x1d7   :  { %v1844_v30 = vadd.f32 %v1843_v19, %v1755_v43  ;;  %v1932_v40 = vpop.f32.mrf.mxu3  ;;  %v1756_v63 = vpop.f32.mrf.mxu1  ;;  %v3145_v19 = vor.u32 %v3541_v9, %v3144_v28 }
 0x1d8   :  { %v1667_v36 = vpop.f32.mrf.mxu0  ;;  %2008 = vmatpush.bf16.msra.mxu0 %v3017_v39 }
 0x1d9   :  { %v1933_v37 = vadd.f32 %v1932_v40, %v1844_v30  ;;  %v1757_v5 = vadd.f32 %v1756_v63, %v1667_v36  ;;  %2097 = vmatpush.bf16.msra.mxu1 %v3145_v19  ;;  %v4393_v63 = vld [vmem:[#allocation20_spill] sm:$0xff]  ;;  %v4394_v40 = vld [vmem:[#allocation21_spill] sm:$0xff]  ;;  %v4396_v19 = vld [vmem:[#allocation23_spill] sm:$0xff] }
 0x1db   :  { %v2731_v38 = vadd.f32 %v1933_v37, %v4045_v16 }
 0x1dd   :  { %2859 = vst [vmem:[#allocation8 + $0x88] sm:$0xff] %v2731_v38 }
 0x1de   :  { %v1845_v62 = vpop.f32.mrf.mxu2 }
 0x1df   :  { %v1846_v6 = vadd.f32 %v1845_v62, %v1757_v5  ;;  %v1934_v7 = vpop.f32.mrf.mxu3  ;;  %v1759_v10 = vpop.f32.mrf.mxu1 }
 0x1e0   :  { %v1670_v43 = vpop.f32.mrf.mxu0 }
 0x1e1   :  { %v1935_v21 = vadd.f32 %v1934_v7, %v1846_v6  ;;  %v1760_v30 = vadd.f32 %v1759_v10, %v1670_v43 }
 0x1e2   :  { %1798 = vmatmul.bf16.gmra.mxu1 %v4393_v63 }
 0x1e3   :  { %1709 = vmatmul.bf16.gmra.mxu0 %v4392_v31  ;;  %v2735_v8 = vadd.f32 %v1935_v21, %v4045_v16  ;;  %1887 = vmatmul.bf16.gmra.mxu2 %v4394_v40  ;;  %v3128_v40 = vld [vmem:[#allocation5 + $0x108] sm:$0xf] }
 0x1e4   :  { %1976 = vmatmul.bf16.gmra.mxu3 %v4395_v11 }
 0x1e5   :  { %2863 = vst [vmem:[#allocation8 + $0xa8] sm:$0xff] %v2735_v8 }
 0x1e6   :  { %v1848_v62 = vpop.f32.mrf.mxu2 }
 0x1e7   :  { %v1849_v36 = vadd.f32 %v1848_v62, %v1760_v30  ;;  %v1937_v61 = vpop.f32.mrf.mxu3  ;;  %v1761_v37 = vpop.f32.mrf.mxu1  ;;  %v4397_v30 = vld [vmem:[#allocation24_spill] sm:$0xff]  ;;  %v4398_v62 = vld [vmem:[#allocation25_spill] sm:$0xff] }
 0x1e8   :  { %v1672_v28 = vpop.f32.mrf.mxu0 }
 0x1e9   :  { %v1938_v39 = vadd.f32 %v1937_v61, %v1849_v36  ;;  %v1762_v38 = vadd.f32 %v1761_v37, %v1672_v28  ;;  %v4399_v36 = vld [vmem:[#allocation26_spill] sm:$0xff]  ;;  %v3256_v61 = vld [vmem:[#allocation5 + $0x208] sm:$0xf] }
 0x1ea   :  { %v3569_v28 = vld [vmem:[#allocation5 + $0x214] sm:$0xf0] }
 0x1eb   :  { %v2739_v7 = vadd.f32 %v1938_v39, %v4045_v16  ;;  %v3257_v39 = vor.u32 %v3569_v28, %v3256_v61  ;;  %v3537_v61 = vld [vmem:[#allocation5 + $0x114] sm:$0xf0] }
 0x1ed   :  { %2867 = vst [vmem:[#allocation8 + $0xc8] sm:$0xff] %v2739_v7  ;;  %v3384_v7 = vld [vmem:[#allocation5 + $0x308] sm:$0xf]  ;;  %2187 = vmatpush.bf16.msra.mxu2 %v3257_v39  ;;  %v4400_v39 = vld [vmem:[#allocation27_spill] sm:$0xff] }
 0x1ee   :  { %v1850_v5 = vpop.f32.mrf.mxu2 }
 0x1ef   :  { %v1851_v41 = vadd.f32 %v1850_v5, %v1762_v38  ;;  %v1939_v10 = vpop.f32.mrf.mxu3  ;;  %v1764_v6 = vpop.f32.mrf.mxu1  ;;  %v3601_v38 = vld [vmem:[#allocation5 + $0x314] sm:$0xf0] }
 0x1f0   :  { %v1675_v9 = vpop.f32.mrf.mxu0 }
 0x1f1   :  { %v1940_v43 = vadd.f32 %v1939_v10, %v1851_v41  ;;  %v1765_v8 = vadd.f32 %v1764_v6, %v1675_v9 }
 0x1f2   :  { %1803 = vmatmul.bf16.gmra.mxu1 %v4397_v30 }
 0x1f3   :  { %1714 = vmatmul.bf16.gmra.mxu0 %v4396_v19  ;;  %v2743_v21 = vadd.f32 %v1940_v43, %v4045_v16  ;;  %1892 = vmatmul.bf16.gmra.mxu2 %v4398_v62  ;;  %v3385_v19 = vor.u32 %v3601_v38, %v3384_v7 }
 0x1f4   :  { %1981 = vmatmul.bf16.gmra.mxu3 %v4399_v36  ;;  %v3000_v36 = vld [vmem:[#allocation5 + $0x8] sm:$0xf] }
 0x1f5   :  { %2871 = vst [vmem:[#allocation8 + $0xe8] sm:$0xff] %v2743_v21  ;;  %2276 = vmatpush.bf16.msra.mxu3 %v3385_v19  ;;  %v3505_v21 = vld [vmem:[#allocation5 + $0x14] sm:$0xf0] }
 0x1f6   :  { %v1853_v37 = vpop.f32.mrf.mxu2  ;;  %v3001_v30 = vor.u32 %v3505_v21, %v3000_v36  ;;  %v4403_v36 = vld [vmem:[#allocation30_spill] sm:$0xff] }
 0x1f7   :  { %v1854_v5 = vadd.f32 %v1853_v37, %v1765_v8  ;;  %v1942_v41 = vpop.f32.mrf.mxu3  ;;  %v1766_v11 = vpop.f32.mrf.mxu1  ;;  %v3129_v37 = vor.u32 %v3537_v61, %v3128_v40 }
 0x1f8   :  { %v1677_v10 = vpop.f32.mrf.mxu0  ;;  %2009 = vmatpush.bf16.msra.mxu0 %v3001_v30 }
 0x1f9   :  { %v1943_v9 = vadd.f32 %v1942_v41, %v1854_v5  ;;  %v1767_v43 = vadd.f32 %v1766_v11, %v1677_v10  ;;  %2098 = vmatpush.bf16.msra.mxu1 %v3129_v37  ;;  %v4401_v11 = vld [vmem:[#allocation28_spill] sm:$0xff]  ;;  %v4402_v5 = vld [vmem:[#allocation29_spill] sm:$0xff]  ;;  %v4404_v37 = vld [vmem:[#allocation31_spill] sm:$0xff] }
 0x1fb   :  { %v2747_v6 = vadd.f32 %v1943_v9, %v4045_v16 }
 0x1fd   :  { %2875 = vst [vmem:[#allocation8 + $0x108] sm:$0xff] %v2747_v6 }
 0x1fe   :  { %v1855_v62 = vpop.f32.mrf.mxu2 }
 0x1ff   :  { %v1856_v28 = vadd.f32 %v1855_v62, %v1767_v43  ;;  %v1944_v63 = vpop.f32.mrf.mxu3  ;;  %v1769_v31 = vpop.f32.mrf.mxu1 }
 0x200   :  { %v1680_v8 = vpop.f32.mrf.mxu0 }
 0x201   :  { %v1945_v7 = vadd.f32 %v1944_v63, %v1856_v28  ;;  %v1770_v38 = vadd.f32 %v1769_v31, %v1680_v8 }
 0x202   :  { %1808 = vmatmul.bf16.gmra.mxu1 %v4401_v11 }
 0x203   :  { %1719 = vmatmul.bf16.gmra.mxu0 %v4400_v39  ;;  %v2751_v19 = vadd.f32 %v1945_v7, %v4045_v16  ;;  %1897 = vmatmul.bf16.gmra.mxu2 %v4402_v5  ;;  %v3563_v5 = vld [vmem:[#allocation5 + $0x1ec] sm:$0xf] }
 0x204   :  { %1986 = vmatmul.bf16.gmra.mxu3 %v4403_v36 }
 0x205   :  { %2879 = vst [vmem:[#allocation8 + $0x128] sm:$0xff] %v2751_v19 }
 0x206   :  { %v1858_v62 = vpop.f32.mrf.mxu2 }
 0x207   :  { %v1859_v41 = vadd.f32 %v1858_v62, %v1770_v38  ;;  %v1947_v10 = vpop.f32.mrf.mxu3  ;;  %v1771_v9 = vpop.f32.mrf.mxu1  ;;  %v4405_v38 = vld [vmem:[#allocation32_spill] sm:$0xff]  ;;  %v4406_v62 = vld [vmem:[#allocation33_spill] sm:$0xff] }
 0x208   :  { %v1682_v40 = vpop.f32.mrf.mxu0 }
 0x209   :  { %v1948_v30 = vadd.f32 %v1947_v10, %v1859_v41  ;;  %v1772_v6 = vadd.f32 %v1771_v9, %v1682_v40  ;;  %v4407_v41 = vld [vmem:[#allocation34_spill] sm:$0xff]  ;;  %v3595_v10 = vld [vmem:[#allocation5 + $0x2ec] sm:$0xf]  ;;  %v3370_v40 = vld [vmem:[#allocation5 + $0x2f8] sm:$0xf0] }
 0x20b   :  { %v2755_v63 = vadd.f32 %v1948_v30, %v4045_v16  ;;  %v3373_v30 = vor.u32 %v3595_v10, %v3370_v40  ;;  %v3242_v10 = vld [vmem:[#allocation5 + $0x1f8] sm:$0xf0] }
 0x20d   :  { %2883 = vst [vmem:[#allocation8 + $0x148] sm:$0xff] %v2755_v63  ;;  %v3627_v63 = vld [vmem:[#allocation5 + $0x3ec] sm:$0xf]  ;;  %2536 = vmatpush.bf16.msrb.mxu2 %v3373_v30 }
 0x20e   :  { %v1860_v43 = vpop.f32.mrf.mxu2 }
 0x20f   :  { %v1861_v21 = vadd.f32 %v1860_v43, %v1772_v6  ;;  %v1949_v31 = vpop.f32.mrf.mxu3  ;;  %v1774_v28 = vpop.f32.mrf.mxu1  ;;  %v3498_v6 = vld [vmem:[#allocation5 + $0x3f8] sm:$0xf0] }
 0x210   :  { %v1685_v61 = vpop.f32.mrf.mxu0 }
 0x211   :  { %v1950_v8 = vadd.f32 %v1949_v31, %v1861_v21  ;;  %v1775_v19 = vadd.f32 %v1774_v28, %v1685_v61 }
 0x212   :  { %1813 = vmatmul.bf16.gmra.mxu1 %v4405_v38 }
 0x213   :  { %1724 = vmatmul.bf16.gmra.mxu0 %v4404_v37  ;;  %v2759_v7 = vadd.f32 %v1950_v8, %v4045_v16  ;;  %1902 = vmatmul.bf16.gmra.mxu2 %v4406_v62  ;;  %v3501_v37 = vor.u32 %v3627_v63, %v3498_v6 }
 0x214   :  { %1991 = vmatmul.bf16.gmra.mxu3 %v4407_v41  ;;  %v3531_v41 = vld [vmem:[#allocation5 + $0xec] sm:$0xf] }
 0x215   :  { %2887 = vst [vmem:[#allocation8 + $0x168] sm:$0xff] %v2759_v7  ;;  %2625 = vmatpush.bf16.msrb.mxu3 %v3501_v37  ;;  %v3114_v7 = vld [vmem:[#allocation5 + $0xf8] sm:$0xf0] }
 0x216   :  { %v1863_v9 = vpop.f32.mrf.mxu2  ;;  %v3117_v38 = vor.u32 %v3531_v41, %v3114_v7 }
 0x217   :  { %v1864_v43 = vadd.f32 %v1863_v9, %v1775_v19  ;;  %v1952_v21 = vpop.f32.mrf.mxu3  ;;  %v1776_v36 = vpop.f32.mrf.mxu1  ;;  %v3245_v9 = vor.u32 %v3563_v5, %v3242_v10 }
 0x218   :  { %v1687_v31 = vpop.f32.mrf.mxu0  ;;  %2358 = vmatpush.bf16.msrb.mxu0 %v3117_v38 }
 0x219   :  { %v1953_v61 = vadd.f32 %v1952_v21, %v1864_v43  ;;  %v1777_v8 = vadd.f32 %v1776_v36, %v1687_v31  ;;  %2447 = vmatpush.bf16.msrb.mxu1 %v3245_v9 }
 0x21b   :  { %v2763_v28 = vadd.f32 %v1953_v61, %v4045_v16 }
 0x21d   :  { %2891 = vst [vmem:[#allocation8 + $0x188] sm:$0xff] %v2763_v28 }
 0x21e   :  { %v1865_v62 = vpop.f32.mrf.mxu2 }
 0x21f   :  { %v1866_v40 = vadd.f32 %v1865_v62, %v1777_v8  ;;  %v1954_v11 = vpop.f32.mrf.mxu3  ;;  %v1779_v39 = vpop.f32.mrf.mxu1 }
 0x220   :  { %v1690_v19 = vpop.f32.mrf.mxu0 }
 0x221   :  { %v1955_v63 = vadd.f32 %v1954_v11, %v1866_v40  ;;  %v1780_v30 = vadd.f32 %v1779_v39, %v1690_v19  ;;  %v3591_v40 = vld [vmem:[#allocation5 + $0x2cc] sm:$0xf]  ;;  %v3354_v19 = vld [vmem:[#allocation5 + $0x2d8] sm:$0xf0] }
 0x222   :  { %1818 = vmatmul.bf16.gmra.mxu1 %v3984_v4 }
 0x223   :  { %1729 = vmatmul.bf16.gmra.mxu0 %v3982_v20  ;;  %v2767_v37 = vadd.f32 %v1955_v63, %v4045_v16  ;;  %1907 = vmatmul.bf16.gmra.mxu2 %v3986_v17  ;;  %v3357_v63 = vor.u32 %v3591_v40, %v3354_v19 }
 0x224   :  { %1996 = vmatmul.bf16.gmra.mxu3 %v3988_v60 }
 0x225   :  { %2895 = vst [vmem:[#allocation8 + $0x1a8] sm:$0xff] %v2767_v37  ;;  %v3623_v37 = vld [vmem:[#allocation5 + $0x3cc] sm:$0xf]  ;;  %2537 = vmatpush.bf16.msrb.mxu2 %v3357_v63 }
 0x226   :  { %v1868_v36 = vpop.f32.mrf.mxu2 }
 0x227   :  { %v1869_v62 = vadd.f32 %v1868_v36, %v1780_v30  ;;  %v1957_v41 = vpop.f32.mrf.mxu3  ;;  %v1781_v6 = vpop.f32.mrf.mxu1  ;;  %v3482_v30 = vld [vmem:[#allocation5 + $0x3d8] sm:$0xf0] }
 0x228   :  { %v1692_v5 = vpop.f32.mrf.mxu0 }
 0x229   :  { %v1958_v38 = vadd.f32 %v1957_v41, %v1869_v62  ;;  %v1782_v43 = vadd.f32 %v1781_v6, %v1692_v5  ;;  %v3485_v5 = vor.u32 %v3623_v37, %v3482_v30 }
 0x22b   :  { %v2771_v11 = vadd.f32 %v1958_v38, %v4045_v16  ;;  %2626 = vmatpush.bf16.msrb.mxu3 %v3485_v5 }
 0x22d   :  { %2899 = vst [vmem:[#allocation8 + $0x1c8] sm:$0xff] %v2771_v11 }
 0x22e   :  { %v1870_v21 = vpop.f32.mrf.mxu2 }
 0x22f   :  { %v1871_v31 = vadd.f32 %v1870_v21, %v1782_v43  ;;  %v1959_v39 = vpop.f32.mrf.mxu3  ;;  %v1784_v28 = vpop.f32.mrf.mxu1  ;;  %v3527_v21 = vld [vmem:[#allocation5 + $0xcc] sm:$0xf] }
 0x230   :  { %v1695_v61 = vpop.f32.mrf.mxu0 }
 0x231   :  { %v1960_v8 = vadd.f32 %v1959_v39, %v1871_v31  ;;  %v1785_v10 = vadd.f32 %v1784_v28, %v1695_v61  ;;  %v3098_v31 = vld [vmem:[#allocation5 + $0xd8] sm:$0xf0]  ;;  %v3559_v28 = vld [vmem:[#allocation5 + $0x1cc] sm:$0xf] }
 0x232   :  { %2099 = vmatmul.bf16.vlgmr.msra.gmra.mxu1 %v3785_v51  ;;  %v3101_v61 = vor.u32 %v3527_v21, %v3098_v31 }
 0x233   :  { %2010 = vmatmul.bf16.vlgmr.msra.gmra.mxu0 %v3783_v47  ;;  %v2775_v7 = vadd.f32 %v1960_v8, %v4045_v16  ;;  %2188 = vmatmul.bf16.vlgmr.msra.gmra.mxu2 %v3787_v52  ;;  %v3226_v8 = vld [vmem:[#allocation5 + $0x1d8] sm:$0xf0] }
 0x234   :  { %2277 = vmatmul.bf16.vlgmr.msra.gmra.mxu3 %v3789_v53  ;;  %v3229_v19 = vor.u32 %v3559_v28, %v3226_v8  ;;  %2359 = vmatpush.bf16.msrb.mxu0 %v3101_v61 }
 0x235   :  { %2903 = vst [vmem:[#allocation8 + $0x1e8] sm:$0xff] %v2775_v7 }
 0x236   :  { %v1873_v9 = vpop.f32.mrf.mxu2  ;;  %2448 = vmatpush.bf16.msrb.mxu1 %v3229_v19  ;;  %v3338_v19 = vld [vmem:[#allocation5 + $0x2b8] sm:$0xf0] }
 0x237   :  { %v1874_v36 = vadd.f32 %v1873_v9, %v1785_v10  ;;  %v1962_v62 = vpop.f32.mrf.mxu3  ;;  %v1786_v6 = vpop.f32.mrf.mxu1 }
 0x238   :  { %v1697_v41 = vpop.f32.mrf.mxu0 }
 0x239   :  { %v1963_v38 = vadd.f32 %v1962_v62, %v1874_v36  ;;  %v1787_v43 = vadd.f32 %v1786_v6, %v1697_v41 }
 0x23b   :  { %v2779_v11 = vadd.f32 %v1963_v38, %v4045_v16 }
 0x23d   :  { %2907 = vst [vmem:[#allocation8 + $0x208] sm:$0xff] %v2779_v11 }
 0x23e   :  { %v1875_v39 = vpop.f32.mrf.mxu2 }
 0x23f   :  { %v1876_v7 = vadd.f32 %v1875_v39, %v1787_v43  ;;  %v1964_v40 = vpop.f32.mrf.mxu3  ;;  %v1789_v9 = vpop.f32.mrf.mxu1 }
 0x240   :  { %v1700_v10 = vpop.f32.mrf.mxu0 }
 0x241   :  { %v1965_v37 = vadd.f32 %v1964_v40, %v1876_v7  ;;  %v1790_v30 = vadd.f32 %v1789_v9, %v1700_v10  ;;  %v3587_v10 = vld [vmem:[#allocation5 + $0x2ac] sm:$0xf] }
 0x242   :  { %2104 = vmatmul.bf16.gmra.mxu1 %v3797_v13 }
 0x243   :  { %2015 = vmatmul.bf16.gmra.mxu0 %v3795_v12  ;;  %v2783_v63 = vadd.f32 %v1965_v37, %v4045_v16  ;;  %2193 = vmatmul.bf16.gmra.mxu2 %v3799_v14  ;;  %v3341_v37 = vor.u32 %v3587_v10, %v3338_v19 }
 0x244   :  { %2282 = vmatmul.bf16.gmra.mxu3 %v3801_v15 }
 0x245   :  { %2911 = vst [vmem:[#allocation8 + $0x228] sm:$0xff] %v2783_v63  ;;  %v3619_v63 = vld [vmem:[#allocation5 + $0x3ac] sm:$0xf]  ;;  %2538 = vmatpush.bf16.msrb.mxu2 %v3341_v37 }
 0x246   :  { %v1878_v36 = vpop.f32.mrf.mxu2 }
 0x247   :  { %v1879_v62 = vadd.f32 %v1878_v36, %v1790_v30  ;;  %v1967_v41 = vpop.f32.mrf.mxu3  ;;  %v1791_v6 = vpop.f32.mrf.mxu1  ;;  %v3466_v30 = vld [vmem:[#allocation5 + $0x3b8] sm:$0xf0] }
 0x248   :  { %v1702_v5 = vpop.f32.mrf.mxu0 }
 0x249   :  { %v1968_v38 = vadd.f32 %v1967_v41, %v1879_v62  ;;  %v1792_v43 = vadd.f32 %v1791_v6, %v1702_v5  ;;  %v3469_v5 = vor.u32 %v3619_v63, %v3466_v30 }
 0x24b   :  { %v2787_v11 = vadd.f32 %v1968_v38, %v4045_v16  ;;  %2627 = vmatpush.bf16.msrb.mxu3 %v3469_v5 }
 0x24d   :  { %2915 = vst [vmem:[#allocation8 + $0x248] sm:$0xff] %v2787_v11 }
 0x24e   :  { %v1880_v21 = vpop.f32.mrf.mxu2 }
 0x24f   :  { %v1881_v31 = vadd.f32 %v1880_v21, %v1792_v43  ;;  %v1969_v39 = vpop.f32.mrf.mxu3  ;;  %v1794_v28 = vpop.f32.mrf.mxu1  ;;  %v3523_v21 = vld [vmem:[#allocation5 + $0xac] sm:$0xf] }
 0x250   :  { %v1705_v61 = vpop.f32.mrf.mxu0 }
 0x251   :  { %v1970_v8 = vadd.f32 %v1969_v39, %v1881_v31  ;;  %v1795_v40 = vadd.f32 %v1794_v28, %v1705_v61  ;;  %v3082_v31 = vld [vmem:[#allocation5 + $0xb8] sm:$0xf0]  ;;  %v3555_v28 = vld [vmem:[#allocation5 + $0x1ac] sm:$0xf] }
 0x252   :  { %2109 = vmatmul.bf16.gmra.mxu1 %v3809_v25  ;;  %v3085_v61 = vor.u32 %v3523_v21, %v3082_v31 }
 0x253   :  { %2020 = vmatmul.bf16.gmra.mxu0 %v3807_v24  ;;  %v2791_v7 = vadd.f32 %v1970_v8, %v4045_v16  ;;  %2198 = vmatmul.bf16.gmra.mxu2 %v3811_v26  ;;  %v3210_v8 = vld [vmem:[#allocation5 + $0x1b8] sm:$0xf0] }
 0x254   :  { %2287 = vmatmul.bf16.gmra.mxu3 %v3813_v27  ;;  %v3213_v19 = vor.u32 %v3555_v28, %v3210_v8  ;;  %2360 = vmatpush.bf16.msrb.mxu0 %v3085_v61 }
 0x255   :  { %2919 = vst [vmem:[#allocation8 + $0x268] sm:$0xff] %v2791_v7 }
 0x256   :  { %v1883_v9 = vpop.f32.mrf.mxu2  ;;  %2449 = vmatpush.bf16.msrb.mxu1 %v3213_v19  ;;  %v3322_v19 = vld [vmem:[#allocation5 + $0x298] sm:$0xf0] }
 0x257   :  { %v1884_v36 = vadd.f32 %v1883_v9, %v1795_v40  ;;  %v1972_v62 = vpop.f32.mrf.mxu3  ;;  %v1796_v6 = vpop.f32.mrf.mxu1 }
 0x258   :  { %v1707_v41 = vpop.f32.mrf.mxu0 }
 0x259   :  { %v1973_v38 = vadd.f32 %v1972_v62, %v1884_v36  ;;  %v1797_v43 = vadd.f32 %v1796_v6, %v1707_v41 }
 0x25b   :  { %v2795_v11 = vadd.f32 %v1973_v38, %v4045_v16 }
 0x25d   :  { %2923 = vst [vmem:[#allocation8 + $0x288] sm:$0xff] %v2795_v11 }
 0x25e   :  { %v1885_v39 = vpop.f32.mrf.mxu2 }
 0x25f   :  { %v1886_v7 = vadd.f32 %v1885_v39, %v1797_v43  ;;  %v1974_v10 = vpop.f32.mrf.mxu3  ;;  %v1799_v9 = vpop.f32.mrf.mxu1 }
 0x260   :  { %v1710_v40 = vpop.f32.mrf.mxu0 }
 0x261   :  { %v1975_v63 = vadd.f32 %v1974_v10, %v1886_v7  ;;  %v1800_v30 = vadd.f32 %v1799_v9, %v1710_v40  ;;  %v3583_v40 = vld [vmem:[#allocation5 + $0x28c] sm:$0xf] }
 0x262   :  { %2114 = vmatmul.bf16.gmra.mxu1 %v3821_v50 }
 0x263   :  { %2025 = vmatmul.bf16.gmra.mxu0 %v3819_v49  ;;  %v2799_v37 = vadd.f32 %v1975_v63, %v4045_v16  ;;  %2203 = vmatmul.bf16.gmra.mxu2 %v3823_v54  ;;  %v3325_v63 = vor.u32 %v3583_v40, %v3322_v19 }
 0x264   :  { %2292 = vmatmul.bf16.gmra.mxu3 %v3825_v55 }
 0x265   :  { %2927 = vst [vmem:[#allocation8 + $0x2a8] sm:$0xff] %v2799_v37  ;;  %v3615_v37 = vld [vmem:[#allocation5 + $0x38c] sm:$0xf]  ;;  %2539 = vmatpush.bf16.msrb.mxu2 %v3325_v63 }
 0x266   :  { %v1888_v36 = vpop.f32.mrf.mxu2 }
 0x267   :  { %v1889_v62 = vadd.f32 %v1888_v36, %v1800_v30  ;;  %v1977_v41 = vpop.f32.mrf.mxu3  ;;  %v1801_v6 = vpop.f32.mrf.mxu1  ;;  %v3450_v30 = vld [vmem:[#allocation5 + $0x398] sm:$0xf0] }
 0x268   :  { %v1712_v5 = vpop.f32.mrf.mxu0 }
 0x269   :  { %v1978_v38 = vadd.f32 %v1977_v41, %v1889_v62  ;;  %v1802_v43 = vadd.f32 %v1801_v6, %v1712_v5  ;;  %v3453_v5 = vor.u32 %v3615_v37, %v3450_v30 }
 0x26b   :  { %v2803_v11 = vadd.f32 %v1978_v38, %v4045_v16  ;;  %2628 = vmatpush.bf16.msrb.mxu3 %v3453_v5 }
 0x26d   :  { %2931 = vst [vmem:[#allocation8 + $0x2c8] sm:$0xff] %v2803_v11 }
 0x26e   :  { %v1890_v21 = vpop.f32.mrf.mxu2 }
 0x26f   :  { %v1891_v31 = vadd.f32 %v1890_v21, %v1802_v43  ;;  %v1979_v39 = vpop.f32.mrf.mxu3  ;;  %v1804_v28 = vpop.f32.mrf.mxu1  ;;  %v3519_v21 = vld [vmem:[#allocation5 + $0x8c] sm:$0xf] }
 0x270   :  { %v1715_v61 = vpop.f32.mrf.mxu0 }
 0x271   :  { %v1980_v8 = vadd.f32 %v1979_v39, %v1891_v31  ;;  %v1805_v10 = vadd.f32 %v1804_v28, %v1715_v61  ;;  %v3066_v31 = vld [vmem:[#allocation5 + $0x98] sm:$0xf0]  ;;  %v3551_v28 = vld [vmem:[#allocation5 + $0x18c] sm:$0xf] }
 0x272   :  { %2119 = vmatmul.bf16.gmra.mxu1 %v3833_v1  ;;  %v3069_v61 = vor.u32 %v3519_v21, %v3066_v31 }
 0x273   :  { %2030 = vmatmul.bf16.gmra.mxu0 %v3831_v0  ;;  %v2807_v7 = vadd.f32 %v1980_v8, %v4045_v16  ;;  %2208 = vmatmul.bf16.gmra.mxu2 %v3835_v2  ;;  %v3194_v8 = vld [vmem:[#allocation5 + $0x198] sm:$0xf0] }
 0x274   :  { %2297 = vmatmul.bf16.gmra.mxu3 %v3837_v3  ;;  %v3197_v19 = vor.u32 %v3551_v28, %v3194_v8  ;;  %2361 = vmatpush.bf16.msrb.mxu0 %v3069_v61 }
 0x275   :  { %2935 = vst [vmem:[#allocation8 + $0x2e8] sm:$0xff] %v2807_v7 }
 0x276   :  { %v1893_v9 = vpop.f32.mrf.mxu2  ;;  %2450 = vmatpush.bf16.msrb.mxu1 %v3197_v19  ;;  %v3306_v19 = vld [vmem:[#allocation5 + $0x278] sm:$0xf0] }
 0x277   :  { %v1894_v36 = vadd.f32 %v1893_v9, %v1805_v10  ;;  %v1982_v62 = vpop.f32.mrf.mxu3  ;;  %v1806_v6 = vpop.f32.mrf.mxu1 }
 0x278   :  { %v1717_v41 = vpop.f32.mrf.mxu0 }
 0x279   :  { %v1983_v38 = vadd.f32 %v1982_v62, %v1894_v36  ;;  %v1807_v43 = vadd.f32 %v1806_v6, %v1717_v41 }
 0x27b   :  { %v2811_v11 = vadd.f32 %v1983_v38, %v4045_v16 }
 0x27d   :  { %2939 = vst [vmem:[#allocation8 + $0x308] sm:$0xff] %v2811_v11 }
 0x27e   :  { %v1895_v39 = vpop.f32.mrf.mxu2 }
 0x27f   :  { %v1896_v7 = vadd.f32 %v1895_v39, %v1807_v43  ;;  %v1984_v40 = vpop.f32.mrf.mxu3  ;;  %v1809_v9 = vpop.f32.mrf.mxu1 }
 0x280   :  { %v1720_v10 = vpop.f32.mrf.mxu0 }
 0x281   :  { %v1985_v37 = vadd.f32 %v1984_v40, %v1896_v7  ;;  %v1810_v30 = vadd.f32 %v1809_v9, %v1720_v10  ;;  %v3579_v10 = vld [vmem:[#allocation5 + $0x26c] sm:$0xf] }
 0x282   :  { %2124 = vmatmul.bf16.gmra.mxu1 %v3845_v33 }
 0x283   :  { %2035 = vmatmul.bf16.gmra.mxu0 %v3843_v32  ;;  %v2815_v63 = vadd.f32 %v1985_v37, %v4045_v16  ;;  %2213 = vmatmul.bf16.gmra.mxu2 %v3847_v34  ;;  %v3309_v37 = vor.u32 %v3579_v10, %v3306_v19 }
 0x284   :  { %2302 = vmatmul.bf16.gmra.mxu3 %v3849_v35 }
 0x285   :  { %2943 = vst [vmem:[#allocation8 + $0x328] sm:$0xff] %v2815_v63  ;;  %v3611_v63 = vld [vmem:[#allocation5 + $0x36c] sm:$0xf]  ;;  %2540 = vmatpush.bf16.msrb.mxu2 %v3309_v37 }
 0x286   :  { %v1898_v36 = vpop.f32.mrf.mxu2 }
 0x287   :  { %v1899_v62 = vadd.f32 %v1898_v36, %v1810_v30  ;;  %v1987_v41 = vpop.f32.mrf.mxu3  ;;  %v1811_v6 = vpop.f32.mrf.mxu1  ;;  %v3434_v30 = vld [vmem:[#allocation5 + $0x378] sm:$0xf0] }
 0x288   :  { %v1722_v5 = vpop.f32.mrf.mxu0 }
 0x289   :  { %v1988_v38 = vadd.f32 %v1987_v41, %v1899_v62  ;;  %v1812_v43 = vadd.f32 %v1811_v6, %v1722_v5  ;;  %v3437_v5 = vor.u32 %v3611_v63, %v3434_v30 }
 0x28b   :  { %v2819_v11 = vadd.f32 %v1988_v38, %v4045_v16  ;;  %2629 = vmatpush.bf16.msrb.mxu3 %v3437_v5 }
 0x28d   :  { %2947 = vst [vmem:[#allocation8 + $0x348] sm:$0xff] %v2819_v11 }
 0x28e   :  { %v1900_v21 = vpop.f32.mrf.mxu2 }
 0x28f   :  { %v1901_v31 = vadd.f32 %v1900_v21, %v1812_v43  ;;  %v1989_v39 = vpop.f32.mrf.mxu3  ;;  %v1814_v28 = vpop.f32.mrf.mxu1  ;;  %v3515_v21 = vld [vmem:[#allocation5 + $0x6c] sm:$0xf] }
 0x290   :  { %v1725_v61 = vpop.f32.mrf.mxu0 }
 0x291   :  { %v1990_v8 = vadd.f32 %v1989_v39, %v1901_v31  ;;  %v1815_v40 = vadd.f32 %v1814_v28, %v1725_v61  ;;  %v3050_v31 = vld [vmem:[#allocation5 + $0x78] sm:$0xf0]  ;;  %v3547_v28 = vld [vmem:[#allocation5 + $0x16c] sm:$0xf] }
 0x292   :  { %2129 = vmatmul.bf16.gmra.mxu1 %v3857_v45  ;;  %v3053_v61 = vor.u32 %v3515_v21, %v3050_v31 }
 0x293   :  { %2040 = vmatmul.bf16.gmra.mxu0 %v3855_v44  ;;  %v2823_v7 = vadd.f32 %v1990_v8, %v4045_v16  ;;  %2218 = vmatmul.bf16.gmra.mxu2 %v3859_v46  ;;  %v3178_v8 = vld [vmem:[#allocation5 + $0x178] sm:$0xf0] }
 0x294   :  { %2307 = vmatmul.bf16.gmra.mxu3 %v3861_v48  ;;  %v3181_v19 = vor.u32 %v3547_v28, %v3178_v8  ;;  %2362 = vmatpush.bf16.msrb.mxu0 %v3053_v61 }
 0x295   :  { %2951 = vst [vmem:[#allocation8 + $0x368] sm:$0xff] %v2823_v7 }
 0x296   :  { %v1903_v9 = vpop.f32.mrf.mxu2  ;;  %2451 = vmatpush.bf16.msrb.mxu1 %v3181_v19  ;;  %v3290_v19 = vld [vmem:[#allocation5 + $0x258] sm:$0xf0] }
 0x297   :  { %v1904_v36 = vadd.f32 %v1903_v9, %v1815_v40  ;;  %v1992_v62 = vpop.f32.mrf.mxu3  ;;  %v1816_v6 = vpop.f32.mrf.mxu1 }
 0x298   :  { %v1727_v41 = vpop.f32.mrf.mxu0 }
 0x299   :  { %v1993_v38 = vadd.f32 %v1992_v62, %v1904_v36  ;;  %v1817_v43 = vadd.f32 %v1816_v6, %v1727_v41 }
 0x29b   :  { %v2827_v11 = vadd.f32 %v1993_v38, %v4045_v16 }
 0x29d   :  { %2955 = vst [vmem:[#allocation8 + $0x388] sm:$0xff] %v2827_v11 }
 0x29e   :  { %v1905_v39 = vpop.f32.mrf.mxu2 }
 0x29f   :  { %v1906_v7 = vadd.f32 %v1905_v39, %v1817_v43  ;;  %v1994_v10 = vpop.f32.mrf.mxu3  ;;  %v1819_v9 = vpop.f32.mrf.mxu1 }
 0x2a0   :  { %v1730_v40 = vpop.f32.mrf.mxu0 }
 0x2a1   :  { %v1995_v63 = vadd.f32 %v1994_v10, %v1906_v7  ;;  %v1820_v30 = vadd.f32 %v1819_v9, %v1730_v40  ;;  %v3575_v40 = vld [vmem:[#allocation5 + $0x24c] sm:$0xf] }
 0x2a2   :  { %2134 = vmatmul.bf16.gmra.mxu1 %v3875_v22 }
 0x2a3   :  { %2045 = vmatmul.bf16.gmra.mxu0 %v3873_v18  ;;  %v2831_v37 = vadd.f32 %v1995_v63, %v4045_v16  ;;  %2223 = vmatmul.bf16.gmra.mxu2 %v3877_v23  ;;  %v3293_v63 = vor.u32 %v3575_v40, %v3290_v19 }
 0x2a4   :  { %2312 = vmatmul.bf16.gmra.mxu3 %v3879_v29 }
 0x2a5   :  { %2959 = vst [vmem:[#allocation8 + $0x3a8] sm:$0xff] %v2831_v37  ;;  %v3607_v37 = vld [vmem:[#allocation5 + $0x34c] sm:$0xf]  ;;  %2541 = vmatpush.bf16.msrb.mxu2 %v3293_v63 }
 0x2a6   :  { %v1908_v36 = vpop.f32.mrf.mxu2 }
 0x2a7   :  { %v1909_v62 = vadd.f32 %v1908_v36, %v1820_v30  ;;  %v1997_v41 = vpop.f32.mrf.mxu3  ;;  %v1821_v6 = vpop.f32.mrf.mxu1  ;;  %v3418_v30 = vld [vmem:[#allocation5 + $0x358] sm:$0xf0] }
 0x2a8   :  { %v1732_v5 = vpop.f32.mrf.mxu0 }
 0x2a9   :  { %v1998_v38 = vadd.f32 %v1997_v41, %v1909_v62  ;;  %v1822_v43 = vadd.f32 %v1821_v6, %v1732_v5  ;;  %v4408_v62 = vld [vmem:[#allocation35_spill] sm:$0xff]  ;;  %v3421_v6 = vor.u32 %v3607_v37, %v3418_v30 }
 0x2aa   :  { %v4144_v41 = vperm.slane %v4408_v62, 2 }
 0x2ab   :  { %v2835_v11 = vadd.f32 %v1998_v38, %v4045_v16  ;;  %2630 = vmatpush.bf16.msrb.mxu3 %v3421_v6 }
 0x2ad   :  { %2963 = vst [vmem:[#allocation8 + $0x3c8] sm:$0xff] %v2835_v11 }
 0x2ae   :  { %v1910_v21 = vpop.f32.mrf.mxu2 }
 0x2af   :  { %v1911_v31 = vadd.f32 %v1910_v21, %v1822_v43  ;;  %v1999_v39 = vpop.f32.mrf.mxu3  ;;  %v2100_v28 = vpop.f32.mrf.mxu1 }
 0x2b0   :  { %v2011_v61 = vpop.f32.mrf.mxu0 }
 0x2b1   :  { %v2000_v8 = vadd.f32 %v1999_v39, %v1911_v31  ;;  %v2101_v10 = vadd.f32 %v2100_v28, %v2011_v61  ;;  %v3511_v31 = vld [vmem:[#allocation5 + $0x4c] sm:$0xf]  ;;  %v3034_v39 = vld [vmem:[#allocation5 + $0x58] sm:$0xf0] }
 0x2b2   :  { %2139 = vmatmul.bf16.gmra.mxu1 %v3887_v56  ;;  %v3037_v28 = vor.u32 %v3511_v31, %v3034_v39 }
 0x2b3   :  { %2050 = vmatmul.bf16.gmra.mxu0 %v3885_v42  ;;  %v2839_v7 = vadd.f32 %v2000_v8, %v4045_v16  ;;  %2228 = vmatmul.bf16.gmra.mxu2 %v3889_v57  ;;  %v3543_v8 = vld [vmem:[#allocation5 + $0x14c] sm:$0xf] }
 0x2b4   :  { %2317 = vmatmul.bf16.gmra.mxu3 %v3891_v59  ;;  %2363 = vmatpush.bf16.msrb.mxu0 %v3037_v28 }
 0x2b5   :  { %2967 = vst [vmem:[#allocation8 + $0x3e8] sm:$0xff] %v2839_v7  ;;  %v3162_v7 = vld [vmem:[#allocation5 + $0x158] sm:$0xf0] }
 0x2b6   :  { %v2189_v9 = vpop.f32.mrf.mxu2 }
 0x2b7   :  { %v2190_v36 = vadd.f32 %v2189_v9, %v2101_v10  ;;  %v2278_v5 = vpop.f32.mrf.mxu3  ;;  %v2102_v38 = vpop.f32.mrf.mxu1  ;;  %v3165_v9 = vor.u32 %v3543_v8, %v3162_v7 }
 0x2b8   :  { %v2013_v16 = vpop.f32.mrf.mxu0 }
 0x2b9   :  { %v2279_v11 = vadd.f32 %v2278_v5, %v2190_v36  ;;  %v2103_v21 = vadd.f32 %v2102_v38, %v2013_v16  ;;  %2452 = vmatpush.bf16.msrb.mxu1 %v3165_v9  ;;  %v4409_v36 = vld [vmem:[#allocation12_spill] sm:$0xff]  ;;  %v4410_v5 = vld [vmem:[#allocation13_spill] sm:$0xff]  ;;  %v4411_v16 = vld [vmem:[#allocation14_spill] sm:$0xff] }
 0x2ba   :  { %v4412_v9 = vld [vmem:[#allocation15_spill] sm:$0xff] }
 0x2bb   :  { %v2716_v43 = vadd.f32 %v2279_v11, %v4144_v41 }
 0x2bd   :  { %2844 = vst [vmem:[#allocation8 + $0x10] sm:$0xff] %v2716_v43 }
 0x2be   :  { %v2191_v61 = vpop.f32.mrf.mxu2 }
 0x2bf   :  { %v2192_v10 = vadd.f32 %v2191_v61, %v2103_v21  ;;  %v2280_v40 = vpop.f32.mrf.mxu3  ;;  %v2105_v62 = vpop.f32.mrf.mxu1 }
 0x2c0   :  { %v2016_v19 = vpop.f32.mrf.mxu0 }
 0x2c1   :  { %v2281_v37 = vadd.f32 %v2280_v40, %v2192_v10  ;;  %v2106_v30 = vadd.f32 %v2105_v62, %v2016_v19 }
 0x2c2   :  { %2144 = vmatmul.bf16.gmra.mxu1 %v4409_v36 }
 0x2c3   :  { %2055 = vmatmul.bf16.gmra.mxu0 %v3898_v58  ;;  %v2720_v63 = vadd.f32 %v2281_v37, %v4144_v41  ;;  %2233 = vmatmul.bf16.gmra.mxu2 %v4410_v5 }
 0x2c4   :  { %2322 = vmatmul.bf16.gmra.mxu3 %v4411_v16  ;;  %v3539_v16 = vld [vmem:[#allocation5 + $0x12c] sm:$0xf] }
 0x2c5   :  { %2848 = vst [vmem:[#allocation8 + $0x30] sm:$0xff] %v2720_v63  ;;  %v4413_v63 = vld [vmem:[#allocation16_spill] sm:$0xff] }
 0x2c6   :  { %v2194_v6 = vpop.f32.mrf.mxu2 }
 0x2c7   :  { %v2195_v38 = vadd.f32 %v2194_v6, %v2106_v30  ;;  %v2283_v11 = vpop.f32.mrf.mxu3  ;;  %v2107_v21 = vpop.f32.mrf.mxu1  ;;  %v4414_v30 = vld [vmem:[#allocation17_spill] sm:$0xff]  ;;  %v4415_v6 = vld [vmem:[#allocation18_spill] sm:$0xff] }
 0x2c8   :  { %v2018_v43 = vpop.f32.mrf.mxu0 }
 0x2c9   :  { %v2284_v31 = vadd.f32 %v2283_v11, %v2195_v38  ;;  %v2108_v61 = vadd.f32 %v2107_v21, %v2018_v43  ;;  %v3571_v38 = vld [vmem:[#allocation5 + $0x22c] sm:$0xf]  ;;  %v3274_v11 = vld [vmem:[#allocation5 + $0x238] sm:$0xf0] }
 0x2ca   :  { %v3277_v21 = vor.u32 %v3571_v38, %v3274_v11  ;;  %v3146_v38 = vld [vmem:[#allocation5 + $0x138] sm:$0xf0] }
 0x2cb   :  { %v2724_v39 = vadd.f32 %v2284_v31, %v4144_v41  ;;  %v3603_v31 = vld [vmem:[#allocation5 + $0x32c] sm:$0xf] }
 0x2cc   :  { %2542 = vmatpush.bf16.msrb.mxu2 %v3277_v21  ;;  %v4416_v21 = vld [vmem:[#allocation19_spill] sm:$0xff] }
 0x2cd   :  { %2852 = vst [vmem:[#allocation8 + $0x50] sm:$0xff] %v2724_v39  ;;  %v3402_v39 = vld [vmem:[#allocation5 + $0x338] sm:$0xf0] }
 0x2ce   :  { %v2196_v28 = vpop.f32.mrf.mxu2 }
 0x2cf   :  { %v2197_v8 = vadd.f32 %v2196_v28, %v2108_v61  ;;  %v2285_v7 = vpop.f32.mrf.mxu3  ;;  %v2110_v40 = vpop.f32.mrf.mxu1 }
 0x2d0   :  { %v2021_v10 = vpop.f32.mrf.mxu0 }
 0x2d1   :  { %v2286_v19 = vadd.f32 %v2285_v7, %v2197_v8  ;;  %v2111_v37 = vadd.f32 %v2110_v40, %v2021_v10  ;;  %v3405_v7 = vor.u32 %v3603_v31, %v3402_v39 }
 0x2d2   :  { %2149 = vmatmul.bf16.gmra.mxu1 %v4413_v63 }
 0x2d3   :  { %2060 = vmatmul.bf16.gmra.mxu0 %v4412_v9  ;;  %v2728_v62 = vadd.f32 %v2286_v19, %v4144_v41  ;;  %2238 = vmatmul.bf16.gmra.mxu2 %v4414_v30 }
 0x2d4   :  { %2327 = vmatmul.bf16.gmra.mxu3 %v4415_v6  ;;  %v3507_v6 = vld [vmem:[#allocation5 + $0x2c] sm:$0xf] }
 0x2d5   :  { %2856 = vst [vmem:[#allocation8 + $0x70] sm:$0xff] %v2728_v62  ;;  %2631 = vmatpush.bf16.msrb.mxu3 %v3405_v7  ;;  %v3018_v62 = vld [vmem:[#allocation5 + $0x38] sm:$0xf0] }
 0x2d6   :  { %v2199_v43 = vpop.f32.mrf.mxu2  ;;  %v3021_v63 = vor.u32 %v3507_v6, %v3018_v62  ;;  %v4419_v6 = vld [vmem:[#allocation22_spill] sm:$0xff] }
 0x2d7   :  { %v2200_v61 = vadd.f32 %v2199_v43, %v2111_v37  ;;  %v2288_v28 = vpop.f32.mrf.mxu3  ;;  %v2112_v9 = vpop.f32.mrf.mxu1  ;;  %v3149_v43 = vor.u32 %v3539_v16, %v3146_v38 }
 0x2d8   :  { %v2023_v8 = vpop.f32.mrf.mxu0  ;;  %2364 = vmatpush.bf16.msrb.mxu0 %v3021_v63 }
 0x2d9   :  { %v2289_v10 = vadd.f32 %v2288_v28, %v2200_v61  ;;  %v2113_v19 = vadd.f32 %v2112_v9, %v2023_v8  ;;  %2453 = vmatpush.bf16.msrb.mxu1 %v3149_v43  ;;  %v4417_v9 = vld [vmem:[#allocation20_spill] sm:$0xff]  ;;  %v4418_v28 = vld [vmem:[#allocation21_spill] sm:$0xff]  ;;  %v4420_v43 = vld [vmem:[#allocation23_spill] sm:$0xff] }
 0x2db   :  { %v2732_v40 = vadd.f32 %v2289_v10, %v4144_v41 }
 0x2dd   :  { %2860 = vst [vmem:[#allocation8 + $0x90] sm:$0xff] %v2732_v40 }
 0x2de   :  { %v2201_v30 = vpop.f32.mrf.mxu2 }
 0x2df   :  { %v2202_v11 = vadd.f32 %v2201_v30, %v2113_v19  ;;  %v2290_v5 = vpop.f32.mrf.mxu3  ;;  %v2115_v36 = vpop.f32.mrf.mxu1 }
 0x2e0   :  { %v2026_v37 = vpop.f32.mrf.mxu0 }
 0x2e1   :  { %v2291_v31 = vadd.f32 %v2290_v5, %v2202_v11  ;;  %v2116_v61 = vadd.f32 %v2115_v36, %v2026_v37 }
 0x2e2   :  { %2154 = vmatmul.bf16.gmra.mxu1 %v4417_v9 }
 0x2e3   :  { %2065 = vmatmul.bf16.gmra.mxu0 %v4416_v21  ;;  %v2736_v39 = vadd.f32 %v2291_v31, %v4144_v41  ;;  %2243 = vmatmul.bf16.gmra.mxu2 %v4418_v28  ;;  %v3535_v28 = vld [vmem:[#allocation5 + $0x10c] sm:$0xf] }
 0x2e4   :  { %2332 = vmatmul.bf16.gmra.mxu3 %v4419_v6 }
 0x2e5   :  { %2864 = vst [vmem:[#allocation8 + $0xb0] sm:$0xff] %v2736_v39 }
 0x2e6   :  { %v2204_v30 = vpop.f32.mrf.mxu2 }
 0x2e7   :  { %v2205_v8 = vadd.f32 %v2204_v30, %v2116_v61  ;;  %v2293_v7 = vpop.f32.mrf.mxu3  ;;  %v2117_v10 = vpop.f32.mrf.mxu1  ;;  %v4421_v61 = vld [vmem:[#allocation24_spill] sm:$0xff]  ;;  %v4422_v30 = vld [vmem:[#allocation25_spill] sm:$0xff] }
 0x2e8   :  { %v2028_v16 = vpop.f32.mrf.mxu0 }
 0x2e9   :  { %v2294_v63 = vadd.f32 %v2293_v7, %v2205_v8  ;;  %v2118_v40 = vadd.f32 %v2117_v10, %v2028_v16  ;;  %v4423_v8 = vld [vmem:[#allocation26_spill] sm:$0xff]  ;;  %v3567_v7 = vld [vmem:[#allocation5 + $0x20c] sm:$0xf]  ;;  %v3258_v16 = vld [vmem:[#allocation5 + $0x218] sm:$0xf0] }
 0x2eb   :  { %v2740_v5 = vadd.f32 %v2294_v63, %v4144_v41  ;;  %v3261_v63 = vor.u32 %v3567_v7, %v3258_v16  ;;  %v3130_v7 = vld [vmem:[#allocation5 + $0x118] sm:$0xf0] }
 0x2ed   :  { %2868 = vst [vmem:[#allocation8 + $0xd0] sm:$0xff] %v2740_v5  ;;  %v3599_v5 = vld [vmem:[#allocation5 + $0x30c] sm:$0xf]  ;;  %2543 = vmatpush.bf16.msrb.mxu2 %v3261_v63  ;;  %v4424_v63 = vld [vmem:[#allocation27_spill] sm:$0xff] }
 0x2ee   :  { %v2206_v19 = vpop.f32.mrf.mxu2 }
 0x2ef   :  { %v2207_v62 = vadd.f32 %v2206_v19, %v2118_v40  ;;  %v2295_v36 = vpop.f32.mrf.mxu3  ;;  %v2120_v11 = vpop.f32.mrf.mxu1  ;;  %v3386_v40 = vld [vmem:[#allocation5 + $0x318] sm:$0xf0] }
 0x2f0   :  { %v2031_v38 = vpop.f32.mrf.mxu0 }
 0x2f1   :  { %v2296_v37 = vadd.f32 %v2295_v36, %v2207_v62  ;;  %v2121_v39 = vadd.f32 %v2120_v11, %v2031_v38 }
 0x2f2   :  { %2159 = vmatmul.bf16.gmra.mxu1 %v4421_v61 }
 0x2f3   :  { %2070 = vmatmul.bf16.gmra.mxu0 %v4420_v43  ;;  %v2744_v31 = vadd.f32 %v2296_v37, %v4144_v41  ;;  %2248 = vmatmul.bf16.gmra.mxu2 %v4422_v30  ;;  %v3389_v43 = vor.u32 %v3599_v5, %v3386_v40 }
 0x2f4   :  { %2337 = vmatmul.bf16.gmra.mxu3 %v4423_v8  ;;  %v3503_v8 = vld [vmem:[#allocation5 + $0xc] sm:$0xf] }
 0x2f5   :  { %2872 = vst [vmem:[#allocation8 + $0xf0] sm:$0xff] %v2744_v31  ;;  %2632 = vmatpush.bf16.msrb.mxu3 %v3389_v43  ;;  %v3002_v31 = vld [vmem:[#allocation5 + $0x18] sm:$0xf0] }
 0x2f6   :  { %v2209_v10 = vpop.f32.mrf.mxu2  ;;  %v3005_v61 = vor.u32 %v3503_v8, %v3002_v31  ;;  %v4427_v8 = vld [vmem:[#allocation30_spill] sm:$0xff] }
 0x2f7   :  { %v2210_v19 = vadd.f32 %v2209_v10, %v2121_v39  ;;  %v2298_v62 = vpop.f32.mrf.mxu3  ;;  %v2122_v6 = vpop.f32.mrf.mxu1  ;;  %v3133_v10 = vor.u32 %v3535_v28, %v3130_v7 }
 0x2f8   :  { %v2033_v36 = vpop.f32.mrf.mxu0  ;;  %2365 = vmatpush.bf16.msrb.mxu0 %v3005_v61 }
 0x2f9   :  { %v2299_v38 = vadd.f32 %v2298_v62, %v2210_v19  ;;  %v2123_v37 = vadd.f32 %v2122_v6, %v2033_v36  ;;  %2454 = vmatpush.bf16.msrb.mxu1 %v3133_v10  ;;  %v4425_v6 = vld [vmem:[#allocation28_spill] sm:$0xff]  ;;  %v4426_v19 = vld [vmem:[#allocation29_spill] sm:$0xff]  ;;  %v4428_v10 = vld [vmem:[#allocation31_spill] sm:$0xff] }
 0x2fb   :  { %v2748_v11 = vadd.f32 %v2299_v38, %v4144_v41 }
 0x2fd   :  { %2876 = vst [vmem:[#allocation8 + $0x110] sm:$0xff] %v2748_v11 }
 0x2fe   :  { %v2211_v30 = vpop.f32.mrf.mxu2 }
 0x2ff   :  { %v2212_v16 = vadd.f32 %v2211_v30, %v2123_v37  ;;  %v2300_v9 = vpop.f32.mrf.mxu3  ;;  %v2125_v21 = vpop.f32.mrf.mxu1 }
 0x300   :  { %v2036_v39 = vpop.f32.mrf.mxu0 }
 0x301   :  { %v2301_v5 = vadd.f32 %v2300_v9, %v2212_v16  ;;  %v2126_v40 = vadd.f32 %v2125_v21, %v2036_v39 }
 0x302   :  { %2164 = vmatmul.bf16.gmra.mxu1 %v4425_v6 }
 0x303   :  { %2075 = vmatmul.bf16.gmra.mxu0 %v4424_v63  ;;  %v2752_v43 = vadd.f32 %v2301_v5, %v4144_v41  ;;  %2253 = vmatmul.bf16.gmra.mxu2 %v4426_v19 }
 0x304   :  { %2342 = vmatmul.bf16.gmra.mxu3 %v4427_v8 }
 0x305   :  { %2880 = vst [vmem:[#allocation8 + $0x130] sm:$0xff] %v2752_v43 }
 0x306   :  { %v2214_v30 = vpop.f32.mrf.mxu2 }
 0x307   :  { %v2215_v62 = vadd.f32 %v2214_v30, %v2126_v40  ;;  %v2303_v36 = vpop.f32.mrf.mxu3  ;;  %v2127_v38 = vpop.f32.mrf.mxu1  ;;  %v4429_v40 = vld [vmem:[#allocation32_spill] sm:$0xff]  ;;  %v4430_v30 = vld [vmem:[#allocation33_spill] sm:$0xff] }
 0x308   :  { %v2038_v28 = vpop.f32.mrf.mxu0 }
 0x309   :  { %v2304_v61 = vadd.f32 %v2303_v36, %v2215_v62  ;;  %v2128_v11 = vadd.f32 %v2127_v38, %v2038_v28  ;;  %v4431_v62 = vld [vmem:[#allocation34_spill] sm:$0xff] }
 0x30b   :  { %v2756_v9 = vadd.f32 %v2304_v61, %v4144_v41 }
 0x30d   :  { %2884 = vst [vmem:[#allocation8 + $0x150] sm:$0xff] %v2756_v9 }
 0x30e   :  { %v2216_v37 = vpop.f32.mrf.mxu2 }
 0x30f   :  { %v2217_v31 = vadd.f32 %v2216_v37, %v2128_v11  ;;  %v2305_v21 = vpop.f32.mrf.mxu3  ;;  %v2130_v16 = vpop.f32.mrf.mxu1 }
 0x310   :  { %v2041_v7 = vpop.f32.mrf.mxu0 }
 0x311   :  { %v2306_v39 = vadd.f32 %v2305_v21, %v2217_v31  ;;  %v2131_v43 = vadd.f32 %v2130_v16, %v2041_v7 }
 0x312   :  { %2169 = vmatmul.bf16.gmra.mxu1 %v4429_v40 }
 0x313   :  { %2080 = vmatmul.bf16.gmra.mxu0 %v4428_v10  ;;  %v2760_v5 = vadd.f32 %v2306_v39, %v4144_v41  ;;  %2258 = vmatmul.bf16.gmra.mxu2 %v4430_v30 }
 0x314   :  { %2347 = vmatmul.bf16.gmra.mxu3 %v4431_v62 }
 0x315   :  { %2888 = vst [vmem:[#allocation8 + $0x170] sm:$0xff] %v2760_v5 }
 0x316   :  { %v2219_v36 = vpop.f32.mrf.mxu2 }
 0x317   :  { %v2220_v28 = vadd.f32 %v2219_v36, %v2131_v43  ;;  %v2308_v38 = vpop.f32.mrf.mxu3  ;;  %v2132_v9 = vpop.f32.mrf.mxu1 }
 0x318   :  { %v2043_v61 = vpop.f32.mrf.mxu0 }
 0x319   :  { %v2309_v11 = vadd.f32 %v2308_v38, %v2220_v28  ;;  %v2133_v31 = vadd.f32 %v2132_v9, %v2043_v61 }
 0x31b   :  { %v2764_v37 = vadd.f32 %v2309_v11, %v4144_v41 }
 0x31d   :  { %2892 = vst [vmem:[#allocation8 + $0x190] sm:$0xff] %v2764_v37 }
 0x31e   :  { %v2221_v21 = vpop.f32.mrf.mxu2 }
 0x31f   :  { %v2222_v39 = vadd.f32 %v2221_v21, %v2133_v31  ;;  %v2310_v7 = vpop.f32.mrf.mxu3  ;;  %v2135_v40 = vpop.f32.mrf.mxu1 }
 0x320   :  { %v2046_v16 = vpop.f32.mrf.mxu0 }
 0x321   :  { %v2311_v10 = vadd.f32 %v2310_v7, %v2222_v39  ;;  %v2136_v62 = vadd.f32 %v2135_v40, %v2046_v16 }
 0x322   :  { %2174 = vmatmul.bf16.gmra.mxu1 %v3984_v4 }
 0x323   :  { %2085 = vmatmul.bf16.gmra.mxu0 %v3982_v20  ;;  %v2768_v5 = vadd.f32 %v2311_v10, %v4144_v41  ;;  %2263 = vmatmul.bf16.gmra.mxu2 %v3986_v17 }
 0x324   :  { %2352 = vmatmul.bf16.gmra.mxu3 %v3988_v60 }
 0x325   :  { %2896 = vst [vmem:[#allocation8 + $0x1b0] sm:$0xff] %v2768_v5 }
 0x326   :  { %v2224_v43 = vpop.f32.mrf.mxu2 }
 0x327   :  { %v2225_v36 = vadd.f32 %v2224_v43, %v2136_v62  ;;  %v2313_v28 = vpop.f32.mrf.mxu3  ;;  %v2137_v61 = vpop.f32.mrf.mxu1 }
 0x328   :  { %v2048_v38 = vpop.f32.mrf.mxu0 }
 0x329   :  { %v2314_v9 = vadd.f32 %v2313_v28, %v2225_v36  ;;  %v2138_v37 = vadd.f32 %v2137_v61, %v2048_v38 }
 0x32b   :  { %v2772_v11 = vadd.f32 %v2314_v9, %v4144_v41 }
 0x32d   :  { %2900 = vst [vmem:[#allocation8 + $0x1d0] sm:$0xff] %v2772_v11 }
 0x32e   :  { %v2226_v31 = vpop.f32.mrf.mxu2 }
 0x32f   :  { %v2227_v10 = vadd.f32 %v2226_v31, %v2138_v37  ;;  %v2315_v40 = vpop.f32.mrf.mxu3  ;;  %v2140_v39 = vpop.f32.mrf.mxu1 }
 0x330   :  { %v2051_v21 = vpop.f32.mrf.mxu0 }
 0x331   :  { %v2316_v7 = vadd.f32 %v2315_v40, %v2227_v10  ;;  %v2141_v5 = vadd.f32 %v2140_v39, %v2051_v21 }
 0x332   :  { %2455 = vmatmul.bf16.vlgmr.msrb.gmra.mxu1 %v3785_v51 }
 0x333   :  { %2366 = vmatmul.bf16.vlgmr.msrb.gmra.mxu0 %v3783_v47  ;;  %v2776_v16 = vadd.f32 %v2316_v7, %v4144_v41  ;;  %2544 = vmatmul.bf16.vlgmr.msrb.gmra.mxu2 %v3787_v52 }
 0x334   :  { %2633 = vmatmul.bf16.vlgmr.msrb.gmra.mxu3 %v3789_v53 }
 0x335   :  { %2904 = vst [vmem:[#allocation8 + $0x1f0] sm:$0xff] %v2776_v16 }
 0x336   :  { %v2229_v62 = vpop.f32.mrf.mxu2 }
 0x337   :  { %v2230_v43 = vadd.f32 %v2229_v62, %v2141_v5  ;;  %v2318_v36 = vpop.f32.mrf.mxu3  ;;  %v2142_v38 = vpop.f32.mrf.mxu1 }
 0x338   :  { %v2053_v28 = vpop.f32.mrf.mxu0 }
 0x339   :  { %v2319_v61 = vadd.f32 %v2318_v36, %v2230_v43  ;;  %v2143_v47 = vadd.f32 %v2142_v38, %v2053_v28 }
 0x33b   :  { %v2780_v9 = vadd.f32 %v2319_v61, %v4144_v41 }
 0x33d   :  { %2908 = vst [vmem:[#allocation8 + $0x210] sm:$0xff] %v2780_v9 }
 0x33e   :  { %v2231_v11 = vpop.f32.mrf.mxu2 }
 0x33f   :  { %v2232_v37 = vadd.f32 %v2231_v11, %v2143_v47  ;;  %v2320_v31 = vpop.f32.mrf.mxu3  ;;  %v2145_v51 = vpop.f32.mrf.mxu1 }
 0x340   :  { %v2056_v10 = vpop.f32.mrf.mxu0 }
 0x341   :  { %v2321_v40 = vadd.f32 %v2320_v31, %v2232_v37  ;;  %v2146_v53 = vadd.f32 %v2145_v51, %v2056_v10 }
 0x342   :  { %2460 = vmatmul.bf16.gmra.mxu1 %v3797_v13 }
 0x343   :  { %2371 = vmatmul.bf16.gmra.mxu0 %v3795_v12  ;;  %v2784_v52 = vadd.f32 %v2321_v40, %v4144_v41  ;;  %2549 = vmatmul.bf16.gmra.mxu2 %v3799_v14 }
 0x344   :  { %2638 = vmatmul.bf16.gmra.mxu3 %v3801_v15 }
 0x345   :  { %2912 = vst [vmem:[#allocation8 + $0x230] sm:$0xff] %v2784_v52 }
 0x346   :  { %v2234_v21 = vpop.f32.mrf.mxu2 }
 0x347   :  { %v2235_v39 = vadd.f32 %v2234_v21, %v2146_v53  ;;  %v2323_v7 = vpop.f32.mrf.mxu3  ;;  %v2147_v5 = vpop.f32.mrf.mxu1 }
 0x348   :  { %v2058_v16 = vpop.f32.mrf.mxu0 }
 0x349   :  { %v2324_v62 = vadd.f32 %v2323_v7, %v2235_v39  ;;  %v2148_v12 = vadd.f32 %v2147_v5, %v2058_v16 }
 0x34b   :  { %v2788_v43 = vadd.f32 %v2324_v62, %v4144_v41 }
 0x34d   :  { %2916 = vst [vmem:[#allocation8 + $0x250] sm:$0xff] %v2788_v43 }
 0x34e   :  { %v2236_v36 = vpop.f32.mrf.mxu2 }
 0x34f   :  { %v2237_v28 = vadd.f32 %v2236_v36, %v2148_v12  ;;  %v2325_v38 = vpop.f32.mrf.mxu3  ;;  %v2150_v13 = vpop.f32.mrf.mxu1 }
 0x350   :  { %v2061_v61 = vpop.f32.mrf.mxu0 }
 0x351   :  { %v2326_v9 = vadd.f32 %v2325_v38, %v2237_v28  ;;  %v2151_v15 = vadd.f32 %v2150_v13, %v2061_v61 }
 0x352   :  { %2465 = vmatmul.bf16.gmra.mxu1 %v3809_v25 }
 0x353   :  { %2376 = vmatmul.bf16.gmra.mxu0 %v3807_v24  ;;  %v2792_v14 = vadd.f32 %v2326_v9, %v4144_v41  ;;  %2554 = vmatmul.bf16.gmra.mxu2 %v3811_v26 }
 0x354   :  { %2643 = vmatmul.bf16.gmra.mxu3 %v3813_v27 }
 0x355   :  { %2920 = vst [vmem:[#allocation8 + $0x270] sm:$0xff] %v2792_v14 }
 0x356   :  { %v2239_v47 = vpop.f32.mrf.mxu2 }
 0x357   :  { %v2240_v11 = vadd.f32 %v2239_v47, %v2151_v15  ;;  %v2328_v37 = vpop.f32.mrf.mxu3  ;;  %v2152_v10 = vpop.f32.mrf.mxu1 }
 0x358   :  { %v2063_v31 = vpop.f32.mrf.mxu0 }
 0x359   :  { %v2329_v51 = vadd.f32 %v2328_v37, %v2240_v11  ;;  %v2153_v24 = vadd.f32 %v2152_v10, %v2063_v31 }
 0x35b   :  { %v2796_v40 = vadd.f32 %v2329_v51, %v4144_v41 }
 0x35d   :  { %2924 = vst [vmem:[#allocation8 + $0x290] sm:$0xff] %v2796_v40 }
 0x35e   :  { %v2241_v52 = vpop.f32.mrf.mxu2 }
 0x35f   :  { %v2242_v53 = vadd.f32 %v2241_v52, %v2153_v24  ;;  %v2330_v21 = vpop.f32.mrf.mxu3  ;;  %v2155_v25 = vpop.f32.mrf.mxu1 }
 0x360   :  { %v2066_v39 = vpop.f32.mrf.mxu0 }
 0x361   :  { %v2331_v7 = vadd.f32 %v2330_v21, %v2242_v53  ;;  %v2156_v27 = vadd.f32 %v2155_v25, %v2066_v39 }
 0x362   :  { %2470 = vmatmul.bf16.gmra.mxu1 %v3821_v50 }
 0x363   :  { %2381 = vmatmul.bf16.gmra.mxu0 %v3819_v49  ;;  %v2800_v26 = vadd.f32 %v2331_v7, %v4144_v41  ;;  %2559 = vmatmul.bf16.gmra.mxu2 %v3823_v54 }
 0x364   :  { %2648 = vmatmul.bf16.gmra.mxu3 %v3825_v55 }
 0x365   :  { %2928 = vst [vmem:[#allocation8 + $0x2b0] sm:$0xff] %v2800_v26 }
 0x366   :  { %v2244_v16 = vpop.f32.mrf.mxu2 }
 0x367   :  { %v2245_v5 = vadd.f32 %v2244_v16, %v2156_v27  ;;  %v2333_v62 = vpop.f32.mrf.mxu3  ;;  %v2157_v12 = vpop.f32.mrf.mxu1 }
 0x368   :  { %v2068_v43 = vpop.f32.mrf.mxu0 }
 0x369   :  { %v2334_v36 = vadd.f32 %v2333_v62, %v2245_v5  ;;  %v2158_v49 = vadd.f32 %v2157_v12, %v2068_v43 }
 0x36b   :  { %v2804_v28 = vadd.f32 %v2334_v36, %v4144_v41 }
 0x36d   :  { %2932 = vst [vmem:[#allocation8 + $0x2d0] sm:$0xff] %v2804_v28 }
 0x36e   :  { %v2246_v38 = vpop.f32.mrf.mxu2 }
 0x36f   :  { %v2247_v61 = vadd.f32 %v2246_v38, %v2158_v49  ;;  %v2335_v13 = vpop.f32.mrf.mxu3  ;;  %v2160_v50 = vpop.f32.mrf.mxu1 }
 0x370   :  { %v2071_v9 = vpop.f32.mrf.mxu0 }
 0x371   :  { %v2336_v14 = vadd.f32 %v2335_v13, %v2247_v61  ;;  %v2161_v55 = vadd.f32 %v2160_v50, %v2071_v9 }
 0x372   :  { %2475 = vmatmul.bf16.gmra.mxu1 %v3833_v1 }
 0x373   :  { %2386 = vmatmul.bf16.gmra.mxu0 %v3831_v0  ;;  %v2808_v54 = vadd.f32 %v2336_v14, %v4144_v41  ;;  %2564 = vmatmul.bf16.gmra.mxu2 %v3835_v2 }
 0x374   :  { %2653 = vmatmul.bf16.gmra.mxu3 %v3837_v3 }
 0x375   :  { %2936 = vst [vmem:[#allocation8 + $0x2f0] sm:$0xff] %v2808_v54 }
 0x376   :  { %v2249_v15 = vpop.f32.mrf.mxu2 }
 0x377   :  { %v2250_v47 = vadd.f32 %v2249_v15, %v2161_v55  ;;  %v2338_v11 = vpop.f32.mrf.mxu3  ;;  %v2162_v31 = vpop.f32.mrf.mxu1 }
 0x378   :  { %v2073_v37 = vpop.f32.mrf.mxu0 }
 0x379   :  { %v2339_v10 = vadd.f32 %v2338_v11, %v2250_v47  ;;  %v2163_v0 = vadd.f32 %v2162_v31, %v2073_v37 }
 0x37b   :  { %v2812_v51 = vadd.f32 %v2339_v10, %v4144_v41 }
 0x37d   :  { %2940 = vst [vmem:[#allocation8 + $0x310] sm:$0xff] %v2812_v51 }
 0x37e   :  { %v2251_v40 = vpop.f32.mrf.mxu2 }
 0x37f   :  { %v2252_v24 = vadd.f32 %v2251_v40, %v2163_v0  ;;  %v2340_v52 = vpop.f32.mrf.mxu3  ;;  %v2165_v1 = vpop.f32.mrf.mxu1 }
 0x380   :  { %v2076_v53 = vpop.f32.mrf.mxu0 }
 0x381   :  { %v2341_v21 = vadd.f32 %v2340_v52, %v2252_v24  ;;  %v2166_v3 = vadd.f32 %v2165_v1, %v2076_v53 }
 0x382   :  { %2480 = vmatmul.bf16.gmra.mxu1 %v3845_v33 }
 0x383   :  { %2391 = vmatmul.bf16.gmra.mxu0 %v3843_v32  ;;  %v2816_v2 = vadd.f32 %v2341_v21, %v4144_v41  ;;  %2569 = vmatmul.bf16.gmra.mxu2 %v3847_v34 }
 0x384   :  { %2658 = vmatmul.bf16.gmra.mxu3 %v3849_v35 }
 0x385   :  { %2944 = vst [vmem:[#allocation8 + $0x330] sm:$0xff] %v2816_v2 }
 0x386   :  { %v2254_v39 = vpop.f32.mrf.mxu2 }
 0x387   :  { %v2255_v25 = vadd.f32 %v2254_v39, %v2166_v3  ;;  %v2343_v7 = vpop.f32.mrf.mxu3  ;;  %v2167_v27 = vpop.f32.mrf.mxu1 }
 0x388   :  { %v2078_v26 = vpop.f32.mrf.mxu0 }
 0x389   :  { %v2344_v16 = vadd.f32 %v2343_v7, %v2255_v25  ;;  %v2168_v32 = vadd.f32 %v2167_v27, %v2078_v26  ;;  %v3640_v25 = vld [vmem:[#allocation7] sm:$0xf] }
 0x38a   :  { %v4242_v7 = vperm.slane %v3640_v25, 3 }
 0x38b   :  { %v2820_v5 = vadd.f32 %v2344_v16, %v4144_v41 }
 0x38d   :  { %2948 = vst [vmem:[#allocation8 + $0x350] sm:$0xff] %v2820_v5 }
 0x38e   :  { %v2256_v62 = vpop.f32.mrf.mxu2 }
 0x38f   :  { %v2257_v43 = vadd.f32 %v2256_v62, %v2168_v32  ;;  %v2345_v12 = vpop.f32.mrf.mxu3  ;;  %v2170_v33 = vpop.f32.mrf.mxu1 }
 0x390   :  { %v2081_v36 = vpop.f32.mrf.mxu0 }
 0x391   :  { %v2346_v28 = vadd.f32 %v2345_v12, %v2257_v43  ;;  %v2171_v35 = vadd.f32 %v2170_v33, %v2081_v36  ;;  %v4432_v33 = vld [vmem:[#allocation12_spill] sm:$0xff] }
 0x392   :  { %2485 = vmatmul.bf16.gmra.mxu1 %v3857_v45 }
 0x393   :  { %2396 = vmatmul.bf16.gmra.mxu0 %v3855_v44  ;;  %v2824_v34 = vadd.f32 %v2346_v28, %v4144_v41  ;;  %2574 = vmatmul.bf16.gmra.mxu2 %v3859_v46  ;;  %v4433_v28 = vld [vmem:[#allocation13_spill] sm:$0xff] }
 0x394   :  { %2663 = vmatmul.bf16.gmra.mxu3 %v3861_v48 }
 0x395   :  { %2952 = vst [vmem:[#allocation8 + $0x370] sm:$0xff] %v2824_v34  ;;  %v4434_v34 = vld [vmem:[#allocation14_spill] sm:$0xff] }
 0x396   :  { %v2259_v49 = vpop.f32.mrf.mxu2 }
 0x397   :  { %v2260_v38 = vadd.f32 %v2259_v49, %v2171_v35  ;;  %v2348_v61 = vpop.f32.mrf.mxu3  ;;  %v2172_v9 = vpop.f32.mrf.mxu1 }
 0x398   :  { %v2083_v13 = vpop.f32.mrf.mxu0 }
 0x399   :  { %v2349_v50 = vadd.f32 %v2348_v61, %v2260_v38  ;;  %v2173_v44 = vadd.f32 %v2172_v9, %v2083_v13 }
 0x39b   :  { %v2828_v14 = vadd.f32 %v2349_v50, %v4144_v41 }
 0x39d   :  { %2956 = vst [vmem:[#allocation8 + $0x390] sm:$0xff] %v2828_v14 }
 0x39e   :  { %v2261_v54 = vpop.f32.mrf.mxu2 }
 0x39f   :  { %v2262_v55 = vadd.f32 %v2261_v54, %v2173_v44  ;;  %v2350_v15 = vpop.f32.mrf.mxu3  ;;  %v2175_v45 = vpop.f32.mrf.mxu1 }
 0x3a0   :  { %v2086_v47 = vpop.f32.mrf.mxu0 }
 0x3a1   :  { %v2351_v11 = vadd.f32 %v2350_v15, %v2262_v55  ;;  %v2176_v48 = vadd.f32 %v2175_v45, %v2086_v47  ;;  %v4435_v45 = vld [vmem:[#allocation15_spill] sm:$0xff] }
 0x3a2   :  { %2490 = vmatmul.bf16.gmra.mxu1 %v3875_v22 }
 0x3a3   :  { %2401 = vmatmul.bf16.gmra.mxu0 %v3873_v18  ;;  %v2832_v46 = vadd.f32 %v2351_v11, %v4144_v41  ;;  %2579 = vmatmul.bf16.gmra.mxu2 %v3877_v23 }
 0x3a4   :  { %2668 = vmatmul.bf16.gmra.mxu3 %v3879_v29 }
 0x3a5   :  { %2960 = vst [vmem:[#allocation8 + $0x3b0] sm:$0xff] %v2832_v46 }
 0x3a6   :  { %v2264_v37 = vpop.f32.mrf.mxu2 }
 0x3a7   :  { %v2265_v31 = vadd.f32 %v2264_v37, %v2176_v48  ;;  %v2353_v10 = vpop.f32.mrf.mxu3  ;;  %v2177_v0 = vpop.f32.mrf.mxu1  ;;  %v4436_v48 = vld [vmem:[#allocation16_spill] sm:$0xff]  ;;  %v4437_v37 = vld [vmem:[#allocation17_spill] sm:$0xff] }
 0x3a8   :  { %v2088_v51 = vpop.f32.mrf.mxu0 }
 0x3a9   :  { %v2354_v40 = vadd.f32 %v2353_v10, %v2265_v31  ;;  %v2178_v18 = vadd.f32 %v2177_v0, %v2088_v51  ;;  %v4438_v31 = vld [vmem:[#allocation18_spill] sm:$0xff] }
 0x3ab   :  { %v2836_v24 = vadd.f32 %v2354_v40, %v4144_v41 }
 0x3ad   :  { %2964 = vst [vmem:[#allocation8 + $0x3d0] sm:$0xff] %v2836_v24 }
 0x3ae   :  { %v2266_v52 = vpop.f32.mrf.mxu2 }
 0x3af   :  { %v2267_v53 = vadd.f32 %v2266_v52, %v2178_v18  ;;  %v2355_v1 = vpop.f32.mrf.mxu3  ;;  %v2456_v22 = vpop.f32.mrf.mxu1 }
 0x3b0   :  { %v2367_v21 = vpop.f32.mrf.mxu0 }
 0x3b1   :  { %v2356_v2 = vadd.f32 %v2355_v1, %v2267_v53  ;;  %v2457_v29 = vadd.f32 %v2456_v22, %v2367_v21 }
 0x3b2   :  { %2495 = vmatmul.bf16.gmra.mxu1 %v3887_v56 }
 0x3b3   :  { %2406 = vmatmul.bf16.gmra.mxu0 %v3885_v42  ;;  %v2840_v23 = vadd.f32 %v2356_v2, %v4144_v41  ;;  %2584 = vmatmul.bf16.gmra.mxu2 %v3889_v57 }
 0x3b4   :  { %2673 = vmatmul.bf16.gmra.mxu3 %v3891_v59 }
 0x3b5   :  { %2968 = vst [vmem:[#allocation8 + $0x3f0] sm:$0xff] %v2840_v23 }
 0x3b6   :  { %v2545_v3 = vpop.f32.mrf.mxu2 }
 0x3b7   :  { %v2546_v39 = vadd.f32 %v2545_v3, %v2457_v29  ;;  %v2634_v26 = vpop.f32.mrf.mxu3  ;;  %v2458_v16 = vpop.f32.mrf.mxu1  ;;  %v4439_v3 = vld [vmem:[#allocation19_spill] sm:$0xff] }
 0x3b8   :  { %v2369_v27 = vpop.f32.mrf.mxu0 }
 0x3b9   :  { %v2635_v5 = vadd.f32 %v2634_v26, %v2546_v39  ;;  %v2459_v41 = vadd.f32 %v2458_v16, %v2369_v27  ;;  %v4440_v26 = vld [vmem:[#allocation20_spill] sm:$0xff]  ;;  %v4441_v27 = vld [vmem:[#allocation21_spill] sm:$0xff]  ;;  %v4442_v16 = vld [vmem:[#allocation22_spill] sm:$0xff] }
 0x3bb   :  { %v2717_v42 = vadd.f32 %v2635_v5, %v4242_v7 }
 0x3bd   :  { %2845 = vst [vmem:[#allocation8 + $0x18] sm:$0xff] %v2717_v42 }
 0x3be   :  { %v2547_v32 = vpop.f32.mrf.mxu2 }
 0x3bf   :  { %v2548_v56 = vadd.f32 %v2547_v32, %v2459_v41  ;;  %v2636_v62 = vpop.f32.mrf.mxu3  ;;  %v2461_v43 = vpop.f32.mrf.mxu1 }
 0x3c0   :  { %v2372_v57 = vpop.f32.mrf.mxu0 }
 0x3c1   :  { %v2637_v59 = vadd.f32 %v2636_v62, %v2548_v56  ;;  %v2462_v36 = vadd.f32 %v2461_v43, %v2372_v57 }
 0x3c2   :  { %2500 = vmatmul.bf16.gmra.mxu1 %v4432_v33 }
 0x3c3   :  { %2411 = vmatmul.bf16.gmra.mxu0 %v3898_v58  ;;  %v2721_v12 = vadd.f32 %v2637_v59, %v4242_v7  ;;  %2589 = vmatmul.bf16.gmra.mxu2 %v4433_v28 }
 0x3c4   :  { %2678 = vmatmul.bf16.gmra.mxu3 %v4434_v34 }
 0x3c5   :  { %2849 = vst [vmem:[#allocation8 + $0x38] sm:$0xff] %v2721_v12 }
 0x3c6   :  { %v2550_v35 = vpop.f32.mrf.mxu2 }
 0x3c7   :  { %v2551_v49 = vadd.f32 %v2550_v35, %v2462_v36  ;;  %v2639_v38 = vpop.f32.mrf.mxu3  ;;  %v2463_v13 = vpop.f32.mrf.mxu1  ;;  %v4443_v35 = vld [vmem:[#allocation23_spill] sm:$0xff] }
 0x3c8   :  { %v2374_v61 = vpop.f32.mrf.mxu0 }
 0x3c9   :  { %v2640_v9 = vadd.f32 %v2639_v38, %v2551_v49  ;;  %v2464_v58 = vadd.f32 %v2463_v13, %v2374_v61  ;;  %v4444_v61 = vld [vmem:[#allocation24_spill] sm:$0xff]  ;;  %v4445_v13 = vld [vmem:[#allocation25_spill] sm:$0xff] }
 0x3cb   :  { %v2725_v50 = vadd.f32 %v2640_v9, %v4242_v7  ;;  %v4446_v9 = vld [vmem:[#allocation26_spill] sm:$0xff] }
 0x3cd   :  { %2853 = vst [vmem:[#allocation8 + $0x58] sm:$0xff] %v2725_v50 }
 0x3ce   :  { %v2552_v14 = vpop.f32.mrf.mxu2 }
 0x3cf   :  { %v2553_v44 = vadd.f32 %v2552_v14, %v2464_v58  ;;  %v2641_v54 = vpop.f32.mrf.mxu3  ;;  %v2466_v15 = vpop.f32.mrf.mxu1 }
 0x3d0   :  { %v2377_v55 = vpop.f32.mrf.mxu0 }
 0x3d1   :  { %v2642_v47 = vadd.f32 %v2641_v54, %v2553_v44  ;;  %v2467_v46 = vadd.f32 %v2466_v15, %v2377_v55 }
 0x3d2   :  { %2505 = vmatmul.bf16.gmra.mxu1 %v4436_v48 }
 0x3d3   :  { %2416 = vmatmul.bf16.gmra.mxu0 %v4435_v45  ;;  %v2729_v11 = vadd.f32 %v2642_v47, %v4242_v7  ;;  %2594 = vmatmul.bf16.gmra.mxu2 %v4437_v37 }
 0x3d4   :  { %2683 = vmatmul.bf16.gmra.mxu3 %v4438_v31 }
 0x3d5   :  { %2857 = vst [vmem:[#allocation8 + $0x78] sm:$0xff] %v2729_v11 }
 0x3d6   :  { %v2555_v10 = vpop.f32.mrf.mxu2 }
 0x3d7   :  { %v2556_v51 = vadd.f32 %v2555_v10, %v2467_v46  ;;  %v2644_v0 = vpop.f32.mrf.mxu3  ;;  %v2468_v24 = vpop.f32.mrf.mxu1 }
 0x3d8   :  { %v2379_v40 = vpop.f32.mrf.mxu0 }
 0x3d9   :  { %v2645_v18 = vadd.f32 %v2644_v0, %v2556_v51  ;;  %v2469_v53 = vadd.f32 %v2468_v24, %v2379_v40 }
 0x3db   :  { %v2733_v52 = vadd.f32 %v2645_v18, %v4242_v7 }
 0x3dd   :  { %2861 = vst [vmem:[#allocation8 + $0x98] sm:$0xff] %v2733_v52 }
 0x3de   :  { %v2557_v1 = vpop.f32.mrf.mxu2 }
 0x3df   :  { %v2558_v21 = vadd.f32 %v2557_v1, %v2469_v53  ;;  %v2646_v22 = vpop.f32.mrf.mxu3  ;;  %v2471_v23 = vpop.f32.mrf.mxu1 }
 0x3e0   :  { %v2382_v2 = vpop.f32.mrf.mxu0 }
 0x3e1   :  { %v2647_v29 = vadd.f32 %v2646_v22, %v2558_v21  ;;  %v2472_v25 = vadd.f32 %v2471_v23, %v2382_v2 }
 0x3e2   :  { %2510 = vmatmul.bf16.gmra.mxu1 %v4440_v26 }
 0x3e3   :  { %2421 = vmatmul.bf16.gmra.mxu0 %v4439_v3  ;;  %v2737_v39 = vadd.f32 %v2647_v29, %v4242_v7  ;;  %2599 = vmatmul.bf16.gmra.mxu2 %v4441_v27 }
 0x3e4   :  { %2688 = vmatmul.bf16.gmra.mxu3 %v4442_v16 }
 0x3e5   :  { %2865 = vst [vmem:[#allocation8 + $0xb8] sm:$0xff] %v2737_v39  ;;  %v4448_v39 = vld [vmem:[#allocation32_spill] sm:$0xff] }
 0x3e6   :  { %v2560_v5 = vpop.f32.mrf.mxu2 }
 0x3e7   :  { %v2561_v42 = vadd.f32 %v2560_v5, %v2472_v25  ;;  %v2649_v41 = vpop.f32.mrf.mxu3  ;;  %v2473_v56 = vpop.f32.mrf.mxu1  ;;  %v4449_v25 = vld [vmem:[#allocation34_spill] sm:$0xff] }
 0x3e8   :  { %v2384_v32 = vpop.f32.mrf.mxu0 }
 0x3e9   :  { %v2650_v62 = vadd.f32 %v2649_v41, %v2561_v42  ;;  %v2474_v43 = vadd.f32 %v2473_v56, %v2384_v32 }
 0x3eb   :  { %v2741_v57 = vadd.f32 %v2650_v62, %v4242_v7 }
 0x3ed   :  { %2869 = vst [vmem:[#allocation8 + $0xd8] sm:$0xff] %v2741_v57 }
 0x3ee   :  { %v2562_v59 = vpop.f32.mrf.mxu2 }
 0x3ef   :  { %v2563_v12 = vadd.f32 %v2562_v59, %v2474_v43  ;;  %v2651_v36 = vpop.f32.mrf.mxu3  ;;  %v2476_v28 = vpop.f32.mrf.mxu1 }
 0x3f0   :  { %v2387_v33 = vpop.f32.mrf.mxu0 }
 0x3f1   :  { %v2652_v34 = vadd.f32 %v2651_v36, %v2563_v12  ;;  %v2477_v38 = vadd.f32 %v2476_v28, %v2387_v33 }
 0x3f2   :  { %2515 = vmatmul.bf16.gmra.mxu1 %v4444_v61 }
 0x3f3   :  { %2426 = vmatmul.bf16.gmra.mxu0 %v4443_v35  ;;  %v2745_v49 = vadd.f32 %v2652_v34, %v4242_v7  ;;  %2604 = vmatmul.bf16.gmra.mxu2 %v4445_v13 }
 0x3f4   :  { %2693 = vmatmul.bf16.gmra.mxu3 %v4446_v9 }
 0x3f5   :  { %2873 = vst [vmem:[#allocation8 + $0xf8] sm:$0xff] %v2745_v49 }
 0x3f6   :  { %v2565_v50 = vpop.f32.mrf.mxu2 }
 0x3f7   :  { %v2566_v58 = vadd.f32 %v2565_v50, %v2477_v38  ;;  %v2654_v14 = vpop.f32.mrf.mxu3  ;;  %v2478_v54 = vpop.f32.mrf.mxu1 }
 0x3f8   :  { %v2389_v44 = vpop.f32.mrf.mxu0 }
 0x3f9   :  { %v2655_v55 = vadd.f32 %v2654_v14, %v2566_v58  ;;  %v2479_v47 = vadd.f32 %v2478_v54, %v2389_v44 }
 0x3fb   :  { %v2749_v15 = vadd.f32 %v2655_v55, %v4242_v7 }
 0x3fd   :  { %2877 = vst [vmem:[#allocation8 + $0x118] sm:$0xff] %v2749_v15 }
 0x3fe   :  { %v2567_v45 = vpop.f32.mrf.mxu2 }
 0x3ff   :  { %v2568_v11 = vadd.f32 %v2567_v45, %v2479_v47  ;;  %v2656_v46 = vpop.f32.mrf.mxu3  ;;  %v2481_v37 = vpop.f32.mrf.mxu1 }
 0x400   :  { %v2392_v48 = vpop.f32.mrf.mxu0 }
 0x401   :  { %v2657_v31 = vadd.f32 %v2656_v46, %v2568_v11  ;;  %v2482_v51 = vadd.f32 %v2481_v37, %v2392_v48 }
 0x402   :  { %2520 = vmatmul.bf16.gmra.mxu1 %v4425_v6 }
 0x403   :  { %2431 = vmatmul.bf16.gmra.mxu0 %v4424_v63  ;;  %v2753_v10 = vadd.f32 %v2657_v31, %v4242_v7  ;;  %2609 = vmatmul.bf16.gmra.mxu2 %v4426_v19  ;;  %v4447_v19 = vld [vmem:[#allocation31_spill] sm:$0xff] }
 0x404   :  { %2698 = vmatmul.bf16.gmra.mxu3 %v4427_v8 }
 0x405   :  { %2881 = vst [vmem:[#allocation8 + $0x138] sm:$0xff] %v2753_v10 }
 0x406   :  { %v2570_v0 = vpop.f32.mrf.mxu2 }
 0x407   :  { %v2571_v40 = vadd.f32 %v2570_v0, %v2482_v51  ;;  %v2659_v24 = vpop.f32.mrf.mxu3  ;;  %v2483_v52 = vpop.f32.mrf.mxu1 }
 0x408   :  { %v2394_v18 = vpop.f32.mrf.mxu0 }
 0x409   :  { %v2660_v53 = vadd.f32 %v2659_v24, %v2571_v40  ;;  %v2484_v63 = vadd.f32 %v2483_v52, %v2394_v18 }
 0x40b   :  { %v2757_v1 = vadd.f32 %v2660_v53, %v4242_v7 }
 0x40d   :  { %2885 = vst [vmem:[#allocation8 + $0x158] sm:$0xff] %v2757_v1 }
 0x40e   :  { %v2572_v21 = vpop.f32.mrf.mxu2 }
 0x40f   :  { %v2573_v22 = vadd.f32 %v2572_v21, %v2484_v63  ;;  %v2661_v2 = vpop.f32.mrf.mxu3  ;;  %v2486_v6 = vpop.f32.mrf.mxu1 }
 0x410   :  { %v2397_v23 = vpop.f32.mrf.mxu0 }
 0x411   :  { %v2662_v29 = vadd.f32 %v2661_v2, %v2573_v22  ;;  %v2487_v3 = vadd.f32 %v2486_v6, %v2397_v23 }
 0x412   :  { %2525 = vmatmul.bf16.gmra.mxu1 %v4448_v39 }
 0x413   :  { %2436 = vmatmul.bf16.gmra.mxu0 %v4447_v19  ;;  %v2761_v8 = vadd.f32 %v2662_v29, %v4242_v7  ;;  %2614 = vmatmul.bf16.gmra.mxu2 %v4430_v30 }
 0x414   :  { %2703 = vmatmul.bf16.gmra.mxu3 %v4449_v25 }
 0x415   :  { %2889 = vst [vmem:[#allocation8 + $0x178] sm:$0xff] %v2761_v8 }
 0x416   :  { %v2575_v26 = vpop.f32.mrf.mxu2 }
 0x417   :  { %v2576_v27 = vadd.f32 %v2575_v26, %v2487_v3  ;;  %v2664_v16 = vpop.f32.mrf.mxu3  ;;  %v2488_v42 = vpop.f32.mrf.mxu1 }
 0x418   :  { %v2399_v5 = vpop.f32.mrf.mxu0 }
 0x419   :  { %v2665_v41 = vadd.f32 %v2664_v16, %v2576_v27  ;;  %v2489_v56 = vadd.f32 %v2488_v42, %v2399_v5 }
 0x41b   :  { %v2765_v32 = vadd.f32 %v2665_v41, %v4242_v7 }
 0x41d   :  { %2893 = vst [vmem:[#allocation8 + $0x198] sm:$0xff] %v2765_v32 }
 0x41e   :  { %v2577_v62 = vpop.f32.mrf.mxu2 }
 0x41f   :  { %v2578_v57 = vadd.f32 %v2577_v62, %v2489_v56  ;;  %v2666_v43 = vpop.f32.mrf.mxu3  ;;  %v2491_v12 = vpop.f32.mrf.mxu1 }
 0x420   :  { %v2402_v59 = vpop.f32.mrf.mxu0 }
 0x421   :  { %v2667_v36 = vadd.f32 %v2666_v43, %v2578_v57  ;;  %v2492_v33 = vadd.f32 %v2491_v12, %v2402_v59 }
 0x422   :  { %2530 = vmatmul.bf16.gmra.mxu1 %v3984_v4 }
 0x423   :  { %2441 = vmatmul.bf16.gmra.mxu0 %v3982_v20  ;;  %v2769_v30 = vadd.f32 %v2667_v36, %v4242_v7  ;;  %2619 = vmatmul.bf16.gmra.mxu2 %v3986_v17 }
 0x424   :  { %2708 = vmatmul.bf16.gmra.mxu3 %v3988_v60 }
 0x425   :  { %2897 = vst [vmem:[#allocation8 + $0x1b8] sm:$0xff] %v2769_v30 }
 0x426   :  { %v2580_v28 = vpop.f32.mrf.mxu2 }
 0x427   :  { %v2581_v34 = vadd.f32 %v2580_v28, %v2492_v33  ;;  %v2669_v35 = vpop.f32.mrf.mxu3  ;;  %v2493_v38 = vpop.f32.mrf.mxu1 }
 0x428   :  { %v2404_v49 = vpop.f32.mrf.mxu0 }
 0x429   :  { %v2670_v61 = vadd.f32 %v2669_v35, %v2581_v34  ;;  %v2494_v20 = vadd.f32 %v2493_v38, %v2404_v49 }
 0x42b   :  { %v2773_v13 = vadd.f32 %v2670_v61, %v4242_v7 }
 0x42d   :  { %2901 = vst [vmem:[#allocation8 + $0x1d8] sm:$0xff] %v2773_v13 }
 0x42e   :  { %v2582_v9 = vpop.f32.mrf.mxu2 }
 0x42f   :  { %v2583_v50 = vadd.f32 %v2582_v9, %v2494_v20  ;;  %v2671_v58 = vpop.f32.mrf.mxu3  ;;  %v2496_v4 = vpop.f32.mrf.mxu1 }
 0x430   :  { %v2407_v14 = vpop.f32.mrf.mxu0 }
 0x431   :  { %v2672_v44 = vadd.f32 %v2671_v58, %v2583_v50  ;;  %v2497_v60 = vadd.f32 %v2496_v4, %v2407_v14 }
 0x433   :  { %v2777_v17 = vadd.f32 %v2672_v44, %v4242_v7 }
 0x435   :  { %2905 = vst [vmem:[#allocation8 + $0x1f8] sm:$0xff] %v2777_v17 }
 0x436   :  { %v2585_v54 = vpop.f32.mrf.mxu2 }
 0x437   :  { %v2586_v55 = vadd.f32 %v2585_v54, %v2497_v60  ;;  %v2674_v15 = vpop.f32.mrf.mxu3  ;;  %v2498_v45 = vpop.f32.mrf.mxu1 }
 0x438   :  { %v2409_v47 = vpop.f32.mrf.mxu0 }
 0x439   :  { %v2675_v11 = vadd.f32 %v2674_v15, %v2586_v55  ;;  %v2499_v48 = vadd.f32 %v2498_v45, %v2409_v47 }
 0x43b   :  { %v2781_v46 = vadd.f32 %v2675_v11, %v4242_v7 }
 0x43d   :  { %2909 = vst [vmem:[#allocation8 + $0x218] sm:$0xff] %v2781_v46 }
 0x43e   :  { %v2587_v37 = vpop.f32.mrf.mxu2 }
 0x43f   :  { %v2588_v31 = vadd.f32 %v2587_v37, %v2499_v48  ;;  %v2676_v10 = vpop.f32.mrf.mxu3  ;;  %v2501_v0 = vpop.f32.mrf.mxu1 }
 0x440   :  { %v2412_v51 = vpop.f32.mrf.mxu0 }
 0x441   :  { %v2677_v40 = vadd.f32 %v2676_v10, %v2588_v31  ;;  %v2502_v18 = vadd.f32 %v2501_v0, %v2412_v51 }
 0x443   :  { %v2785_v24 = vadd.f32 %v2677_v40, %v4242_v7 }
 0x445   :  { %2913 = vst [vmem:[#allocation8 + $0x238] sm:$0xff] %v2785_v24 }
 0x446   :  { %v2590_v52 = vpop.f32.mrf.mxu2 }
 0x447   :  { %v2591_v53 = vadd.f32 %v2590_v52, %v2502_v18  ;;  %v2679_v1 = vpop.f32.mrf.mxu3  ;;  %v2503_v21 = vpop.f32.mrf.mxu1 }
 0x448   :  { %v2414_v63 = vpop.f32.mrf.mxu0 }
 0x449   :  { %v2680_v22 = vadd.f32 %v2679_v1, %v2591_v53  ;;  %v2504_v23 = vadd.f32 %v2503_v21, %v2414_v63 }
 0x44b   :  { %v2789_v2 = vadd.f32 %v2680_v22, %v4242_v7 }
 0x44d   :  { %2917 = vst [vmem:[#allocation8 + $0x258] sm:$0xff] %v2789_v2 }
 0x44e   :  { %v2592_v6 = vpop.f32.mrf.mxu2 }
 0x44f   :  { %v2593_v29 = vadd.f32 %v2592_v6, %v2504_v23  ;;  %v2681_v19 = vpop.f32.mrf.mxu3  ;;  %v2506_v3 = vpop.f32.mrf.mxu1 }
 0x450   :  { %v2417_v8 = vpop.f32.mrf.mxu0 }
 0x451   :  { %v2682_v39 = vadd.f32 %v2681_v19, %v2593_v29  ;;  %v2507_v26 = vadd.f32 %v2506_v3, %v2417_v8 }
 0x453   :  { %v2793_v25 = vadd.f32 %v2682_v39, %v4242_v7 }
 0x455   :  { %2921 = vst [vmem:[#allocation8 + $0x278] sm:$0xff] %v2793_v25 }
 0x456   :  { %v2595_v27 = vpop.f32.mrf.mxu2 }
 0x457   :  { %v2596_v16 = vadd.f32 %v2595_v27, %v2507_v26  ;;  %v2684_v5 = vpop.f32.mrf.mxu3  ;;  %v2508_v41 = vpop.f32.mrf.mxu1 }
 0x458   :  { %v2419_v42 = vpop.f32.mrf.mxu0 }
 0x459   :  { %v2685_v32 = vadd.f32 %v2684_v5, %v2596_v16  ;;  %v2509_v62 = vadd.f32 %v2508_v41, %v2419_v42 }
 0x45b   :  { %v2797_v56 = vadd.f32 %v2685_v32, %v4242_v7 }
 0x45d   :  { %2925 = vst [vmem:[#allocation8 + $0x298] sm:$0xff] %v2797_v56 }
 0x45e   :  { %v2597_v57 = vpop.f32.mrf.mxu2 }
 0x45f   :  { %v2598_v43 = vadd.f32 %v2597_v57, %v2509_v62  ;;  %v2686_v59 = vpop.f32.mrf.mxu3  ;;  %v2511_v36 = vpop.f32.mrf.mxu1 }
 0x460   :  { %v2422_v12 = vpop.f32.mrf.mxu0 }
 0x461   :  { %v2687_v30 = vadd.f32 %v2686_v59, %v2598_v43  ;;  %v2512_v28 = vadd.f32 %v2511_v36, %v2422_v12 }
 0x463   :  { %v2801_v33 = vadd.f32 %v2687_v30, %v4242_v7 }
 0x465   :  { %2929 = vst [vmem:[#allocation8 + $0x2b8] sm:$0xff] %v2801_v33 }
 0x466   :  { %v2600_v34 = vpop.f32.mrf.mxu2 }
 0x467   :  { %v2601_v35 = vadd.f32 %v2600_v34, %v2512_v28  ;;  %v2689_v49 = vpop.f32.mrf.mxu3  ;;  %v2513_v61 = vpop.f32.mrf.mxu1 }
 0x468   :  { %v2424_v38 = vpop.f32.mrf.mxu0 }
 0x469   :  { %v2690_v13 = vadd.f32 %v2689_v49, %v2601_v35  ;;  %v2514_v9 = vadd.f32 %v2513_v61, %v2424_v38 }
 0x46b   :  { %v2805_v20 = vadd.f32 %v2690_v13, %v4242_v7 }
 0x46d   :  { %2933 = vst [vmem:[#allocation8 + $0x2d8] sm:$0xff] %v2805_v20 }
 0x46e   :  { %v2602_v50 = vpop.f32.mrf.mxu2 }
 0x46f   :  { %v2603_v58 = vadd.f32 %v2602_v50, %v2514_v9  ;;  %v2691_v14 = vpop.f32.mrf.mxu3  ;;  %v2516_v44 = vpop.f32.mrf.mxu1 }
 0x470   :  { %v2427_v4 = vpop.f32.mrf.mxu0 }
 0x471   :  { %v2692_v17 = vadd.f32 %v2691_v14, %v2603_v58  ;;  %v2517_v54 = vadd.f32 %v2516_v44, %v2427_v4 }
 0x473   :  { %v2809_v60 = vadd.f32 %v2692_v17, %v4242_v7 }
 0x475   :  { %2937 = vst [vmem:[#allocation8 + $0x2f8] sm:$0xff] %v2809_v60 }
 0x476   :  { %v2605_v55 = vpop.f32.mrf.mxu2 }
 0x477   :  { %v2606_v15 = vadd.f32 %v2605_v55, %v2517_v54  ;;  %v2694_v47 = vpop.f32.mrf.mxu3  ;;  %v2518_v11 = vpop.f32.mrf.mxu1 }
 0x478   :  { %v2429_v45 = vpop.f32.mrf.mxu0 }
 0x479   :  { %v2695_v46 = vadd.f32 %v2694_v47, %v2606_v15  ;;  %v2519_v37 = vadd.f32 %v2518_v11, %v2429_v45 }
 0x47b   :  { %v2813_v48 = vadd.f32 %v2695_v46, %v4242_v7 }
 0x47d   :  { %2941 = vst [vmem:[#allocation8 + $0x318] sm:$0xff] %v2813_v48 }
 0x47e   :  { %v2607_v31 = vpop.f32.mrf.mxu2 }
 0x47f   :  { %v2608_v10 = vadd.f32 %v2607_v31, %v2519_v37  ;;  %v2696_v51 = vpop.f32.mrf.mxu3  ;;  %v2521_v40 = vpop.f32.mrf.mxu1 }
 0x480   :  { %v2432_v0 = vpop.f32.mrf.mxu0 }
 0x481   :  { %v2697_v24 = vadd.f32 %v2696_v51, %v2608_v10  ;;  %v2522_v52 = vadd.f32 %v2521_v40, %v2432_v0 }
 0x483   :  { %v2817_v18 = vadd.f32 %v2697_v24, %v4242_v7 }
 0x485   :  { %2945 = vst [vmem:[#allocation8 + $0x338] sm:$0xff] %v2817_v18 }
 0x486   :  { %v2610_v53 = vpop.f32.mrf.mxu2 }
 0x487   :  { %v2611_v1 = vadd.f32 %v2610_v53, %v2522_v52  ;;  %v2699_v63 = vpop.f32.mrf.mxu3  ;;  %v2523_v22 = vpop.f32.mrf.mxu1 }
 0x488   :  { %v2434_v21 = vpop.f32.mrf.mxu0 }
 0x489   :  { %v2700_v2 = vadd.f32 %v2699_v63, %v2611_v1  ;;  %v2524_v6 = vadd.f32 %v2523_v22, %v2434_v21 }
 0x48b   :  { %v2821_v23 = vadd.f32 %v2700_v2, %v4242_v7 }
 0x48d   :  { %2949 = vst [vmem:[#allocation8 + $0x358] sm:$0xff] %v2821_v23 }
 0x48e   :  { %v2612_v29 = vpop.f32.mrf.mxu2 }
 0x48f   :  { %v2613_v19 = vadd.f32 %v2612_v29, %v2524_v6  ;;  %v2701_v8 = vpop.f32.mrf.mxu3  ;;  %v2526_v39 = vpop.f32.mrf.mxu1 }
 0x490   :  { %v2437_v3 = vpop.f32.mrf.mxu0 }
 0x491   :  { %v2702_v25 = vadd.f32 %v2701_v8, %v2613_v19  ;;  %v2527_v27 = vadd.f32 %v2526_v39, %v2437_v3 }
 0x493   :  { %v2825_v26 = vadd.f32 %v2702_v25, %v4242_v7 }
 0x495   :  { %2953 = vst [vmem:[#allocation8 + $0x378] sm:$0xff] %v2825_v26 }
 0x496   :  { %v2615_v16 = vpop.f32.mrf.mxu2 }
 0x497   :  { %v2616_v5 = vadd.f32 %v2615_v16, %v2527_v27  ;;  %v2704_v42 = vpop.f32.mrf.mxu3  ;;  %v2528_v32 = vpop.f32.mrf.mxu1 }
 0x498   :  { %v2439_v41 = vpop.f32.mrf.mxu0 }
 0x499   :  { %v2705_v56 = vadd.f32 %v2704_v42, %v2616_v5  ;;  %v2529_v57 = vadd.f32 %v2528_v32, %v2439_v41 }
 0x49b   :  { %v2829_v62 = vadd.f32 %v2705_v56, %v4242_v7 }
 0x49d   :  { %2957 = vst [vmem:[#allocation8 + $0x398] sm:$0xff] %v2829_v62 }
 0x49e   :  { %v2617_v43 = vpop.f32.mrf.mxu2 }
 0x49f   :  { %v2618_v59 = vadd.f32 %v2617_v43, %v2529_v57  ;;  %v2706_v12 = vpop.f32.mrf.mxu3  ;;  %v2531_v30 = vpop.f32.mrf.mxu1 }
 0x4a0   :  { %v2442_v36 = vpop.f32.mrf.mxu0 }
 0x4a1   :  { %v2707_v33 = vadd.f32 %v2706_v12, %v2618_v59  ;;  %v2532_v34 = vadd.f32 %v2531_v30, %v2442_v36 }
 0x4a3   :  { %v2833_v28 = vadd.f32 %v2707_v33, %v4242_v7 }
 0x4a5   :  { %2961 = vst [vmem:[#allocation8 + $0x3b8] sm:$0xff] %v2833_v28 }
 0x4a6   :  { %v2620_v35 = vpop.f32.mrf.mxu2 }
 0x4a7   :  { %v2621_v49 = vadd.f32 %v2620_v35, %v2532_v34  ;;  %v2709_v38 = vpop.f32.mrf.mxu3  ;;  %v2533_v20 = vpop.f32.mrf.mxu1 }
 0x4a8   :  { %v2444_v13 = vpop.f32.mrf.mxu0 }
 0x4a9   :  { %v2710_v61 = vadd.f32 %v2709_v38, %v2621_v49  ;;  %v2534_v50 = vadd.f32 %v2533_v20, %v2444_v13 }
 0x4ab   :  { %v2837_v9 = vadd.f32 %v2710_v61, %v4242_v7 }
 0x4ad   :  { %2965 = vst [vmem:[#allocation8 + $0x3d8] sm:$0xff] %v2837_v9 }
 0x4ae   :  { %v2622_v58 = vpop.f32.mrf.mxu2 }
 0x4af   :  { %v2623_v14 = vadd.f32 %v2622_v58, %v2534_v50  ;;  %v2711_v4 = vpop.f32.mrf.mxu3 }
 0x4b1   :  { %v2712_v44 = vadd.f32 %v2711_v4, %v2623_v14 }
 0x4b3   :  { %v2841_v17 = vadd.f32 %v2712_v44, %v4242_v7 }
 0x4b5   :  { %2969 = vst [vmem:[#allocation8 + $0x3f8] sm:$0xff] %v2841_v17 }
 0x4b6   :  { %2982 = dma.vmem_to_hbm [thread:$0]  %s2975_s29, 16384, %s2977_s5, [#allocation4], %s3747_s24, %s3747_s24, %s3748_s25  }
 0x4b7   :  { %3741 = dma.done.wait [#allocation4], 16384  }
 0x4b8   :  { %3742 = vsyncadd [#allocation4], 4294950912 }
 0x4b9   :  { %2987 = vsyncpa [#allocation3], 1 }
 0x4ba   :  { %2988 = vsyncpa [#allocation6], 1 }
 0x4bb   :  { %2989 = vsyncpa [#allocation4], 1 }

</bundles_post_ra>
